<compile_context>
chip_gen: v6e
topology: v6e:2x2x1
jax: 0.10.0
libtpu: 0.0.40
codegen_flags: <defaults>
</compile_context>

<pallas_src>
import functools

import jax
import jax.numpy as jnp
from jax import lax
from jax.experimental import pallas as pl
from jax.experimental.pallas import tpu as pltpu

LANE = 128                     # lane width / output-channel padding target
TM_MAX = 1024                  # row-tile size for the im2col matmul
VMEM_LIMIT = 32 * 1024 * 1024  # safe on v5e/v6e (128 MiB phys) and v7x (64 MiB)


def _round_up(x, m):
    return (x + m - 1) // m * m


# ----------------------------- Pallas kernels ------------------------------ #

def _matmul_bias_act_kernel(x_ref, w_ref, b_ref, o_ref, *, act):
    """One (TM, K) x (K, 128) tile of the im2col matmul, fused with folded-BN bias
    and (optionally) SiLU.  bf16 operands, f32 MXU accumulation, f32 epilogue."""
    y = jnp.dot(x_ref[...], w_ref[...], preferred_element_type=jnp.float32)
    y = y + b_ref[...]
    if act:
        y = y * jax.nn.sigmoid(y)      # SiLU in f32
    o_ref[...] = y.astype(o_ref.dtype)


def _decode_kernel(raw_ref, grid_ref, stride_ref, o_ref):
    """YOLOXHead inference decode on a (B, TA, 128) tile.
       lanes 0:2  xy  -> (raw + grid) * stride
       lanes 2:4  wh  -> exp(raw) * stride
       lanes 4:   obj/cls (+pad) -> sigmoid(raw)
    Full-width compute + lane-iota select -> single unmasked lane-dense store."""
    raw = raw_ref[...]                       # (B, TA, 128) f32
    g = grid_ref[...][None]                  # (1, TA, 128)  (xy in lanes 0:2, else 0)
    s = stride_ref[...][None]                # (1, TA, 1) -> lane broadcast
    xy = (raw + g) * s
    wh = jnp.exp(raw) * s
    sc = jax.nn.sigmoid(raw)
    c = lax.broadcasted_iota(jnp.int32, raw.shape, 2)
    o_ref[...] = jnp.where(c < 2, xy, jnp.where(c < 4, wh, sc))


# ------------------------------ conv wrapper ------------------------------- #

def _im2col_nhwc(x, k, stride, pad):
    """x: (B, H, W, C) NHWC -> patches (B*Ho*Wo, k*k*C), flatten order (kh, kw, C).
    Slice + concat only (channels stay on the minor axis: no relayout transposes)."""
    B, H, W, C = x.shape
    if k == 1 and stride == 1:
        return x.reshape(B * H * W, C), H, W
    xp = jnp.pad(x, ((0, 0), (pad, pad), (pad, pad), (0, 0)))
    Hp, Wp = H + 2 * pad, W + 2 * pad
    Ho = (Hp - k) // stride + 1
    Wo = (Wp - k) // stride + 1
    cols = []
    for i in range(k):
        for j in range(k):
            cols.append(xp[:, i:i + stride * (Ho - 1) + 1:stride,
                            j:j + stride * (Wo - 1) + 1:stride, :])
    p = jnp.concatenate(cols, axis=-1)            # (B, Ho, Wo, k*k*C)
    return p.reshape(B * Ho * Wo, k * k * C), Ho, Wo


def conv2d(x, wb, *, stride=1, act=True):
    """BaseConv (conv + folded-BN + SiLU) or plain pred conv (act=False).
    x: (B, H, W, Cin) NHWC.  w: (k, k, Cin, Cout) HWIO.  b: (Cout,)."""
    w, b = wb
    k, _, cin, cout = w.shape
    B = x.shape[0]
    pad = (k - 1) // 2
    patches, Ho, Wo = _im2col_nhwc(x, k, stride, pad)
    M, K = patches.shape

    # Lane-dense output: pad Cout to a multiple of 128; slice real channels after.
    Np = _round_up(cout, LANE)
    # Row tiling: one block if small, else TM_MAX-row tiles (parallel -> megacore).
    if M <= TM_MAX:
        tm = _round_up(M, 16)
        Mp = tm
    else:
        tm = TM_MAX
        Mp = _round_up(M, tm)
    if Mp != M:
        patches = jnp.pad(patches, ((0, Mp - M), (0, 0)))

    patches = patches.astype(jnp.bfloat16)
    wm = jnp.pad(w.reshape(K, cout), ((0, 0), (0, Np - cout))).astype(jnp.bfloat16)
    bm = jnp.pad(b.astype(jnp.float32).reshape(1, cout), ((0, 0), (0, Np - cout)))

    out_dtype = jnp.bfloat16 if act else jnp.float32   # bf16 activations, f32 preds
    out_bytes = 2 if act else 4
    y = pl.pallas_call(
        functools.partial(_matmul_bias_act_kernel, act=act),
        out_shape=jax.ShapeDtypeStruct((Mp, Np), out_dtype),
        grid=(Mp // tm, Np // LANE),
        in_specs=[
            pl.BlockSpec((tm, K), lambda i, j: (i, 0)),
            pl.BlockSpec((K, LANE), lambda i, j: (0, j)),
            pl.BlockSpec((1, LANE), lambda i, j: (0, j)),
        ],
        out_specs=pl.BlockSpec((tm, LANE), lambda i, j: (i, j)),
        compiler_params=pltpu.CompilerParams(
            dimension_semantics=("parallel", "parallel"),
            vmem_limit_bytes=VMEM_LIMIT),
        cost_estimate=pl.CostEstimate(
            flops=int(2 * Mp * K * Np),
            transcendentals=int(Mp * Np) if act else 0,
            bytes_accessed=int(Mp * K * 2 + K * Np * 2 + Np * 4 + Mp * Np * out_bytes)),
    )(patches, wm, bm)
    return y[:M, :cout].reshape(B, Ho, Wo, cout)


def upsample2(x):  # nn.Upsample(scale_factor=2, mode="nearest"), NHWC
    return jnp.repeat(jnp.repeat(x, 2, axis=1), 2, axis=2)


# ------------------------------ parameters --------------------------------- #

def _base_conv_params(key, cin, cout, k):
    """Conv2d(no bias, HWIO layout) + BatchNorm2d folded (inference) into (w, b)."""
    kw, kg, kb = jax.random.split(key, 3)
    fan_in = cin * k * k
    w = jax.random.normal(kw, (k, k, cin, cout), jnp.float32) / jnp.sqrt(fan_in)
    gamma = 1.0 + 0.05 * jax.random.normal(kg, (cout,), jnp.float32)
    beta = 0.05 * jax.random.normal(kb, (cout,), jnp.float32)
    mean = jnp.zeros((cout,), jnp.float32)
    var = jnp.ones((cout,), jnp.float32)
    scale = gamma / jnp.sqrt(var + 1e-3)
    return (w * scale[None, None, None, :], beta - mean * scale)


def _pred_conv_params(key, cin, cout):
    """Plain 1x1 Conv2d with bias (cls_pred / reg_pred / obj_pred), HWIO."""
    kw, kb = jax.random.split(key)
    w = jax.random.normal(kw, (1, 1, cin, cout), jnp.float32) / jnp.sqrt(cin)
    b = 0.05 * jax.random.normal(kb, (cout,), jnp.float32)
    return (w, b)


def init_params(key, in_ch=3, num_classes=80, hid=16):
    backbone_defs = {
        "stem":          (in_ch, 8, 3),
        "dark2":         (8, 16, 3),
        "dark3":         (16, 16, 3),
        "dark4":         (16, 32, 3),
        "dark5":         (32, 64, 3),
        "lateral_conv0": (64, 32, 1),
        "C3_p4":         (64, 32, 3),
        "reduce_conv1":  (32, 16, 1),
        "C3_p3":         (32, 16, 3),
        "bu_conv2":      (16, 16, 3),
        "C3_n3":         (32, 32, 3),
        "bu_conv1":      (32, 32, 3),
        "C3_n4":         (64, 64, 3),
    }
    keys = jax.random.split(key, len(backbone_defs) + 1)
    params = {}
    for kk, (name, (ci, co, ks)) in zip(keys[:-1], backbone_defs.items()):
        params[name] = _base_conv_params(kk, ci, co, ks)

    head = []
    for cin, hk in zip((16, 32, 64), jax.random.split(keys[-1], 3)):
        ks = jax.random.split(hk, 8)
        head.append(dict(
            stem=_base_conv_params(ks[0], cin, hid, 1),
            cls_conv0=_base_conv_params(ks[1], hid, hid, 3),
            cls_conv1=_base_conv_params(ks[2], hid, hid, 3),
            reg_conv0=_base_conv_params(ks[3], hid, hid, 3),
            reg_conv1=_base_conv_params(ks[4], hid, hid, 3),
            cls_pred=_pred_conv_params(ks[5], hid, num_classes),
            reg_pred=_pred_conv_params(ks[6], hid, 4),
            obj_pred=_pred_conv_params(ks[7], hid, 1),
        ))
    params["head"] = head
    return params


# --------------------------- head branch fusion ----------------------------- #

def _fuse_head_level(hp, num_classes, hid):
    """Fold the 8 per-level head convs into 3 fused weight sets (conv0, conv1, pred).
    Channel layout after conv0/conv1: [cls branch (hid), reg branch (hid)].
    Pred output layout: [reg(4), obj(1), cls(nc)] -> matches YOLOX channel order."""
    h = hid
    # conv0: cls_conv0 ++ reg_conv0 on Cout (both consume the stem output).
    w0 = jnp.concatenate([hp["cls_conv0"][0], hp["reg_conv0"][0]], axis=-1)
    b0 = jnp.concatenate([hp["cls_conv0"][1], hp["reg_conv0"][1]])
    # conv1: block-diagonal (cls branch keeps to itself, reg branch too).
    w1 = jnp.zeros((3, 3, 2 * h, 2 * h), jnp.float32)
    w1 = w1.at[:, :, :h, :h].set(hp["cls_conv1"][0])
    w1 = w1.at[:, :, h:, h:].set(hp["reg_conv1"][0])
    b1 = jnp.concatenate([hp["cls_conv1"][1], hp["reg_conv1"][1]])
    # pred: 1x1, reg/obj read the reg branch channels, cls reads the cls branch.
    nc = num_classes
    wp = jnp.zeros((1, 1, 2 * h, 5 + nc), jnp.float32)
    wp = wp.at[:, :, h:, 0:4].set(hp["reg_pred"][0])
    wp = wp.at[:, :, h:, 4:5].set(hp["obj_pred"][0])
    wp = wp.at[:, :, :h, 5:].set(hp["cls_pred"][0])
    bp = jnp.concatenate([hp["reg_pred"][1], hp["obj_pred"][1], hp["cls_pred"][1]])
    return (w0, b0), (w1, b1), (wp, bp)


# ------------------------------ forward pass -------------------------------- #

def yolox_forward(params, x, num_classes=80, hid=16):
    p = params
    x = jnp.transpose(x, (0, 2, 3, 1))      # PyTorch NCHW interface -> NHWC, once

    # ---- backbone (CSPDarknet, simplified) ----
    c1 = conv2d(x,  p["stem"],  stride=2)   # /2
    c2 = conv2d(c1, p["dark2"], stride=2)   # /4
    c3 = conv2d(c2, p["dark3"], stride=2)   # /8   (16 ch)
    c4 = conv2d(c3, p["dark4"], stride=2)   # /16  (32 ch)
    c5 = conv2d(c4, p["dark5"], stride=2)   # /32  (64 ch)

    # ---- YOLOPAFPN (NHWC, channel concat on last axis) ----
    fpn5 = conv2d(c5, p["lateral_conv0"])                                      # 64 -> 32
    f_out0 = conv2d(jnp.concatenate([upsample2(fpn5), c4], -1), p["C3_p4"])    # 64 -> 32
    fpn4 = conv2d(f_out0, p["reduce_conv1"])                                   # 32 -> 16
    pan_out2 = conv2d(jnp.concatenate([upsample2(fpn4), c3], -1), p["C3_p3"])  # 32 -> 16
    d2 = conv2d(pan_out2, p["bu_conv2"], stride=2)                             # /16
    pan_out1 = conv2d(jnp.concatenate([d2, fpn4], -1), p["C3_n3"])             # 32 -> 32
    d1 = conv2d(pan_out1, p["bu_conv1"], stride=2)                             # /32
    pan_out0 = conv2d(jnp.concatenate([d1, fpn5], -1), p["C3_n4"])             # 64 -> 64
    fpn_outs = (pan_out2, pan_out1, pan_out0)

    # ---- YOLOXHead (inference), 4 fused conv launches per level ----
    outputs, grids, strides_l = [], [], []
    for lvl, (feat, stride) in enumerate(zip(fpn_outs, (8, 16, 32))):
        hp = p["head"][lvl]
        wb0, wb1, wbp = _fuse_head_level(hp, num_classes, hid)
        xh = conv2d(feat, hp["stem"])                 # 1x1 cin -> hid
        f0 = conv2d(xh, wb0)                          # 3x3 hid -> 2*hid (cls||reg)
        f1 = conv2d(f0, wb1)                          # 3x3 2*hid -> 2*hid (block-diag)
        out = conv2d(f1, wbp, act=False)              # 1x1 2*hid -> (5 + nc)
        B, H, W, C = out.shape
        outputs.append(out.reshape(B, H * W, C))      # anchor order h*W + w (matches torch)
        yv, xv = jnp.meshgrid(jnp.arange(H), jnp.arange(W), indexing="ij")
        grids.append(jnp.stack([xv, yv], -1).reshape(H * W, 2).astype(jnp.float32))
        strides_l.append(jnp.full((H * W, 1), float(stride), jnp.float32))

    out_cat = jnp.concatenate(outputs, axis=1)         # (B, A, 5+nc) f32
    Bsz, A, C = out_cat.shape
    grid_cat = jnp.concatenate(grids, 0)               # (A, 2)
    stride_cat = jnp.concatenate(strides_l, 0)         # (A, 1)

    # pad anchors to a sublane multiple (tile if large) and channels to 128 lanes
    CP = LANE
    Ap = _round_up(A, 8)
    if Ap > TM_MAX:
        ta = TM_MAX
        Ap = _round_up(Ap, ta)
    else:
        ta = Ap
    raw = jnp.pad(out_cat, ((0, 0), (0, Ap - A), (0, CP - C)))
    grid_pad = jnp.pad(grid_cat, ((0, Ap - A), (0, CP - 2)))   # xy in lanes 0:2, else 0
    stride_pad = jnp.pad(stride_cat, ((0, Ap - A), (0, 0)))

    decoded = pl.pallas_call(
        _decode_kernel,
        out_shape=jax.ShapeDtypeStruct((Bsz, Ap, CP), jnp.float32),
        grid=(Ap // ta,),
        in_specs=[
            pl.BlockSpec((Bsz, ta, CP), lambda a: (0, a, 0)),
            pl.BlockSpec((ta, CP), lambda a: (a, 0)),
            pl.BlockSpec((ta, 1), lambda a: (a, 0)),
        ],
        out_specs=pl.BlockSpec((Bsz, ta, CP), lambda a: (0, a, 0)),
        compiler_params=pltpu.CompilerParams(
            dimension_semantics=("parallel",),
            vmem_limit_bytes=VMEM_LIMIT),
        cost_estimate=pl.CostEstimate(
            flops=int(8 * Bsz * Ap * CP),
            transcendentals=int(2 * Bsz * Ap * CP),
            bytes_accessed=int(2 * Bsz * Ap * CP * 4 + Ap * (CP + 1) * 4)),
    )(raw, grid_pad, stride_pad)
    return decoded[:, :A, :C]                          # (B, A, 5 + num_classes)


# ---------------------------------- main ------------------------------------ #

if __name__ == "__main__":
    key = jax.random.PRNGKey(0)
    pkey, xkey = jax.random.split(key)
    num_classes = 80
    params = init_params(pkey, in_ch=3, num_classes=num_classes)

    # small deterministic input; spatial must be divisible by 32 (strides 8/16/32)
    x = jax.random.normal(xkey, (2, 3, 32, 32), jnp.float32)

    fwd = jax.jit(functools.partial(yolox_forward, num_classes=num_classes))
    out = fwd(params, x)
    jax.block_until_ready(out)

    # expected anchors: 4*4 + 2*2 + 1*1 = 21, channels = 5 + num_classes
    assert out.shape == (2, 21, 5 + num_classes), out.shape
    assert bool(jnp.all(jnp.isfinite(out)))
    print("KERNEL_OK")
</pallas_src>

<mosaic_0001>
module attributes {stable_mosaic.version = 11 : i64} {
  func.func @_matmul_bias_act_kernel(%arg0: i32, %arg1: i32, %arg2: memref<512x27xbf16, #tpu.memory_space<vmem>>, %arg3: memref<27x128xbf16, #tpu.memory_space<vmem>>, %arg4: memref<1x128xf32, #tpu.memory_space<vmem>>, %arg5: memref<512x128xbf16, #tpu.memory_space<vmem>>) attributes {dimension_semantics = [#tpu.dimension_semantics<parallel>, #tpu.dimension_semantics<parallel>], iteration_bounds = array<i64: 1, 1>, scalar_prefetch = 0 : i64, scratch_operands = 0 : i64, tpu.core_type = #tpu.core_type<tc>, window_params = [{transform_indices = @transform_0, window_bounds = array<i64: 512, 27>}, {transform_indices = @transform_1, window_bounds = array<i64: 27, 128>}, {transform_indices = @transform_2, window_bounds = array<i64: 1, 128>}, {transform_indices = @transform_3, window_bounds = array<i64: 512, 128>}]} {
    %c0 = arith.constant 0 : index
    %c0_0 = arith.constant 0 : index
    %0 = vector.load %arg2[%c0, %c0_0] : memref<512x27xbf16, #tpu.memory_space<vmem>>, vector<512x27xbf16>
    %c0_1 = arith.constant 0 : index
    %c0_2 = arith.constant 0 : index
    %1 = vector.load %arg3[%c0_1, %c0_2] : memref<27x128xbf16, #tpu.memory_space<vmem>>, vector<27x128xbf16>
    %cst = arith.constant dense<0.000000e+00> : vector<512x128xf32>
    %2 = tpu.matmul %0, %1, %cst {dimension_numbers = #tpu.dot_dimension_numbers<[1], [0], [0], [1], [0, 0, 1, 1], [], []>} : vector<512x27xbf16>, vector<27x128xbf16>, vector<512x128xf32> -> vector<512x128xf32>
    %c0_3 = arith.constant 0 : index
    %c0_4 = arith.constant 0 : index
    %3 = vector.load %arg4[%c0_3, %c0_4] : memref<1x128xf32, #tpu.memory_space<vmem>>, vector<1x128xf32>
    %4 = vector.broadcast %3 : vector<1x128xf32> to vector<512x128xf32>
    %5 = arith.addf %2, %4 : vector<512x128xf32>
    %6 = arith.negf %5 : vector<512x128xf32>
    %7 = math.exp %6 : vector<512x128xf32>
    %cst_5 = arith.constant 1.000000e+00 : f32
    %8 = vector.broadcast %cst_5 : f32 to vector<512x128xf32>
    %9 = arith.addf %8, %7 : vector<512x128xf32>
    %10 = arith.divf %8, %9 : vector<512x128xf32>
    %11 = arith.mulf %5, %10 : vector<512x128xf32>
    %12 = arith.truncf %11 : vector<512x128xf32> to vector<512x128xbf16>
    %c0_6 = arith.constant 0 : index
    %c0_7 = arith.constant 0 : index
    %13 = vector.load %arg5[%c0_6, %c0_7] : memref<512x128xbf16, #tpu.memory_space<vmem>>, vector<512x128xbf16>
    tpu.vector_store %arg5[%c0_6, %c0_7], %12 {strides = array<i32>} : memref<512x128xbf16, #tpu.memory_space<vmem>>, vector<512x128xbf16>,
    return
  }
  func.func @transform_0(%arg0: i32, %arg1: i32) -> (i32, i32) {
    %c0_i32 = arith.constant 0 : i32
    %c0_i32_0 = arith.constant 0 : i32
    return %arg0, %c0_i32 : i32, i32
  }
  func.func @transform_1(%arg0: i32, %arg1: i32) -> (i32, i32) {
    %c0_i32 = arith.constant 0 : i32
    %c0_i32_0 = arith.constant 0 : i32
    return %c0_i32, %arg1 : i32, i32
  }
  func.func @transform_2(%arg0: i32, %arg1: i32) -> (i32, i32) {
    %c0_i32 = arith.constant 0 : i32
    %c0_i32_0 = arith.constant 0 : i32
    return %c0_i32, %arg1 : i32, i32
  }
  func.func @transform_3(%arg0: i32, %arg1: i32) -> (i32, i32) {
    %c0_i32 = arith.constant 0 : i32
    return %arg0, %arg1 : i32, i32
  }
}

module attributes {stable_mosaic.version = 11 : i64} {
  func.func @_matmul_bias_act_kernel(%arg0: i32, %arg1: i32, %arg2: memref<128x72xbf16, #tpu.memory_space<vmem>>, %arg3: memref<72x128xbf16, #tpu.memory_space<vmem>>, %arg4: memref<1x128xf32, #tpu.memory_space<vmem>>, %arg5: memref<128x128xbf16, #tpu.memory_space<vmem>>) attributes {dimension_semantics = [#tpu.dimension_semantics<parallel>, #tpu.dimension_semantics<parallel>], iteration_bounds = array<i64: 1, 1>, scalar_prefetch = 0 : i64, scratch_operands = 0 : i64, tpu.core_type = #tpu.core_type<tc>, window_params = [{transform_indices = @transform_0, window_bounds = array<i64: 128, 72>}, {transform_indices = @transform_1, window_bounds = array<i64: 72, 128>}, {transform_indices = @transform_2, window_bounds = array<i64: 1, 128>}, {transform_indices = @transform_3, window_bounds = array<i64: 128, 128>}]} {
    %c0 = arith.constant 0 : index
    %c0_0 = arith.constant 0 : index
    %0 = vector.load %arg2[%c0, %c0_0] : memref<128x72xbf16, #tpu.memory_space<vmem>>, vector<128x72xbf16>
    %c0_1 = arith.constant 0 : index
    %c0_2 = arith.constant 0 : index
    %1 = vector.load %arg3[%c0_1, %c0_2] : memref<72x128xbf16, #tpu.memory_space<vmem>>, vector<72x128xbf16>
    %cst = arith.constant dense<0.000000e+00> : vector<128x128xf32>
    %2 = tpu.matmul %0, %1, %cst {dimension_numbers = #tpu.dot_dimension_numbers<[1], [0], [0], [1], [0, 0, 1, 1], [], []>} : vector<128x72xbf16>, vector<72x128xbf16>, vector<128x128xf32> -> vector<128x128xf32>
    %c0_3 = arith.constant 0 : index
    %c0_4 = arith.constant 0 : index
    %3 = vector.load %arg4[%c0_3, %c0_4] : memref<1x128xf32, #tpu.memory_space<vmem>>, vector<1x128xf32>
    %4 = vector.broadcast %3 : vector<1x128xf32> to vector<128x128xf32>
    %5 = arith.addf %2, %4 : vector<128x128xf32>
    %6 = arith.negf %5 : vector<128x128xf32>
    %7 = math.exp %6 : vector<128x128xf32>
    %cst_5 = arith.constant 1.000000e+00 : f32
    %8 = vector.broadcast %cst_5 : f32 to vector<128x128xf32>
    %9 = arith.addf %8, %7 : vector<128x128xf32>
    %10 = arith.divf %8, %9 : vector<128x128xf32>
    %11 = arith.mulf %5, %10 : vector<128x128xf32>
    %12 = arith.truncf %11 : vector<128x128xf32> to vector<128x128xbf16>
    %c0_6 = arith.constant 0 : index
    %c0_7 = arith.constant 0 : index
    %13 = vector.load %arg5[%c0_6, %c0_7] : memref<128x128xbf16, #tpu.memory_space<vmem>>, vector<128x128xbf16>
    tpu.vector_store %arg5[%c0_6, %c0_7], %12 {strides = array<i32>} : memref<128x128xbf16, #tpu.memory_space<vmem>>, vector<128x128xbf16>,
    return
  }
  func.func @transform_0(%arg0: i32, %arg1: i32) -> (i32, i32) {
    %c0_i32 = arith.constant 0 : i32
    %c0_i32_0 = arith.constant 0 : i32
    return %arg0, %c0_i32 : i32, i32
  }
  func.func @transform_1(%arg0: i32, %arg1: i32) -> (i32, i32) {
    %c0_i32 = arith.constant 0 : i32
    %c0_i32_0 = arith.constant 0 : i32
    return %c0_i32, %arg1 : i32, i32
  }
  func.func @transform_2(%arg0: i32, %arg1: i32) -> (i32, i32) {
    %c0_i32 = arith.constant 0 : i32
    %c0_i32_0 = arith.constant 0 : i32
    return %c0_i32, %arg1 : i32, i32
  }
  func.func @transform_3(%arg0: i32, %arg1: i32) -> (i32, i32) {
    %c0_i32 = arith.constant 0 : i32
    return %arg0, %arg1 : i32, i32
  }
}

module attributes {stable_mosaic.version = 11 : i64} {
  func.func @_matmul_bias_act_kernel(%arg0: i32, %arg1: i32, %arg2: memref<32x144xbf16, #tpu.memory_space<vmem>>, %arg3: memref<144x128xbf16, #tpu.memory_space<vmem>>, %arg4: memref<1x128xf32, #tpu.memory_space<vmem>>, %arg5: memref<32x128xbf16, #tpu.memory_space<vmem>>) attributes {dimension_semantics = [#tpu.dimension_semantics<parallel>, #tpu.dimension_semantics<parallel>], iteration_bounds = array<i64: 1, 1>, scalar_prefetch = 0 : i64, scratch_operands = 0 : i64, tpu.core_type = #tpu.core_type<tc>, window_params = [{transform_indices = @transform_0, window_bounds = array<i64: 32, 144>}, {transform_indices = @transform_1, window_bounds = array<i64: 144, 128>}, {transform_indices = @transform_2, window_bounds = array<i64: 1, 128>}, {transform_indices = @transform_3, window_bounds = array<i64: 32, 128>}]} {
    %c0 = arith.constant 0 : index
    %c0_0 = arith.constant 0 : index
    %0 = vector.load %arg2[%c0, %c0_0] : memref<32x144xbf16, #tpu.memory_space<vmem>>, vector<32x144xbf16>
    %c0_1 = arith.constant 0 : index
    %c0_2 = arith.constant 0 : index
    %1 = vector.load %arg3[%c0_1, %c0_2] : memref<144x128xbf16, #tpu.memory_space<vmem>>, vector<144x128xbf16>
    %cst = arith.constant dense<0.000000e+00> : vector<32x128xf32>
    %2 = tpu.matmul %0, %1, %cst {dimension_numbers = #tpu.dot_dimension_numbers<[1], [0], [0], [1], [0, 0, 1, 1], [], []>} : vector<32x144xbf16>, vector<144x128xbf16>, vector<32x128xf32> -> vector<32x128xf32>
    %c0_3 = arith.constant 0 : index
    %c0_4 = arith.constant 0 : index
    %3 = vector.load %arg4[%c0_3, %c0_4] : memref<1x128xf32, #tpu.memory_space<vmem>>, vector<1x128xf32>
    %4 = vector.broadcast %3 : vector<1x128xf32> to vector<32x128xf32>
    %5 = arith.addf %2, %4 : vector<32x128xf32>
    %6 = arith.negf %5 : vector<32x128xf32>
    %7 = math.exp %6 : vector<32x128xf32>
    %cst_5 = arith.constant 1.000000e+00 : f32
    %8 = vector.broadcast %cst_5 : f32 to vector<32x128xf32>
    %9 = arith.addf %8, %7 : vector<32x128xf32>
    %10 = arith.divf %8, %9 : vector<32x128xf32>
    %11 = arith.mulf %5, %10 : vector<32x128xf32>
    %12 = arith.truncf %11 : vector<32x128xf32> to vector<32x128xbf16>
    %c0_6 = arith.constant 0 : index
    %c0_7 = arith.constant 0 : index
    %13 = vector.load %arg5[%c0_6, %c0_7] : memref<32x128xbf16, #tpu.memory_space<vmem>>, vector<32x128xbf16>
    tpu.vector_store %arg5[%c0_6, %c0_7], %12 {strides = array<i32>} : memref<32x128xbf16, #tpu.memory_space<vmem>>, vector<32x128xbf16>,
    return
  }
  func.func @transform_0(%arg0: i32, %arg1: i32) -> (i32, i32) {
    %c0_i32 = arith.constant 0 : i32
    %c0_i32_0 = arith.constant 0 : i32
    return %arg0, %c0_i32 : i32, i32
  }
  func.func @transform_1(%arg0: i32, %arg1: i32) -> (i32, i32) {
    %c0_i32 = arith.constant 0 : i32
    %c0_i32_0 = arith.constant 0 : i32
    return %c0_i32, %arg1 : i32, i32
  }
  func.func @transform_2(%arg0: i32, %arg1: i32) -> (i32, i32) {
    %c0_i32 = arith.constant 0 : i32
    %c0_i32_0 = arith.constant 0 : i32
    return %c0_i32, %arg1 : i32, i32
  }
  func.func @transform_3(%arg0: i32, %arg1: i32) -> (i32, i32) {
    %c0_i32 = arith.constant 0 : i32
    return %arg0, %arg1 : i32, i32
  }
}

module attributes {stable_mosaic.version = 11 : i64} {
  func.func @_matmul_bias_act_kernel(%arg0: i32, %arg1: i32, %arg2: memref<16x144xbf16, #tpu.memory_space<vmem>>, %arg3: memref<144x128xbf16, #tpu.memory_space<vmem>>, %arg4: memref<1x128xf32, #tpu.memory_space<vmem>>, %arg5: memref<16x128xbf16, #tpu.memory_space<vmem>>) attributes {dimension_semantics = [#tpu.dimension_semantics<parallel>, #tpu.dimension_semantics<parallel>], iteration_bounds = array<i64: 1, 1>, scalar_prefetch = 0 : i64, scratch_operands = 0 : i64, tpu.core_type = #tpu.core_type<tc>, window_params = [{transform_indices = @transform_0, window_bounds = array<i64: 16, 144>}, {transform_indices = @transform_1, window_bounds = array<i64: 144, 128>}, {transform_indices = @transform_2, window_bounds = array<i64: 1, 128>}, {transform_indices = @transform_3, window_bounds = array<i64: 16, 128>}]} {
    %c0 = arith.constant 0 : index
    %c0_0 = arith.constant 0 : index
    %0 = vector.load %arg2[%c0, %c0_0] : memref<16x144xbf16, #tpu.memory_space<vmem>>, vector<16x144xbf16>
    %c0_1 = arith.constant 0 : index
    %c0_2 = arith.constant 0 : index
    %1 = vector.load %arg3[%c0_1, %c0_2] : memref<144x128xbf16, #tpu.memory_space<vmem>>, vector<144x128xbf16>
    %cst = arith.constant dense<0.000000e+00> : vector<16x128xf32>
    %2 = tpu.matmul %0, %1, %cst {dimension_numbers = #tpu.dot_dimension_numbers<[1], [0], [0], [1], [0, 0, 1, 1], [], []>} : vector<16x144xbf16>, vector<144x128xbf16>, vector<16x128xf32> -> vector<16x128xf32>
    %c0_3 = arith.constant 0 : index
    %c0_4 = arith.constant 0 : index
    %3 = vector.load %arg4[%c0_3, %c0_4] : memref<1x128xf32, #tpu.memory_space<vmem>>, vector<1x128xf32>
    %4 = vector.broadcast %3 : vector<1x128xf32> to vector<16x128xf32>
    %5 = arith.addf %2, %4 : vector<16x128xf32>
    %6 = arith.negf %5 : vector<16x128xf32>
    %7 = math.exp %6 : vector<16x128xf32>
    %cst_5 = arith.constant 1.000000e+00 : f32
    %8 = vector.broadcast %cst_5 : f32 to vector<16x128xf32>
    %9 = arith.addf %8, %7 : vector<16x128xf32>
    %10 = arith.divf %8, %9 : vector<16x128xf32>
    %11 = arith.mulf %5, %10 : vector<16x128xf32>
    %12 = arith.truncf %11 : vector<16x128xf32> to vector<16x128xbf16>
    %c0_6 = arith.constant 0 : index
    %c0_7 = arith.constant 0 : index
    %13 = vector.load %arg5[%c0_6, %c0_7] : memref<16x128xbf16, #tpu.memory_space<vmem>>, vector<16x128xbf16>
    tpu.vector_store %arg5[%c0_6, %c0_7], %12 {strides = array<i32>} : memref<16x128xbf16, #tpu.memory_space<vmem>>, vector<16x128xbf16>,
    return
  }
  func.func @transform_0(%arg0: i32, %arg1: i32) -> (i32, i32) {
    %c0_i32 = arith.constant 0 : i32
    %c0_i32_0 = arith.constant 0 : i32
    return %arg0, %c0_i32 : i32, i32
  }
  func.func @transform_1(%arg0: i32, %arg1: i32) -> (i32, i32) {
    %c0_i32 = arith.constant 0 : i32
    %c0_i32_0 = arith.constant 0 : i32
    return %c0_i32, %arg1 : i32, i32
  }
  func.func @transform_2(%arg0: i32, %arg1: i32) -> (i32, i32) {
    %c0_i32 = arith.constant 0 : i32
    %c0_i32_0 = arith.constant 0 : i32
    return %c0_i32, %arg1 : i32, i32
  }
  func.func @transform_3(%arg0: i32, %arg1: i32) -> (i32, i32) {
    %c0_i32 = arith.constant 0 : i32
    return %arg0, %arg1 : i32, i32
  }
}

module attributes {stable_mosaic.version = 11 : i64} {
  func.func @_matmul_bias_act_kernel(%arg0: i32, %arg1: i32, %arg2: memref<16x288xbf16, #tpu.memory_space<vmem>>, %arg3: memref<288x128xbf16, #tpu.memory_space<vmem>>, %arg4: memref<1x128xf32, #tpu.memory_space<vmem>>, %arg5: memref<16x128xbf16, #tpu.memory_space<vmem>>) attributes {dimension_semantics = [#tpu.dimension_semantics<parallel>, #tpu.dimension_semantics<parallel>], iteration_bounds = array<i64: 1, 1>, scalar_prefetch = 0 : i64, scratch_operands = 0 : i64, tpu.core_type = #tpu.core_type<tc>, window_params = [{transform_indices = @transform_0, window_bounds = array<i64: 16, 288>}, {transform_indices = @transform_1, window_bounds = array<i64: 288, 128>}, {transform_indices = @transform_2, window_bounds = array<i64: 1, 128>}, {transform_indices = @transform_3, window_bounds = array<i64: 16, 128>}]} {
    %c0 = arith.constant 0 : index
    %c0_0 = arith.constant 0 : index
    %0 = vector.load %arg2[%c0, %c0_0] : memref<16x288xbf16, #tpu.memory_space<vmem>>, vector<16x288xbf16>
    %c0_1 = arith.constant 0 : index
    %c0_2 = arith.constant 0 : index
    %1 = vector.load %arg3[%c0_1, %c0_2] : memref<288x128xbf16, #tpu.memory_space<vmem>>, vector<288x128xbf16>
    %cst = arith.constant dense<0.000000e+00> : vector<16x128xf32>
    %2 = tpu.matmul %0, %1, %cst {dimension_numbers = #tpu.dot_dimension_numbers<[1], [0], [0], [1], [0, 0, 1, 1], [], []>} : vector<16x288xbf16>, vector<288x128xbf16>, vector<16x128xf32> -> vector<16x128xf32>
    %c0_3 = arith.constant 0 : index
    %c0_4 = arith.constant 0 : index
    %3 = vector.load %arg4[%c0_3, %c0_4] : memref<1x128xf32, #tpu.memory_space<vmem>>, vector<1x128xf32>
    %4 = vector.broadcast %3 : vector<1x128xf32> to vector<16x128xf32>
    %5 = arith.addf %2, %4 : vector<16x128xf32>
    %6 = arith.negf %5 : vector<16x128xf32>
    %7 = math.exp %6 : vector<16x128xf32>
    %cst_5 = arith.constant 1.000000e+00 : f32
    %8 = vector.broadcast %cst_5 : f32 to vector<16x128xf32>
    %9 = arith.addf %8, %7 : vector<16x128xf32>
    %10 = arith.divf %8, %9 : vector<16x128xf32>
    %11 = arith.mulf %5, %10 : vector<16x128xf32>
    %12 = arith.truncf %11 : vector<16x128xf32> to vector<16x128xbf16>
    %c0_6 = arith.constant 0 : index
    %c0_7 = arith.constant 0 : index
    %13 = vector.load %arg5[%c0_6, %c0_7] : memref<16x128xbf16, #tpu.memory_space<vmem>>, vector<16x128xbf16>
    tpu.vector_store %arg5[%c0_6, %c0_7], %12 {strides = array<i32>} : memref<16x128xbf16, #tpu.memory_space<vmem>>, vector<16x128xbf16>,
    return
  }
  func.func @transform_0(%arg0: i32, %arg1: i32) -> (i32, i32) {
    %c0_i32 = arith.constant 0 : i32
    %c0_i32_0 = arith.constant 0 : i32
    return %arg0, %c0_i32 : i32, i32
  }
  func.func @transform_1(%arg0: i32, %arg1: i32) -> (i32, i32) {
    %c0_i32 = arith.constant 0 : i32
    %c0_i32_0 = arith.constant 0 : i32
    return %c0_i32, %arg1 : i32, i32
  }
  func.func @transform_2(%arg0: i32, %arg1: i32) -> (i32, i32) {
    %c0_i32 = arith.constant 0 : i32
    %c0_i32_0 = arith.constant 0 : i32
    return %c0_i32, %arg1 : i32, i32
  }
  func.func @transform_3(%arg0: i32, %arg1: i32) -> (i32, i32) {
    %c0_i32 = arith.constant 0 : i32
    return %arg0, %arg1 : i32, i32
  }
}

module attributes {stable_mosaic.version = 11 : i64} {
  func.func @_matmul_bias_act_kernel(%arg0: i32, %arg1: i32, %arg2: memref<16x64xbf16, #tpu.memory_space<vmem>>, %arg3: memref<64x128xbf16, #tpu.memory_space<vmem>>, %arg4: memref<1x128xf32, #tpu.memory_space<vmem>>, %arg5: memref<16x128xbf16, #tpu.memory_space<vmem>>) attributes {dimension_semantics = [#tpu.dimension_semantics<parallel>, #tpu.dimension_semantics<parallel>], iteration_bounds = array<i64: 1, 1>, scalar_prefetch = 0 : i64, scratch_operands = 0 : i64, tpu.core_type = #tpu.core_type<tc>, window_params = [{transform_indices = @transform_0, window_bounds = array<i64: 16, 64>}, {transform_indices = @transform_1, window_bounds = array<i64: 64, 128>}, {transform_indices = @transform_2, window_bounds = array<i64: 1, 128>}, {transform_indices = @transform_3, window_bounds = array<i64: 16, 128>}]} {
    %c0 = arith.constant 0 : index
    %c0_0 = arith.constant 0 : index
    %0 = vector.load %arg2[%c0, %c0_0] : memref<16x64xbf16, #tpu.memory_space<vmem>>, vector<16x64xbf16>
    %c0_1 = arith.constant 0 : index
    %c0_2 = arith.constant 0 : index
    %1 = vector.load %arg3[%c0_1, %c0_2] : memref<64x128xbf16, #tpu.memory_space<vmem>>, vector<64x128xbf16>
    %cst = arith.constant dense<0.000000e+00> : vector<16x128xf32>
    %2 = tpu.matmul %0, %1, %cst {dimension_numbers = #tpu.dot_dimension_numbers<[1], [0], [0], [1], [0, 0, 1, 1], [], []>} : vector<16x64xbf16>, vector<64x128xbf16>, vector<16x128xf32> -> vector<16x128xf32>
    %c0_3 = arith.constant 0 : index
    %c0_4 = arith.constant 0 : index
    %3 = vector.load %arg4[%c0_3, %c0_4] : memref<1x128xf32, #tpu.memory_space<vmem>>, vector<1x128xf32>
    %4 = vector.broadcast %3 : vector<1x128xf32> to vector<16x128xf32>
    %5 = arith.addf %2, %4 : vector<16x128xf32>
    %6 = arith.negf %5 : vector<16x128xf32>
    %7 = math.exp %6 : vector<16x128xf32>
    %cst_5 = arith.constant 1.000000e+00 : f32
    %8 = vector.broadcast %cst_5 : f32 to vector<16x128xf32>
    %9 = arith.addf %8, %7 : vector<16x128xf32>
    %10 = arith.divf %8, %9 : vector<16x128xf32>
    %11 = arith.mulf %5, %10 : vector<16x128xf32>
    %12 = arith.truncf %11 : vector<16x128xf32> to vector<16x128xbf16>
    %c0_6 = arith.constant 0 : index
    %c0_7 = arith.constant 0 : index
    %13 = vector.load %arg5[%c0_6, %c0_7] : memref<16x128xbf16, #tpu.memory_space<vmem>>, vector<16x128xbf16>
    tpu.vector_store %arg5[%c0_6, %c0_7], %12 {strides = array<i32>} : memref<16x128xbf16, #tpu.memory_space<vmem>>, vector<16x128xbf16>,
    return
  }
  func.func @transform_0(%arg0: i32, %arg1: i32) -> (i32, i32) {
    %c0_i32 = arith.constant 0 : i32
    %c0_i32_0 = arith.constant 0 : i32
    return %arg0, %c0_i32 : i32, i32
  }
  func.func @transform_1(%arg0: i32, %arg1: i32) -> (i32, i32) {
    %c0_i32 = arith.constant 0 : i32
    %c0_i32_0 = arith.constant 0 : i32
    return %c0_i32, %arg1 : i32, i32
  }
  func.func @transform_2(%arg0: i32, %arg1: i32) -> (i32, i32) {
    %c0_i32 = arith.constant 0 : i32
    %c0_i32_0 = arith.constant 0 : i32
    return %c0_i32, %arg1 : i32, i32
  }
  func.func @transform_3(%arg0: i32, %arg1: i32) -> (i32, i32) {
    %c0_i32 = arith.constant 0 : i32
    return %arg0, %arg1 : i32, i32
  }
}

module attributes {stable_mosaic.version = 11 : i64} {
  func.func @_matmul_bias_act_kernel(%arg0: i32, %arg1: i32, %arg2: memref<16x576xbf16, #tpu.memory_space<vmem>>, %arg3: memref<576x128xbf16, #tpu.memory_space<vmem>>, %arg4: memref<1x128xf32, #tpu.memory_space<vmem>>, %arg5: memref<16x128xbf16, #tpu.memory_space<vmem>>) attributes {dimension_semantics = [#tpu.dimension_semantics<parallel>, #tpu.dimension_semantics<parallel>], iteration_bounds = array<i64: 1, 1>, scalar_prefetch = 0 : i64, scratch_operands = 0 : i64, tpu.core_type = #tpu.core_type<tc>, window_params = [{transform_indices = @transform_0, window_bounds = array<i64: 16, 576>}, {transform_indices = @transform_1, window_bounds = array<i64: 576, 128>}, {transform_indices = @transform_2, window_bounds = array<i64: 1, 128>}, {transform_indices = @transform_3, window_bounds = array<i64: 16, 128>}]} {
    %c0 = arith.constant 0 : index
    %c0_0 = arith.constant 0 : index
    %0 = vector.load %arg2[%c0, %c0_0] : memref<16x576xbf16, #tpu.memory_space<vmem>>, vector<16x576xbf16>
    %c0_1 = arith.constant 0 : index
    %c0_2 = arith.constant 0 : index
    %1 = vector.load %arg3[%c0_1, %c0_2] : memref<576x128xbf16, #tpu.memory_space<vmem>>, vector<576x128xbf16>
    %cst = arith.constant dense<0.000000e+00> : vector<16x128xf32>
    %2 = tpu.matmul %0, %1, %cst {dimension_numbers = #tpu.dot_dimension_numbers<[1], [0], [0], [1], [0, 0, 1, 1], [], []>} : vector<16x576xbf16>, vector<576x128xbf16>, vector<16x128xf32> -> vector<16x128xf32>
    %c0_3 = arith.constant 0 : index
    %c0_4 = arith.constant 0 : index
    %3 = vector.load %arg4[%c0_3, %c0_4] : memref<1x128xf32, #tpu.memory_space<vmem>>, vector<1x128xf32>
    %4 = vector.broadcast %3 : vector<1x128xf32> to vector<16x128xf32>
    %5 = arith.addf %2, %4 : vector<16x128xf32>
    %6 = arith.negf %5 : vector<16x128xf32>
    %7 = math.exp %6 : vector<16x128xf32>
    %cst_5 = arith.constant 1.000000e+00 : f32
    %8 = vector.broadcast %cst_5 : f32 to vector<16x128xf32>
    %9 = arith.addf %8, %7 : vector<16x128xf32>
    %10 = arith.divf %8, %9 : vector<16x128xf32>
    %11 = arith.mulf %5, %10 : vector<16x128xf32>
    %12 = arith.truncf %11 : vector<16x128xf32> to vector<16x128xbf16>
    %c0_6 = arith.constant 0 : index
    %c0_7 = arith.constant 0 : index
    %13 = vector.load %arg5[%c0_6, %c0_7] : memref<16x128xbf16, #tpu.memory_space<vmem>>, vector<16x128xbf16>
    tpu.vector_store %arg5[%c0_6, %c0_7], %12 {strides = array<i32>} : memref<16x128xbf16, #tpu.memory_space<vmem>>, vector<16x128xbf16>,
    return
  }
  func.func @transform_0(%arg0: i32, %arg1: i32) -> (i32, i32) {
    %c0_i32 = arith.constant 0 : i32
    %c0_i32_0 = arith.constant 0 : i32
    return %arg0, %c0_i32 : i32, i32
  }
  func.func @transform_1(%arg0: i32, %arg1: i32) -> (i32, i32) {
    %c0_i32 = arith.constant 0 : i32
    %c0_i32_0 = arith.constant 0 : i32
    return %c0_i32, %arg1 : i32, i32
  }
  func.func @transform_2(%arg0: i32, %arg1: i32) -> (i32, i32) {
    %c0_i32 = arith.constant 0 : i32
    %c0_i32_0 = arith.constant 0 : i32
    return %c0_i32, %arg1 : i32, i32
  }
  func.func @transform_3(%arg0: i32, %arg1: i32) -> (i32, i32) {
    %c0_i32 = arith.constant 0 : i32
    return %arg0, %arg1 : i32, i32
  }
}

module attributes {stable_mosaic.version = 11 : i64} {
  func.func @_matmul_bias_act_kernel(%arg0: i32, %arg1: i32, %arg2: memref<16x32xbf16, #tpu.memory_space<vmem>>, %arg3: memref<32x128xbf16, #tpu.memory_space<vmem>>, %arg4: memref<1x128xf32, #tpu.memory_space<vmem>>, %arg5: memref<16x128xbf16, #tpu.memory_space<vmem>>) attributes {dimension_semantics = [#tpu.dimension_semantics<parallel>, #tpu.dimension_semantics<parallel>], iteration_bounds = array<i64: 1, 1>, scalar_prefetch = 0 : i64, scratch_operands = 0 : i64, tpu.core_type = #tpu.core_type<tc>, window_params = [{transform_indices = @transform_0, window_bounds = array<i64: 16, 32>}, {transform_indices = @transform_1, window_bounds = array<i64: 32, 128>}, {transform_indices = @transform_2, window_bounds = array<i64: 1, 128>}, {transform_indices = @transform_3, window_bounds = array<i64: 16, 128>}]} {
    %c0 = arith.constant 0 : index
    %c0_0 = arith.constant 0 : index
    %0 = vector.load %arg2[%c0, %c0_0] : memref<16x32xbf16, #tpu.memory_space<vmem>>, vector<16x32xbf16>
    %c0_1 = arith.constant 0 : index
    %c0_2 = arith.constant 0 : index
    %1 = vector.load %arg3[%c0_1, %c0_2] : memref<32x128xbf16, #tpu.memory_space<vmem>>, vector<32x128xbf16>
    %cst = arith.constant dense<0.000000e+00> : vector<16x128xf32>
    %2 = tpu.matmul %0, %1, %cst {dimension_numbers = #tpu.dot_dimension_numbers<[1], [0], [0], [1], [0, 0, 1, 1], [], []>} : vector<16x32xbf16>, vector<32x128xbf16>, vector<16x128xf32> -> vector<16x128xf32>
    %c0_3 = arith.constant 0 : index
    %c0_4 = arith.constant 0 : index
    %3 = vector.load %arg4[%c0_3, %c0_4] : memref<1x128xf32, #tpu.memory_space<vmem>>, vector<1x128xf32>
    %4 = vector.broadcast %3 : vector<1x128xf32> to vector<16x128xf32>
    %5 = arith.addf %2, %4 : vector<16x128xf32>
    %6 = arith.negf %5 : vector<16x128xf32>
    %7 = math.exp %6 : vector<16x128xf32>
    %cst_5 = arith.constant 1.000000e+00 : f32
    %8 = vector.broadcast %cst_5 : f32 to vector<16x128xf32>
    %9 = arith.addf %8, %7 : vector<16x128xf32>
    %10 = arith.divf %8, %9 : vector<16x128xf32>
    %11 = arith.mulf %5, %10 : vector<16x128xf32>
    %12 = arith.truncf %11 : vector<16x128xf32> to vector<16x128xbf16>
    %c0_6 = arith.constant 0 : index
    %c0_7 = arith.constant 0 : index
    %13 = vector.load %arg5[%c0_6, %c0_7] : memref<16x128xbf16, #tpu.memory_space<vmem>>, vector<16x128xbf16>
    tpu.vector_store %arg5[%c0_6, %c0_7], %12 {strides = array<i32>} : memref<16x128xbf16, #tpu.memory_space<vmem>>, vector<16x128xbf16>,
    return
  }
  func.func @transform_0(%arg0: i32, %arg1: i32) -> (i32, i32) {
    %c0_i32 = arith.constant 0 : i32
    %c0_i32_0 = arith.constant 0 : i32
    return %arg0, %c0_i32 : i32, i32
  }
  func.func @transform_1(%arg0: i32, %arg1: i32) -> (i32, i32) {
    %c0_i32 = arith.constant 0 : i32
    %c0_i32_0 = arith.constant 0 : i32
    return %c0_i32, %arg1 : i32, i32
  }
  func.func @transform_2(%arg0: i32, %arg1: i32) -> (i32, i32) {
    %c0_i32 = arith.constant 0 : i32
    %c0_i32_0 = arith.constant 0 : i32
    return %c0_i32, %arg1 : i32, i32
  }
  func.func @transform_3(%arg0: i32, %arg1: i32) -> (i32, i32) {
    %c0_i32 = arith.constant 0 : i32
    return %arg0, %arg1 : i32, i32
  }
}

module attributes {stable_mosaic.version = 11 : i64} {
  func.func @_matmul_bias_act_kernel(%arg0: i32, %arg1: i32, %arg2: memref<32x288xbf16, #tpu.memory_space<vmem>>, %arg3: memref<288x128xbf16, #tpu.memory_space<vmem>>, %arg4: memref<1x128xf32, #tpu.memory_space<vmem>>, %arg5: memref<32x128xbf16, #tpu.memory_space<vmem>>) attributes {dimension_semantics = [#tpu.dimension_semantics<parallel>, #tpu.dimension_semantics<parallel>], iteration_bounds = array<i64: 1, 1>, scalar_prefetch = 0 : i64, scratch_operands = 0 : i64, tpu.core_type = #tpu.core_type<tc>, window_params = [{transform_indices = @transform_0, window_bounds = array<i64: 32, 288>}, {transform_indices = @transform_1, window_bounds = array<i64: 288, 128>}, {transform_indices = @transform_2, window_bounds = array<i64: 1, 128>}, {transform_indices = @transform_3, window_bounds = array<i64: 32, 128>}]} {
    %c0 = arith.constant 0 : index
    %c0_0 = arith.constant 0 : index
    %0 = vector.load %arg2[%c0, %c0_0] : memref<32x288xbf16, #tpu.memory_space<vmem>>, vector<32x288xbf16>
    %c0_1 = arith.constant 0 : index
    %c0_2 = arith.constant 0 : index
    %1 = vector.load %arg3[%c0_1, %c0_2] : memref<288x128xbf16, #tpu.memory_space<vmem>>, vector<288x128xbf16>
    %cst = arith.constant dense<0.000000e+00> : vector<32x128xf32>
    %2 = tpu.matmul %0, %1, %cst {dimension_numbers = #tpu.dot_dimension_numbers<[1], [0], [0], [1], [0, 0, 1, 1], [], []>} : vector<32x288xbf16>, vector<288x128xbf16>, vector<32x128xf32> -> vector<32x128xf32>
    %c0_3 = arith.constant 0 : index
    %c0_4 = arith.constant 0 : index
    %3 = vector.load %arg4[%c0_3, %c0_4] : memref<1x128xf32, #tpu.memory_space<vmem>>, vector<1x128xf32>
    %4 = vector.broadcast %3 : vector<1x128xf32> to vector<32x128xf32>
    %5 = arith.addf %2, %4 : vector<32x128xf32>
    %6 = arith.negf %5 : vector<32x128xf32>
    %7 = math.exp %6 : vector<32x128xf32>
    %cst_5 = arith.constant 1.000000e+00 : f32
    %8 = vector.broadcast %cst_5 : f32 to vector<32x128xf32>
    %9 = arith.addf %8, %7 : vector<32x128xf32>
    %10 = arith.divf %8, %9 : vector<32x128xf32>
    %11 = arith.mulf %5, %10 : vector<32x128xf32>
    %12 = arith.truncf %11 : vector<32x128xf32> to vector<32x128xbf16>
    %c0_6 = arith.constant 0 : index
    %c0_7 = arith.constant 0 : index
    %13 = vector.load %arg5[%c0_6, %c0_7] : memref<32x128xbf16, #tpu.memory_space<vmem>>, vector<32x128xbf16>
    tpu.vector_store %arg5[%c0_6, %c0_7], %12 {strides = array<i32>} : memref<32x128xbf16, #tpu.memory_space<vmem>>, vector<32x128xbf16>,
    return
  }
  func.func @transform_0(%arg0: i32, %arg1: i32) -> (i32, i32) {
    %c0_i32 = arith.constant 0 : i32
    %c0_i32_0 = arith.constant 0 : i32
    return %arg0, %c0_i32 : i32, i32
  }
  func.func @transform_1(%arg0: i32, %arg1: i32) -> (i32, i32) {
    %c0_i32 = arith.constant 0 : i32
    %c0_i32_0 = arith.constant 0 : i32
    return %c0_i32, %arg1 : i32, i32
  }
  func.func @transform_2(%arg0: i32, %arg1: i32) -> (i32, i32) {
    %c0_i32 = arith.constant 0 : i32
    %c0_i32_0 = arith.constant 0 : i32
    return %c0_i32, %arg1 : i32, i32
  }
  func.func @transform_3(%arg0: i32, %arg1: i32) -> (i32, i32) {
    %c0_i32 = arith.constant 0 : i32
    return %arg0, %arg1 : i32, i32
  }
}

module attributes {stable_mosaic.version = 11 : i64} {
  func.func @_matmul_bias_act_kernel(%arg0: i32, %arg1: i32, %arg2: memref<32x16xbf16, #tpu.memory_space<vmem>>, %arg3: memref<16x128xbf16, #tpu.memory_space<vmem>>, %arg4: memref<1x128xf32, #tpu.memory_space<vmem>>, %arg5: memref<32x128xbf16, #tpu.memory_space<vmem>>) attributes {dimension_semantics = [#tpu.dimension_semantics<parallel>, #tpu.dimension_semantics<parallel>], iteration_bounds = array<i64: 1, 1>, scalar_prefetch = 0 : i64, scratch_operands = 0 : i64, tpu.core_type = #tpu.core_type<tc>, window_params = [{transform_indices = @transform_0, window_bounds = array<i64: 32, 16>}, {transform_indices = @transform_1, window_bounds = array<i64: 16, 128>}, {transform_indices = @transform_2, window_bounds = array<i64: 1, 128>}, {transform_indices = @transform_3, window_bounds = array<i64: 32, 128>}]} {
    %c0 = arith.constant 0 : index
    %c0_0 = arith.constant 0 : index
    %0 = vector.load %arg2[%c0, %c0_0] : memref<32x16xbf16, #tpu.memory_space<vmem>>, vector<32x16xbf16>
    %c0_1 = arith.constant 0 : index
    %c0_2 = arith.constant 0 : index
    %1 = vector.load %arg3[%c0_1, %c0_2] : memref<16x128xbf16, #tpu.memory_space<vmem>>, vector<16x128xbf16>
    %cst = arith.constant dense<0.000000e+00> : vector<32x128xf32>
    %2 = tpu.matmul %0, %1, %cst {dimension_numbers = #tpu.dot_dimension_numbers<[1], [0], [0], [1], [0, 0, 1, 1], [], []>} : vector<32x16xbf16>, vector<16x128xbf16>, vector<32x128xf32> -> vector<32x128xf32>
    %c0_3 = arith.constant 0 : index
    %c0_4 = arith.constant 0 : index
    %3 = vector.load %arg4[%c0_3, %c0_4] : memref<1x128xf32, #tpu.memory_space<vmem>>, vector<1x128xf32>
    %4 = vector.broadcast %3 : vector<1x128xf32> to vector<32x128xf32>
    %5 = arith.addf %2, %4 : vector<32x128xf32>
    %6 = arith.negf %5 : vector<32x128xf32>
    %7 = math.exp %6 : vector<32x128xf32>
    %cst_5 = arith.constant 1.000000e+00 : f32
    %8 = vector.broadcast %cst_5 : f32 to vector<32x128xf32>
    %9 = arith.addf %8, %7 : vector<32x128xf32>
    %10 = arith.divf %8, %9 : vector<32x128xf32>
    %11 = arith.mulf %5, %10 : vector<32x128xf32>
    %12 = arith.truncf %11 : vector<32x128xf32> to vector<32x128xbf16>
    %c0_6 = arith.constant 0 : index
    %c0_7 = arith.constant 0 : index
    %13 = vector.load %arg5[%c0_6, %c0_7] : memref<32x128xbf16, #tpu.memory_space<vmem>>, vector<32x128xbf16>
    tpu.vector_store %arg5[%c0_6, %c0_7], %12 {strides = array<i32>} : memref<32x128xbf16, #tpu.memory_space<vmem>>, vector<32x128xbf16>,
    return
  }
  func.func @transform_0(%arg0: i32, %arg1: i32) -> (i32, i32) {
    %c0_i32 = arith.constant 0 : i32
    %c0_i32_0 = arith.constant 0 : i32
    return %arg0, %c0_i32 : i32, i32
  }
  func.func @transform_1(%arg0: i32, %arg1: i32) -> (i32, i32) {
    %c0_i32 = arith.constant 0 : i32
    %c0_i32_0 = arith.constant 0 : i32
    return %c0_i32, %arg1 : i32, i32
  }
  func.func @transform_2(%arg0: i32, %arg1: i32) -> (i32, i32) {
    %c0_i32 = arith.constant 0 : i32
    %c0_i32_0 = arith.constant 0 : i32
    return %c0_i32, %arg1 : i32, i32
  }
  func.func @transform_3(%arg0: i32, %arg1: i32) -> (i32, i32) {
    %c0_i32 = arith.constant 0 : i32
    return %arg0, %arg1 : i32, i32
  }
}

module attributes {stable_mosaic.version = 11 : i64} {
  func.func @_matmul_bias_act_kernel(%arg0: i32, %arg1: i32, %arg2: memref<32x32xbf16, #tpu.memory_space<vmem>>, %arg3: memref<32x128xbf16, #tpu.memory_space<vmem>>, %arg4: memref<1x128xf32, #tpu.memory_space<vmem>>, %arg5: memref<32x128xf32, #tpu.memory_space<vmem>>) attributes {dimension_semantics = [#tpu.dimension_semantics<parallel>, #tpu.dimension_semantics<parallel>], iteration_bounds = array<i64: 1, 1>, scalar_prefetch = 0 : i64, scratch_operands = 0 : i64, tpu.core_type = #tpu.core_type<tc>, window_params = [{transform_indices = @transform_0, window_bounds = array<i64: 32, 32>}, {transform_indices = @transform_1, window_bounds = array<i64: 32, 128>}, {transform_indices = @transform_2, window_bounds = array<i64: 1, 128>}, {transform_indices = @transform_3, window_bounds = array<i64: 32, 128>}]} {
    %c0 = arith.constant 0 : index
    %c0_0 = arith.constant 0 : index
    %0 = vector.load %arg2[%c0, %c0_0] : memref<32x32xbf16, #tpu.memory_space<vmem>>, vector<32x32xbf16>
    %c0_1 = arith.constant 0 : index
    %c0_2 = arith.constant 0 : index
    %1 = vector.load %arg3[%c0_1, %c0_2] : memref<32x128xbf16, #tpu.memory_space<vmem>>, vector<32x128xbf16>
    %cst = arith.constant dense<0.000000e+00> : vector<32x128xf32>
    %2 = tpu.matmul %0, %1, %cst {dimension_numbers = #tpu.dot_dimension_numbers<[1], [0], [0], [1], [0, 0, 1, 1], [], []>} : vector<32x32xbf16>, vector<32x128xbf16>, vector<32x128xf32> -> vector<32x128xf32>
    %c0_3 = arith.constant 0 : index
    %c0_4 = arith.constant 0 : index
    %3 = vector.load %arg4[%c0_3, %c0_4] : memref<1x128xf32, #tpu.memory_space<vmem>>, vector<1x128xf32>
    %4 = vector.broadcast %3 : vector<1x128xf32> to vector<32x128xf32>
    %5 = arith.addf %2, %4 : vector<32x128xf32>
    %c0_5 = arith.constant 0 : index
    %c0_6 = arith.constant 0 : index
    %6 = vector.load %arg5[%c0_5, %c0_6] : memref<32x128xf32, #tpu.memory_space<vmem>>, vector<32x128xf32>
    tpu.vector_store %arg5[%c0_5, %c0_6], %5 {strides = array<i32>} : memref<32x128xf32, #tpu.memory_space<vmem>>, vector<32x128xf32>,
    return
  }
  func.func @transform_0(%arg0: i32, %arg1: i32) -> (i32, i32) {
    %c0_i32 = arith.constant 0 : i32
    %c0_i32_0 = arith.constant 0 : i32
    return %arg0, %c0_i32 : i32, i32
  }
  func.func @transform_1(%arg0: i32, %arg1: i32) -> (i32, i32) {
    %c0_i32 = arith.constant 0 : i32
    %c0_i32_0 = arith.constant 0 : i32
    return %c0_i32, %arg1 : i32, i32
  }
  func.func @transform_2(%arg0: i32, %arg1: i32) -> (i32, i32) {
    %c0_i32 = arith.constant 0 : i32
    %c0_i32_0 = arith.constant 0 : i32
    return %c0_i32, %arg1 : i32, i32
  }
  func.func @transform_3(%arg0: i32, %arg1: i32) -> (i32, i32) {
    %c0_i32 = arith.constant 0 : i32
    return %arg0, %arg1 : i32, i32
  }
}

module attributes {stable_mosaic.version = 11 : i64} {
  func.func @_matmul_bias_act_kernel(%arg0: i32, %arg1: i32, %arg2: memref<16x32xbf16, #tpu.memory_space<vmem>>, %arg3: memref<32x128xbf16, #tpu.memory_space<vmem>>, %arg4: memref<1x128xf32, #tpu.memory_space<vmem>>, %arg5: memref<16x128xf32, #tpu.memory_space<vmem>>) attributes {dimension_semantics = [#tpu.dimension_semantics<parallel>, #tpu.dimension_semantics<parallel>], iteration_bounds = array<i64: 1, 1>, scalar_prefetch = 0 : i64, scratch_operands = 0 : i64, tpu.core_type = #tpu.core_type<tc>, window_params = [{transform_indices = @transform_0, window_bounds = array<i64: 16, 32>}, {transform_indices = @transform_1, window_bounds = array<i64: 32, 128>}, {transform_indices = @transform_2, window_bounds = array<i64: 1, 128>}, {transform_indices = @transform_3, window_bounds = array<i64: 16, 128>}]} {
    %c0 = arith.constant 0 : index
    %c0_0 = arith.constant 0 : index
    %0 = vector.load %arg2[%c0, %c0_0] : memref<16x32xbf16, #tpu.memory_space<vmem>>, vector<16x32xbf16>
    %c0_1 = arith.constant 0 : index
    %c0_2 = arith.constant 0 : index
    %1 = vector.load %arg3[%c0_1, %c0_2] : memref<32x128xbf16, #tpu.memory_space<vmem>>, vector<32x128xbf16>
    %cst = arith.constant dense<0.000000e+00> : vector<16x128xf32>
    %2 = tpu.matmul %0, %1, %cst {dimension_numbers = #tpu.dot_dimension_numbers<[1], [0], [0], [1], [0, 0, 1, 1], [], []>} : vector<16x32xbf16>, vector<32x128xbf16>, vector<16x128xf32> -> vector<16x128xf32>
    %c0_3 = arith.constant 0 : index
    %c0_4 = arith.constant 0 : index
    %3 = vector.load %arg4[%c0_3, %c0_4] : memref<1x128xf32, #tpu.memory_space<vmem>>, vector<1x128xf32>
    %4 = vector.broadcast %3 : vector<1x128xf32> to vector<16x128xf32>
    %5 = arith.addf %2, %4 : vector<16x128xf32>
    %c0_5 = arith.constant 0 : index
    %c0_6 = arith.constant 0 : index
    %6 = vector.load %arg5[%c0_5, %c0_6] : memref<16x128xf32, #tpu.memory_space<vmem>>, vector<16x128xf32>
    tpu.vector_store %arg5[%c0_5, %c0_6], %5 {strides = array<i32>} : memref<16x128xf32, #tpu.memory_space<vmem>>, vector<16x128xf32>,
    return
  }
  func.func @transform_0(%arg0: i32, %arg1: i32) -> (i32, i32) {
    %c0_i32 = arith.constant 0 : i32
    %c0_i32_0 = arith.constant 0 : i32
    return %arg0, %c0_i32 : i32, i32
  }
  func.func @transform_1(%arg0: i32, %arg1: i32) -> (i32, i32) {
    %c0_i32 = arith.constant 0 : i32
    %c0_i32_0 = arith.constant 0 : i32
    return %c0_i32, %arg1 : i32, i32
  }
  func.func @transform_2(%arg0: i32, %arg1: i32) -> (i32, i32) {
    %c0_i32 = arith.constant 0 : i32
    %c0_i32_0 = arith.constant 0 : i32
    return %c0_i32, %arg1 : i32, i32
  }
  func.func @transform_3(%arg0: i32, %arg1: i32) -> (i32, i32) {
    %c0_i32 = arith.constant 0 : i32
    return %arg0, %arg1 : i32, i32
  }
}

module attributes {stable_mosaic.version = 11 : i64} {
  func.func @_decode_kernel(%arg0: i32, %arg1: memref<2x24x128xf32, #tpu.memory_space<vmem>>, %arg2: memref<24x128xf32, #tpu.memory_space<vmem>>, %arg3: memref<24x1xf32, #tpu.memory_space<vmem>>, %arg4: memref<2x24x128xf32, #tpu.memory_space<vmem>>) attributes {dimension_semantics = [#tpu.dimension_semantics<parallel>], iteration_bounds = array<i64: 1>, scalar_prefetch = 0 : i64, scratch_operands = 0 : i64, tpu.core_type = #tpu.core_type<tc>, window_params = [{transform_indices = @transform_0, window_bounds = array<i64: 2, 24, 128>}, {transform_indices = @transform_1, window_bounds = array<i64: 24, 128>}, {transform_indices = @transform_2, window_bounds = array<i64: 24, 1>}, {transform_indices = @transform_3, window_bounds = array<i64: 2, 24, 128>}]} {
    %c0 = arith.constant 0 : index
    %c0_0 = arith.constant 0 : index
    %c0_1 = arith.constant 0 : index
    %0 = vector.load %arg1[%c0, %c0_0, %c0_1] : memref<2x24x128xf32, #tpu.memory_space<vmem>>, vector<2x24x128xf32>
    %c0_2 = arith.constant 0 : index
    %c0_3 = arith.constant 0 : index
    %1 = vector.load %arg2[%c0_2, %c0_3] : memref<24x128xf32, #tpu.memory_space<vmem>>, vector<24x128xf32>
    %2 = vector.shape_cast %1 : vector<24x128xf32> to vector<1x24x128xf32>
    %c0_4 = arith.constant 0 : index
    %c0_5 = arith.constant 0 : index
    %3 = vector.load %arg3[%c0_4, %c0_5] : memref<24x1xf32, #tpu.memory_space<vmem>>, vector<24x1xf32>
    %4 = vector.shape_cast %3 : vector<24x1xf32> to vector<1x24x1xf32>
    %5 = vector.broadcast %2 : vector<1x24x128xf32> to vector<2x24x128xf32>
    %6 = arith.addf %0, %5 : vector<2x24x128xf32>
    %7 = vector.broadcast %4 : vector<1x24x1xf32> to vector<2x24x128xf32>
    %8 = arith.mulf %6, %7 : vector<2x24x128xf32>
    %9 = math.exp %0 : vector<2x24x128xf32>
    %10 = vector.broadcast %4 : vector<1x24x1xf32> to vector<2x24x128xf32>
    %11 = arith.mulf %9, %10 : vector<2x24x128xf32>
    %12 = arith.negf %0 : vector<2x24x128xf32>
    %13 = math.exp %12 : vector<2x24x128xf32>
    %cst = arith.constant 1.000000e+00 : f32
    %14 = vector.broadcast %cst : f32 to vector<2x24x128xf32>
    %15 = arith.addf %14, %13 : vector<2x24x128xf32>
    %16 = arith.divf %14, %15 : vector<2x24x128xf32>
    %17 = tpu.iota {dimensions = array<i32: 2>} : vector<2x24x128xi32>
    %c2_i32 = arith.constant 2 : i32
    %18 = vector.broadcast %c2_i32 : i32 to vector<2x24x128xi32>
    %19 = arith.cmpi slt, %17, %18 : vector<2x24x128xi32>
    %c4_i32 = arith.constant 4 : i32
    %20 = vector.broadcast %c4_i32 : i32 to vector<2x24x128xi32>
    %21 = arith.cmpi slt, %17, %20 : vector<2x24x128xi32>
    %22 = arith.select %21, %11, %16 : vector<2x24x128xi1>, vector<2x24x128xf32>
    %23 = arith.select %19, %8, %22 : vector<2x24x128xi1>, vector<2x24x128xf32>
    %c0_6 = arith.constant 0 : index
    %c0_7 = arith.constant 0 : index
    %c0_8 = arith.constant 0 : index
    %24 = vector.load %arg4[%c0_6, %c0_7, %c0_8] : memref<2x24x128xf32, #tpu.memory_space<vmem>>, vector<2x24x128xf32>
    tpu.vector_store %arg4[%c0_6, %c0_7, %c0_8], %23 {strides = array<i32>} : memref<2x24x128xf32, #tpu.memory_space<vmem>>, vector<2x24x128xf32>,
    return
  }
  func.func @transform_0(%arg0: i32) -> (i32, i32, i32) {
    %c0_i32 = arith.constant 0 : i32
    %c0_i32_0 = arith.constant 0 : i32
    %c0_i32_1 = arith.constant 0 : i32
    return %c0_i32, %arg0, %c0_i32_0 : i32, i32, i32
  }
  func.func @transform_1(%arg0: i32) -> (i32, i32) {
    %c0_i32 = arith.constant 0 : i32
    %c0_i32_0 = arith.constant 0 : i32
    return %arg0, %c0_i32 : i32, i32
  }
  func.func @transform_2(%arg0: i32) -> (i32, i32) {
    %c0_i32 = arith.constant 0 : i32
    %c0_i32_0 = arith.constant 0 : i32
    return %arg0, %c0_i32 : i32, i32
  }
  func.func @transform_3(%arg0: i32) -> (i32, i32, i32) {
    %c0_i32 = arith.constant 0 : i32
    %c0_i32_0 = arith.constant 0 : i32
    %c0_i32_1 = arith.constant 0 : i32
    return %c0_i32, %arg0, %c0_i32_0 : i32, i32, i32
  }
}

</mosaic_0001>

<bundles_post_ra>
// kernel: yolox_forward.26
= control target key start
LH: loop header
LB: loop body
LE: loop exit
PB: predicated region body
PF: predicated region fallthrough
CT: control target
= control target key end

     0   :  { %vm358_vm0 = vcmask 1044480   ;;  %vm359_vm1 = vcmask 1045504   ;;  %v2273_v1 = vmov 65535   ;;  %vm261_vm2 = vcmask 220160   ;;  %s2867_s1 = inlined_call_operand.vmem [shape: bf16[27,128], index: 1, kind: input, shape index: {}]   ;;  %s2868_s0 = inlined_call_operand.vmem [shape: bf16[512,27], index: 0, kind: input, shape index: {}]   ;;  %s2869_s2 = inlined_call_operand.vmem [shape: f32[1,128], index: 2, kind: input, shape index: {}]   ;;  %s2870_s3 = inlined_call_operand.vmem [shape: bf16[512,128], index: 3, kind: output, shape index: {}]  }
   0x1   :  { %v1983_v0 = vld [vmem:[%s2867_s1 + $0x8] sm:$0x3f]   ;;  %v360_v2 = vsel %vm358_vm0, 4294967295, %v2273_v1  ;;  %v1985_v4 = vld [vmem:[%s2868_s0] sm:$0xff]   ;;  %v1989_v10 = vld [vmem:[%s2868_s0 + $0x10] sm:$0xff]  }
   0x2   :  { %v361_v3 = vsel %vm359_vm1, %v360_v2, 0  ;;  %v1984_v6 = vld [vmem:[%s2867_s1] sm:$0xff]   ;;  %1914 = vmatprep.mubr.msk.bf16.mxu0 %vm261_vm2, %v1985_v4  ;;  %v1987_v8 = vld [vmem:[%s2868_s0 + $0x8] sm:$0xff]   ;;  %v1990_v11 = vld [vmem:[%s2868_s0 + $0x90] sm:$0xff]  }
   0x3   :  { %v363_v5 = vand.u32 %v1983_v0, %v361_v3  ;;  %v1986_v7 = vld [vmem:[%s2868_s0 + $0x80] sm:$0xff]   ;;  %v1988_v9 = vld [vmem:[%s2868_s0 + $0x88] sm:$0xff]   ;;  %v1991_v12 = vld [vmem:[%s2868_s0 + $0x18] sm:$0xff]  }
   0x4   :  { %1946 = vmatprep.mubr.msk.bf16.mxu1 %vm261_vm2, %v1986_v7  ;;  %v1992_v13 = vld [vmem:[%s2868_s0 + $0x98] sm:$0xff]   ;;  %v1993_v14 = vld [vmem:[%s2868_s0 + $0x20] sm:$0xff]   ;;  %v1995_v16 = vld [vmem:[%s2868_s0 + $0x28] sm:$0xff]  }
   0x5   :  { %1910 = vmatprep.subr.bf16.mxu0 %v363_v5  ;;  %1978 = vmatprep.subr.bf16.mxu1 %v363_v5  ;;  %v1994_v15 = vld [vmem:[%s2868_s0 + $0xa0] sm:$0xff]   ;;  %v1996_v17 = vld [vmem:[%s2868_s0 + $0xa8] sm:$0xff]   ;;  %v1997_v18 = vld [vmem:[%s2868_s0 + $0x30] sm:$0xff]  }
   0x6   :  { %1911 = vmatpush3.bf16.msra.mxu0 %v363_v5  ;;  %1980 = vmatpush3.bf16.msra.mxu1 %v363_v5  ;;  %v1998_v19 = vld [vmem:[%s2868_s0 + $0xb0] sm:$0xff]   ;;  %v1999_v20 = vld [vmem:[%s2868_s0 + $0x38] sm:$0xff]   ;;  %v2001_v22 = vld [vmem:[%s2868_s0 + $0x40] sm:$0xff]  }
   0x7   :  { %1912 = vmatprep.subr.bf16.mxu0 %v1984_v6  ;;  %1979 = vmatprep.subr.bf16.mxu1 %v1984_v6  ;;  %v2000_v21 = vld [vmem:[%s2868_s0 + $0xb8] sm:$0xff]   ;;  %v2002_v23 = vld [vmem:[%s2868_s0 + $0xc0] sm:$0xff]   ;;  %v2003_v24 = vld [vmem:[%s2868_s0 + $0x48] sm:$0xff]  }
   0x8   :  { %v2004_v25 = vld [vmem:[%s2868_s0 + $0xc8] sm:$0xff]   ;;  %v2005_v26 = vld [vmem:[%s2868_s0 + $0x50] sm:$0xff]   ;;  %v2007_v28 = vld [vmem:[%s2868_s0 + $0x58] sm:$0xff]  }
   0x9   :  { %v2006_v27 = vld [vmem:[%s2868_s0 + $0xd0] sm:$0xff]   ;;  %v2008_v29 = vld [vmem:[%s2868_s0 + $0xd8] sm:$0xff]   ;;  %v2009_v30 = vld [vmem:[%s2868_s0 + $0x60] sm:$0xff]  }
   0xa   :  { %1913 = vmatpush3.bf16.msra.mxu0 %v1984_v6  ;;  %1981 = vmatpush3.bf16.msra.mxu1 %v1984_v6  ;;  %v2010_v31 = vld [vmem:[%s2868_s0 + $0xe0] sm:$0xff]   ;;  %v2011_v32 = vld [vmem:[%s2868_s0 + $0x68] sm:$0xff]   ;;  %v2013_v34 = vld [vmem:[%s2868_s0 + $0x70] sm:$0xff]  }
   0xb   :  { %v2012_v33 = vld [vmem:[%s2868_s0 + $0xe8] sm:$0xff]   ;;  %v2014_v35 = vld [vmem:[%s2868_s0 + $0xf0] sm:$0xff]   ;;  %v2015_v36 = vld [vmem:[%s2868_s0 + $0x78] sm:$0xff]  }
   0xc   :  { %v2016_v37 = vld [vmem:[%s2868_s0 + $0xf8] sm:$0xff]   ;;  %v2431_v38 = vld [vmem:[%s2869_s2] ss:$0 sm:$0xff] }
   0xd   :  { %1915 = vmatmul.mubr.msk.bf16.vlgmr.msra.gmra.mxu0 %vm261_vm2, %v1987_v8  ;;  %1947 = vmatmul.mubr.msk.bf16.vlgmr.msra.gmra.mxu1 %vm261_vm2, %v1988_v9 }
   0xe   :  { %1918 = vmatprep.mubr.msk.bf16.mxu0 %vm261_vm2, %v1989_v10  ;;  %1950 = vmatprep.mubr.msk.bf16.mxu1 %vm261_vm2, %v1990_v11 }
  0x15   :  { %1919 = vmatmul.mubr.msk.bf16.gmra.mxu0 %vm261_vm2, %v1991_v12  ;;  %1951 = vmatmul.mubr.msk.bf16.gmra.mxu1 %vm261_vm2, %v1992_v13 }
  0x16   :  { %1922 = vmatprep.mubr.msk.bf16.mxu0 %vm261_vm2, %v1993_v14  ;;  %1954 = vmatprep.mubr.msk.bf16.mxu1 %vm261_vm2, %v1994_v15 }
  0x1d   :  { %1923 = vmatmul.mubr.msk.bf16.gmra.mxu0 %vm261_vm2, %v1995_v16  ;;  %1955 = vmatmul.mubr.msk.bf16.gmra.mxu1 %vm261_vm2, %v1996_v17 }
  0x1e   :  { %1926 = vmatprep.mubr.msk.bf16.mxu0 %vm261_vm2, %v1997_v18  ;;  %1958 = vmatprep.mubr.msk.bf16.mxu1 %vm261_vm2, %v1998_v19 }
  0x25   :  { %1927 = vmatmul.mubr.msk.bf16.gmra.mxu0 %vm261_vm2, %v1999_v20  ;;  %1959 = vmatmul.mubr.msk.bf16.gmra.mxu1 %vm261_vm2, %v2000_v21 }
  0x26   :  { %1930 = vmatprep.mubr.msk.bf16.mxu0 %vm261_vm2, %v2001_v22  ;;  %1962 = vmatprep.mubr.msk.bf16.mxu1 %vm261_vm2, %v2002_v23 }
  0x2d   :  { %1931 = vmatmul.mubr.msk.bf16.gmra.mxu0 %vm261_vm2, %v2003_v24  ;;  %1963 = vmatmul.mubr.msk.bf16.gmra.mxu1 %vm261_vm2, %v2004_v25 }
  0x2e   :  { %1934 = vmatprep.mubr.msk.bf16.mxu0 %vm261_vm2, %v2005_v26  ;;  %1966 = vmatprep.mubr.msk.bf16.mxu1 %vm261_vm2, %v2006_v27 }
  0x35   :  { %1935 = vmatmul.mubr.msk.bf16.gmra.mxu0 %vm261_vm2, %v2007_v28  ;;  %1967 = vmatmul.mubr.msk.bf16.gmra.mxu1 %vm261_vm2, %v2008_v29 }
  0x36   :  { %1938 = vmatprep.mubr.msk.bf16.mxu0 %vm261_vm2, %v2009_v30  ;;  %1970 = vmatprep.mubr.msk.bf16.mxu1 %vm261_vm2, %v2010_v31 }
  0x3d   :  { %1939 = vmatmul.mubr.msk.bf16.gmra.mxu0 %vm261_vm2, %v2011_v32  ;;  %1971 = vmatmul.mubr.msk.bf16.gmra.mxu1 %vm261_vm2, %v2012_v33 }
  0x3e   :  { %1942 = vmatprep.mubr.msk.bf16.mxu0 %vm261_vm2, %v2013_v34  ;;  %1974 = vmatprep.mubr.msk.bf16.mxu1 %vm261_vm2, %v2014_v35 }
  0x45   :  { %1943 = vmatmul.mubr.msk.bf16.gmra.mxu0 %vm261_vm2, %v2015_v36  ;;  %1975 = vmatmul.mubr.msk.bf16.gmra.mxu1 %vm261_vm2, %v2016_v37 }
  0xcd   :  { %v1916_v39 = vpop.f32.mrf.mxu0  ;;  %v1948_v40 = vpop.f32.mrf.mxu1 }
  0xce   :  { %v2434_v41 = vadd.f32 %v1916_v39, %v2431_v38  ;;  %v2437_v42 = vadd.f32 %v1948_v40, %v2431_v38 }
  0xcf   :  { %v399_v43 = vpop.f32.mrf.mxu0  ;;  %v527_v44 = vpop.f32.mrf.mxu1 }
  0xd0   :  { %v1495_v45 = vmul.f32 -1.442695, %v2434_v41  ;;  %v1527_v46 = vmul.f32 -1.442695, %v2437_v42  ;;  %v2442_v47 = vadd.f32 %v2431_v38, %v399_v43  ;;  %v2445_v48 = vadd.f32 %v2431_v38, %v527_v44 }
  0xd1   :  { %v1917_v49 = vpop.f32.mrf.mxu0  ;;  %v1949_v50 = vpop.f32.mrf.mxu1 }
  0xd2   :  { %2017 = vpow2.f32 %v1495_v45  ;;  %v1493_v51 = vmul.f32 -1.442695, %v2442_v47  ;;  %v1525_v52 = vmul.f32 -1.442695, %v2445_v48  ;;  %v2450_v53 = vadd.f32 %v1917_v49, %v2431_v38 }
  0xd3   :  { %2019 = vpow2.f32 %v1527_v46  ;;  %v2453_v54 = vadd.f32 %v1949_v50, %v2431_v38  ;;  %v402_v55 = vpop.f32.mrf.mxu0  ;;  %v530_v56 = vpop.f32.mrf.mxu1 }
  0xd4   :  { %2021 = vpow2.f32 %v1493_v51  ;;  %v1496_v57 = vmul.f32 -1.442695, %v2450_v53  ;;  %v2457_v58 = vadd.f32 %v2431_v38, %v402_v55  ;;  %v2460_v59 = vadd.f32 %v2431_v38, %v530_v56 }
  0xd5   :  { %2023 = vpow2.f32 %v1525_v52  ;;  %v1528_v60 = vmul.f32 -1.442695, %v2453_v54  ;;  %v1920_v61 = vpop.f32.mrf.mxu0  ;;  %v1952_v62 = vpop.f32.mrf.mxu1 }
  0xd6   :  { %2025 = vpow2.f32 %v1496_v57  ;;  %v1494_v63 = vmul.f32 -1.442695, %v2457_v58  ;;  %v1526_v0 = vmul.f32 -1.442695, %v2460_v59  ;;  %v2466_v1 = vadd.f32 %v1920_v61, %v2431_v38 }
  0xd7   :  { %2027 = vpow2.f32 %v1528_v60  ;;  %v2469_v2 = vadd.f32 %v1952_v62, %v2431_v38  ;;  %v415_v3 = vpop.f32.mrf.mxu0  ;;  %v543_v4 = vpop.f32.mrf.mxu1 }
  0xd8   :  { %2029 = vpow2.f32 %v1494_v63  ;;  %v1499_v5 = vmul.f32 -1.442695, %v2466_v1  ;;  %v2473_v6 = vadd.f32 %v2431_v38, %v415_v3  ;;  %v2476_v7 = vadd.f32 %v2431_v38, %v543_v4 }
  0xd9   :  { %2031 = vpow2.f32 %v1526_v0  ;;  %v1531_v8 = vmul.f32 -1.442695, %v2469_v2  ;;  %v1921_v9 = vpop.f32.mrf.mxu0  ;;  %v1953_v10 = vpop.f32.mrf.mxu1 }
  0xda   :  { %2033 = vpow2.f32 %v1499_v5  ;;  %v1497_v11 = vmul.f32 -1.442695, %v2473_v6  ;;  %v1529_v12 = vmul.f32 -1.442695, %v2476_v7  ;;  %v2482_v13 = vadd.f32 %v1921_v9, %v2431_v38 }
  0xdb   :  { %2035 = vpow2.f32 %v1531_v8  ;;  %v2485_v14 = vadd.f32 %v1953_v10, %v2431_v38  ;;  %v418_v15 = vpop.f32.mrf.mxu0  ;;  %v546_v16 = vpop.f32.mrf.mxu1 }
  0xdc   :  { %2037 = vpow2.f32 %v1497_v11  ;;  %v1500_v17 = vmul.f32 -1.442695, %v2482_v13  ;;  %v2489_v18 = vadd.f32 %v2431_v38, %v418_v15  ;;  %v2492_v19 = vadd.f32 %v2431_v38, %v546_v16 }
  0xdd   :  { %2039 = vpow2.f32 %v1529_v12  ;;  %v1532_v20 = vmul.f32 -1.442695, %v2485_v14  ;;  %v1924_v21 = vpop.f32.mrf.mxu0  ;;  %v1956_v22 = vpop.f32.mrf.mxu1 }
  0xde   :  { %2041 = vpow2.f32 %v1500_v17  ;;  %v1498_v23 = vmul.f32 -1.442695, %v2489_v18  ;;  %v1530_v24 = vmul.f32 -1.442695, %v2492_v19  ;;  %v2498_v55 = vadd.f32 %v1924_v21, %v2431_v38 }
  0xdf   :  { %v2018_v25 = vpop.eup %2017  ;;  %2043 = vpow2.f32 %v1532_v20  ;;  %v431_v26 = vpop.f32.mrf.mxu0  ;;  %v2501_v3 = vadd.f32 %v1956_v22, %v2431_v38 }
  0xe0   :  { %v559_v27 = vpop.f32.mrf.mxu1  ;;  %v2020_v28 = vpop.eup %2019  ;;  %v848_v29 = vadd.f32 1.0, %v2018_v25  ;;  %2045 = vpow2.f32 %v1498_v23  ;;  %v1503_v9 = vmul.f32 -1.442695, %v2498_v55  ;;  %v2505_v10 = vadd.f32 %v2431_v38, %v431_v26 }
  0xe1   :  { %v2022_v30 = vpop.eup %2021  ;;  %v880_v31 = vadd.f32 1.0, %v2020_v28  ;;  %2047 = vpow2.f32 %v1530_v24  ;;  %v1925_v32 = vpop.f32.mrf.mxu0  ;;  %v2508_v15 = vadd.f32 %v2431_v38, %v559_v27 }
  0xe2   :  { %v2024_v33 = vpop.eup %2023  ;;  %2049 = vrcp.f32 %v848_v29  ;;  %v846_v34 = vadd.f32 1.0, %v2022_v30  ;;  %v1957_v35 = vpop.f32.mrf.mxu1  ;;  %v2511_v16 = vadd.f32 %v1925_v32, %v2431_v38 }
  0xe3   :  { %v2026_v36 = vpop.eup %2025  ;;  %2051 = vrcp.f32 %v880_v31  ;;  %v878_v37 = vadd.f32 1.0, %v2024_v33  ;;  %v434_v45 = vpop.f32.mrf.mxu0  ;;  %v2514_v21 = vadd.f32 %v1957_v35, %v2431_v38  ;;  %v1535_v31 = vmul.f32 -1.442695, %v2501_v3 }
  0xe4   :  { %v2028_v39 = vpop.eup %2027  ;;  %2053 = vrcp.f32 %v846_v34  ;;  %v849_v40 = vadd.f32 1.0, %v2026_v36  ;;  %v562_v50 = vpop.f32.mrf.mxu1  ;;  %v2517_v22 = vadd.f32 %v2431_v38, %v434_v45  ;;  %v1501_v34 = vmul.f32 -1.442695, %v2505_v10 }
  0xe5   :  { %v2030_v43 = vpop.eup %2029  ;;  %2055 = vrcp.f32 %v878_v37  ;;  %v881_v44 = vadd.f32 1.0, %v2028_v39  ;;  %v1928_v62 = vpop.f32.mrf.mxu0  ;;  %v2520_v26 = vadd.f32 %v2431_v38, %v562_v50  ;;  %v1533_v36 = vmul.f32 -1.442695, %v2508_v15 }
  0xe6   :  { %v2032_v46 = vpop.eup %2031  ;;  %2057 = vrcp.f32 %v849_v40  ;;  %v847_v49 = vadd.f32 1.0, %v2030_v43  ;;  %v1960_v4 = vpop.f32.mrf.mxu1  ;;  %v2523_v27 = vadd.f32 %v1928_v62, %v2431_v38  ;;  %v1504_v37 = vmul.f32 -1.442695, %v2511_v16 }
  0xe7   :  { %v2034_v51 = vpop.eup %2033  ;;  %2059 = vrcp.f32 %v881_v44  ;;  %v879_v52 = vadd.f32 1.0, %v2032_v46  ;;  %v447_v23 = vpop.f32.mrf.mxu0  ;;  %v2527_v32 = vadd.f32 %v1960_v4, %v2431_v38  ;;  %v1536_v39 = vmul.f32 -1.442695, %v2514_v21 }
  0xe8   :  { %v2036_v56 = vpop.eup %2035  ;;  %2061 = vrcp.f32 %v847_v49  ;;  %v852_v57 = vadd.f32 1.0, %v2034_v51  ;;  %v575_v28 = vpop.f32.mrf.mxu1  ;;  %v1502_v44 = vmul.f32 -1.442695, %v2517_v22  ;;  %v1534_v45 = vmul.f32 -1.442695, %v2520_v26 }
  0xe9   :  { %v2038_v60 = vpop.eup %2037  ;;  %2063 = vrcp.f32 %v879_v52  ;;  %v884_v61 = vadd.f32 1.0, %v2036_v56  ;;  %v1929_v40 = vpop.f32.mrf.mxu0  ;;  %v1507_v46 = vmul.f32 -1.442695, %v2523_v27  ;;  %v1539_v51 = vmul.f32 -1.442695, %v2527_v32 }
  0xea   :  { %v2040_v63 = vpop.eup %2039  ;;  %2065 = vrcp.f32 %v852_v57  ;;  %v850_v0 = vadd.f32 1.0, %v2038_v60  ;;  %v1961_v49 = vpop.f32.mrf.mxu1  ;;  %v2538_v52 = vadd.f32 %v2431_v38, %v447_v23  ;;  %v2541_v56 = vadd.f32 %v2431_v38, %v575_v28 }
  0xeb   :  { %v2042_v5 = vpop.eup %2041  ;;  %2067 = vrcp.f32 %v884_v61  ;;  %v882_v8 = vadd.f32 1.0, %v2040_v63  ;;  %v2546_v62 = vadd.f32 %v1929_v40, %v2431_v38 }
  0xec   :  { %v2044_v11 = vpop.eup %2043  ;;  %2069 = vrcp.f32 %v850_v0  ;;  %v853_v12 = vadd.f32 1.0, %v2042_v5  ;;  %v2551_v5 = vadd.f32 %v1961_v49, %v2431_v38 }
  0xed   :  { %v2046_v17 = vpop.eup %2045  ;;  %2071 = vrcp.f32 %v882_v8  ;;  %v885_v20 = vadd.f32 1.0, %v2044_v11  ;;  %v450_v8 = vpop.f32.mrf.mxu0 }
  0xee   :  { %v2048_v24 = vpop.eup %2047  ;;  %2073 = vrcp.f32 %v853_v12  ;;  %v851_v25 = vadd.f32 1.0, %v2046_v17  ;;  %v578_v12 = vpop.f32.mrf.mxu1 }
  0xef   :  { %v2050_v29 = vpop.eup %2049  ;;  %2075 = vrcp.f32 %v885_v20  ;;  %v883_v30 = vadd.f32 1.0, %v2048_v24  ;;  %v2569_v28 = vadd.f32 %v2431_v38, %v578_v12 }
  0xf0   :  { %v2052_v33 = vpop.eup %2051  ;;  %2077 = vrcp.f32 %v851_v25  ;;  %v1040_v60 = vmul.f32 %v2050_v29, %v2434_v41  ;;  %v2571_v29 = vpop.f32.mrf.mxu0 }
  0xf1   :  { %v2054_v35 = vpop.eup %2053  ;;  %2079 = vrcp.f32 %v883_v30  ;;  %v1072_v0 = vmul.f32 %v2052_v33, %v2437_v42  ;;  %v2577_v33 = vpop.f32.mrf.mxu1 }
  0xf2   :  { %v2056_v43 = vpop.eup %2055  ;;  %2081 = vpow2.f32 %v1503_v9  ;;  %v1038_v11 = vmul.f32 %v2054_v35, %v2442_v47  ;;  %v1505_v47 = vmul.f32 -1.442695, %v2538_v52  ;;  %v1540_v35 = vmul.f32 -1.442695, %v2551_v5  ;;  %v2589_v49 = vpop.f32.mrf.mxu0 }
  0xf3   :  { %v2058_v50 = vpop.eup %2057  ;;  %2083 = vpow2.f32 %v1535_v31  ;;  %v1070_v20 = vmul.f32 %v2056_v43, %v2445_v48  ;;  %v1508_v31 = vmul.f32 -1.442695, %v2546_v62 }
  0xf4   :  { %v2060_v57 = vpop.eup %2059  ;;  %v1041_v61 = vmul.f32 %v2058_v50, %v2450_v53  ;;  %2085 = vpow2.f32 %v1501_v34 }
  0xf5   :  { %v2062_v63 = vpop.eup %2061  ;;  %v1073_v4 = vmul.f32 %v2060_v57, %v2453_v54  ;;  %2087 = vpow2.f32 %v1533_v36 }
  0xf6   :  { %v2064_v9 = vpop.eup %2063  ;;  %v1693_v41 = vpack.c.bf16 %v1041_v61, %v1040_v60  ;;  %v1039_v53 = vmul.f32 %v2062_v63, %v2457_v58  ;;  %2089 = vpow2.f32 %v1504_v37  ;;  %v2562_v58 = vadd.f32 %v2431_v38, %v450_v8 }
  0xf7   :  { %v2066_v17 = vpop.eup %2065  ;;  %v1773_v23 = vpack.c.bf16 %v1073_v4, %v1072_v0  ;;  %v1071_v42 = vmul.f32 %v2064_v9, %v2460_v59  ;;  %2091 = vpow2.f32 %v1536_v39  ;;  %v1537_v59 = vmul.f32 -1.442695, %v2541_v56 }
  0xf8   :  { %v2068_v54 = vpop.eup %2067  ;;  %1845 = vst [vmem:[%s2870_s3 + $0x8] sm:$0xff] %v1693_v41   ;;  %v1688_v24 = vpack.c.bf16 %v1039_v53, %v1038_v11  ;;  %2093 = vpow2.f32 %v1502_v44  ;;  %v1044_v37 = vmul.f32 %v2066_v17, %v2466_v1  ;;  %v1506_v40 = vmul.f32 -1.442695, %v2562_v58 }
  0xf9   :  { %v2070_v25 = vpop.eup %2069  ;;  %1861 = vst [vmem:[%s2870_s3 + $0x88] sm:$0xff] %v1773_v23   ;;  %v1768_v48 = vpack.c.bf16 %v1071_v42, %v1070_v20  ;;  %2095 = vpow2.f32 %v1534_v45  ;;  %v1076_v44 = vmul.f32 %v2068_v54, %v2469_v2 }
  0xfa   :  { %v2072_v30 = vpop.eup %2071  ;;  %1689 = vst [vmem:[%s2870_s3] sm:$0xff] %v1688_v24   ;;  %2097 = vpow2.f32 %v1507_v46  ;;  %v1538_v46 = vmul.f32 -1.442695, %v2569_v28 }
  0xfb   :  { %v2074_v34 = vpop.eup %2073  ;;  %1860 = vst [vmem:[%s2870_s3 + $0x80] sm:$0xff] %v1768_v48   ;;  %2099 = vpow2.f32 %v1539_v51  ;;  %v1042_v51 = vmul.f32 %v2070_v25, %v2473_v6  ;;  %v1074_v61 = vmul.f32 %v2072_v30, %v2476_v7  ;;  %v1933_v7 = vpop.f32.mrf.mxu0 }
  0xfc   :  { %v2076_v36 = vpop.eup %2075  ;;  %v1045_v39 = vmul.f32 %v2074_v34, %v2482_v13  ;;  %2101 = vpow2.f32 %v1505_v47  ;;  %v591_v13 = vpop.f32.mrf.mxu1 }
  0xfd   :  { %v2078_v43 = vpop.eup %2077  ;;  %v1077_v45 = vmul.f32 %v2076_v36, %v2485_v14  ;;  %2103 = vpow2.f32 %v1537_v59  ;;  %v466_v42 = vpop.f32.mrf.mxu0  ;;  %v2609_v59 = vadd.f32 %v2571_v29, %v2431_v38 }
  0xfe   :  { %v2080_v50 = vpop.eup %2079  ;;  %v1703_v57 = vpack.c.bf16 %v1045_v39, %v1044_v37  ;;  %v1043_v1 = vmul.f32 %v2078_v43, %v2489_v18  ;;  %2105 = vpow2.f32 %v1508_v31  ;;  %v1965_v11 = vpop.f32.mrf.mxu1 }
  0xff   :  { %v2082_v60 = vpop.eup %2081  ;;  %v1783_v63 = vpack.c.bf16 %v1077_v45, %v1076_v44  ;;  %v1075_v2 = vmul.f32 %v2080_v50, %v2492_v19  ;;  %2107 = vpow2.f32 %v1540_v35  ;;  %v1936_v36 = vpop.f32.mrf.mxu0  ;;  %v1511_v29 = vmul.f32 -1.442695, %v2609_v59 }
 0x100   :  { %v2084_v14 = vpop.eup %2083  ;;  %1847 = vst [vmem:[%s2870_s3 + $0x18] sm:$0xff] %v1703_v57   ;;  %v1698_v0 = vpack.c.bf16 %v1043_v1, %v1042_v51  ;;  %v856_v4 = vadd.f32 1.0, %v2082_v60  ;;  %2109 = vpow2.f32 %v1506_v40  ;;  %v594_v47 = vpop.f32.mrf.mxu1  ;;  %v2613_v40 = vadd.f32 %v2577_v33, %v2431_v38 }
 0x101   :  { %v2086_v6 = vpop.eup %2085  ;;  %1863 = vst [vmem:[%s2870_s3 + $0x98] sm:$0xff] %v1783_v63   ;;  %v1778_v18 = vpack.c.bf16 %v1075_v2, %v1074_v61  ;;  %v888_v8 = vadd.f32 1.0, %v2084_v14  ;;  %2111 = vpow2.f32 %v1538_v46  ;;  %v2618_v46 = vadd.f32 %v2431_v38, %v2589_v49  ;;  %v479_v49 = vpop.f32.mrf.mxu0 }
 0x102   :  { %v2088_v9 = vpop.eup %2087  ;;  %1846 = vst [vmem:[%s2870_s3 + $0x10] sm:$0xff] %v1698_v0   ;;  %2113 = vrcp.f32 %v856_v4  ;;  %v854_v19 = vadd.f32 1.0, %v2086_v6  ;;  %v1968_v43 = vpop.f32.mrf.mxu1  ;;  %v2621_v57 = vadd.f32 %v2431_v38, %v591_v13  ;;  %v2624_v1 = vadd.f32 %v1933_v7, %v2431_v38 }
 0x103   :  { %v2090_v41 = vpop.eup %2089  ;;  %1862 = vst [vmem:[%s2870_s3 + $0x90] sm:$0xff] %v1778_v18   ;;  %2115 = vrcp.f32 %v888_v8  ;;  %v886_v53 = vadd.f32 1.0, %v2088_v9  ;;  %v2627_v61 = vadd.f32 %v1965_v11, %v2431_v38  ;;  %v2630_v63 = vadd.f32 %v2431_v38, %v466_v42 }
 0x104   :  { %v2092_v12 = vpop.eup %2091  ;;  %2117 = vrcp.f32 %v854_v19  ;;  %v857_v17 = vadd.f32 1.0, %v2090_v41  ;;  %v2633_v0 = vadd.f32 %v2431_v38, %v594_v47  ;;  %v2636_v13 = vadd.f32 %v1936_v36, %v2431_v38  ;;  %v607_v4 = vpop.f32.mrf.mxu1 }
 0x105   :  { %v2094_v20 = vpop.eup %2093  ;;  %2119 = vrcp.f32 %v886_v53  ;;  %v889_v23 = vadd.f32 1.0, %v2092_v12  ;;  %v1543_v8 = vmul.f32 -1.442695, %v2613_v40  ;;  %v2640_v7 = vadd.f32 %v1968_v43, %v2431_v38 }
 0x106   :  { %v2096_v54 = vpop.eup %2095  ;;  %2121 = vrcp.f32 %v857_v17  ;;  %v855_v24 = vadd.f32 1.0, %v2094_v20  ;;  %v1509_v19 = vmul.f32 -1.442695, %v2618_v46  ;;  %v1541_v41 = vmul.f32 -1.442695, %v2621_v57  ;;  %v1937_v17 = vpop.f32.mrf.mxu0 }
 0x107   :  { %v2098_v25 = vpop.eup %2097  ;;  %2123 = vrcp.f32 %v889_v23  ;;  %v887_v48 = vadd.f32 1.0, %v2096_v54  ;;  %v1512_v53 = vmul.f32 -1.442695, %v2624_v1  ;;  %v1544_v12 = vmul.f32 -1.442695, %v2627_v61 }
 0x108   :  { %v2100_v30 = vpop.eup %2099  ;;  %2125 = vrcp.f32 %v855_v24  ;;  %v860_v31 = vadd.f32 1.0, %v2098_v25  ;;  %v1510_v23 = vmul.f32 -1.442695, %v2630_v63  ;;  %v1542_v42 = vmul.f32 -1.442695, %v2633_v0  ;;  %v1969_v24 = vpop.f32.mrf.mxu1 }
 0x109   :  { %v2102_v34 = vpop.eup %2101  ;;  %2127 = vrcp.f32 %v887_v48  ;;  %v892_v35 = vadd.f32 1.0, %v2100_v30  ;;  %v1515_v54 = vmul.f32 -1.442695, %v2636_v13  ;;  %v1547_v25 = vmul.f32 -1.442695, %v2640_v7 }
 0x10a   :  { %v2104_v37 = vpop.eup %2103  ;;  %2129 = vrcp.f32 %v860_v31  ;;  %v858_v39 = vadd.f32 1.0, %v2102_v34  ;;  %v2651_v48 = vadd.f32 %v2431_v38, %v479_v49  ;;  %v2654_v30 = vadd.f32 %v2431_v38, %v607_v4 }
 0x10b   :  { %v2106_v44 = vpop.eup %2105  ;;  %2131 = vrcp.f32 %v892_v35  ;;  %v890_v45 = vadd.f32 1.0, %v2104_v37  ;;  %v2659_v36 = vadd.f32 %v1937_v17, %v2431_v38 }
 0x10c   :  { %v2108_v50 = vpop.eup %2107  ;;  %2133 = vrcp.f32 %v858_v39  ;;  %v861_v51 = vadd.f32 1.0, %v2106_v44  ;;  %v2664_v44 = vadd.f32 %v1969_v24, %v2431_v38 }
 0x10d   :  { %v2110_v33 = vpop.eup %2109  ;;  %2135 = vrcp.f32 %v890_v45  ;;  %v893_v60 = vadd.f32 1.0, %v2108_v50  ;;  %v482_v45 = vpop.f32.mrf.mxu0 }
 0x10e   :  { %v2112_v2 = vpop.eup %2111  ;;  %2137 = vrcp.f32 %v861_v51  ;;  %v859_v14 = vadd.f32 1.0, %v2110_v33  ;;  %v610_v51 = vpop.f32.mrf.mxu1 }
 0x10f   :  { %v2114_v6 = vpop.eup %2113  ;;  %2139 = vrcp.f32 %v893_v60  ;;  %v891_v18 = vadd.f32 1.0, %v2112_v2  ;;  %v2682_v4 = vadd.f32 %v2431_v38, %v610_v51 }
 0x110   :  { %v2116_v9 = vpop.eup %2115  ;;  %2141 = vrcp.f32 %v859_v14  ;;  %v1048_v34 = vmul.f32 %v2114_v6, %v2498_v55  ;;  %v2684_v6 = vpop.f32.mrf.mxu0 }
 0x111   :  { %v2118_v11 = vpop.eup %2117  ;;  %2143 = vrcp.f32 %v891_v18  ;;  %v1080_v39 = vmul.f32 %v2116_v9, %v2501_v3  ;;  %v2690_v9 = vpop.f32.mrf.mxu1 }
 0x112   :  { %v2120_v20 = vpop.eup %2119  ;;  %2145 = vpow2.f32 %v1511_v29  ;;  %v1046_v50 = vmul.f32 %v2118_v11, %v2505_v10  ;;  %v1513_v10 = vmul.f32 -1.442695, %v2651_v48  ;;  %v1548_v11 = vmul.f32 -1.442695, %v2664_v44  ;;  %v2702_v24 = vpop.f32.mrf.mxu0 }
 0x113   :  { %v2122_v47 = vpop.eup %2121  ;;  %2147 = vpow2.f32 %v1543_v8  ;;  %v1078_v60 = vmul.f32 %v2120_v20, %v2508_v15  ;;  %v1516_v8 = vmul.f32 -1.442695, %v2659_v36 }
 0x114   :  { %v2124_v31 = vpop.eup %2123  ;;  %v1049_v35 = vmul.f32 %v2122_v47, %v2511_v16  ;;  %2149 = vpow2.f32 %v1509_v19 }
 0x115   :  { %v2126_v37 = vpop.eup %2125  ;;  %v1081_v43 = vmul.f32 %v2124_v31, %v2514_v21  ;;  %2151 = vpow2.f32 %v1541_v41 }
 0x116   :  { %v2128_v29 = vpop.eup %2127  ;;  %v1713_v55 = vpack.c.bf16 %v1049_v35, %v1048_v34  ;;  %v1047_v16 = vmul.f32 %v2126_v37, %v2517_v22  ;;  %2153 = vpow2.f32 %v1512_v53  ;;  %v2675_v22 = vadd.f32 %v2431_v38, %v482_v45 }
 0x117   :  { %v2130_v33 = vpop.eup %2129  ;;  %v1793_v49 = vpack.c.bf16 %v1081_v43, %v1080_v39  ;;  %v1079_v3 = vmul.f32 %v2128_v29, %v2520_v26  ;;  %2155 = vpow2.f32 %v1544_v12  ;;  %v1545_v26 = vmul.f32 -1.442695, %v2654_v30 }
 0x118   :  { %v2132_v21 = vpop.eup %2131  ;;  %1849 = vst [vmem:[%s2870_s3 + $0x28] sm:$0xff] %v1713_v55   ;;  %v1708_v2 = vpack.c.bf16 %v1047_v16, %v1046_v50  ;;  %2157 = vpow2.f32 %v1510_v23  ;;  %v1052_v53 = vmul.f32 %v2130_v33, %v2523_v27  ;;  %v1514_v17 = vmul.f32 -1.442695, %v2675_v22 }
 0x119   :  { %v2134_v14 = vpop.eup %2133  ;;  %1865 = vst [vmem:[%s2870_s3 + $0xa8] sm:$0xff] %v1793_v49   ;;  %v1788_v15 = vpack.c.bf16 %v1079_v3, %v1078_v60  ;;  %2159 = vpow2.f32 %v1542_v42  ;;  %v1084_v23 = vmul.f32 %v2132_v21, %v2527_v32 }
 0x11a   :  { %v2136_v18 = vpop.eup %2135  ;;  %1848 = vst [vmem:[%s2870_s3 + $0x20] sm:$0xff] %v1708_v2   ;;  %2161 = vpow2.f32 %v1515_v54  ;;  %v1546_v54 = vmul.f32 -1.442695, %v2682_v4 }
 0x11b   :  { %v2138_v19 = vpop.eup %2137  ;;  %1864 = vst [vmem:[%s2870_s3 + $0xa0] sm:$0xff] %v1788_v15   ;;  %2163 = vpow2.f32 %v1547_v25  ;;  %v1050_v25 = vmul.f32 %v2134_v14, %v2538_v52  ;;  %v1082_v35 = vmul.f32 %v2136_v18, %v2541_v56  ;;  %v1941_v56 = vpop.f32.mrf.mxu0 }
 0x11c   :  { %v2140_v41 = vpop.eup %2139  ;;  %v1053_v12 = vmul.f32 %v2138_v19, %v2546_v62  ;;  %2165 = vpow2.f32 %v1513_v10  ;;  %v623_v62 = vpop.f32.mrf.mxu1 }
 0x11d   :  { %v2142_v20 = vpop.eup %2141  ;;  %v1085_v42 = vmul.f32 %v2140_v41, %v2551_v5  ;;  %2167 = vpow2.f32 %v1545_v26  ;;  %v498_v3 = vpop.f32.mrf.mxu0  ;;  %v2722_v26 = vadd.f32 %v2684_v6, %v2431_v38 }
 0x11e   :  { %v2144_v47 = vpop.eup %2143  ;;  %v1723_v31 = vpack.c.bf16 %v1053_v12, %v1052_v53  ;;  %v1051_v27 = vmul.f32 %v2142_v20, %v2562_v58  ;;  %2169 = vpow2.f32 %v1516_v8  ;;  %v1973_v50 = vpop.f32.mrf.mxu1 }
 0x11f   :  { %v2146_v34 = vpop.eup %2145  ;;  %v1803_v37 = vpack.c.bf16 %v1085_v42, %v1084_v23  ;;  %v1083_v32 = vmul.f32 %v2144_v47, %v2569_v28  ;;  %2171 = vpow2.f32 %v1548_v11  ;;  %v1944_v41 = vpop.f32.mrf.mxu0  ;;  %v1519_v6 = vmul.f32 -1.442695, %v2722_v26 }
 0x120   :  { %v2148_v5 = vpop.eup %2147  ;;  %1851 = vst [vmem:[%s2870_s3 + $0x38] sm:$0xff] %v1723_v31   ;;  %v1718_v39 = vpack.c.bf16 %v1051_v27, %v1050_v25  ;;  %v864_v43 = vadd.f32 1.0, %v2146_v34  ;;  %2173 = vpow2.f32 %v1514_v17  ;;  %v626_v10 = vpop.f32.mrf.mxu1  ;;  %v2726_v17 = vadd.f32 %v2690_v9, %v2431_v38 }
 0x121   :  { %v2150_v52 = vpop.eup %2149  ;;  %1867 = vst [vmem:[%s2870_s3 + $0xb8] sm:$0xff] %v1803_v37   ;;  %v1798_v58 = vpack.c.bf16 %v1083_v32, %v1082_v35  ;;  %v896_v45 = vadd.f32 1.0, %v2148_v5  ;;  %2175 = vpow2.f32 %v1546_v54  ;;  %v2731_v54 = vadd.f32 %v2431_v38, %v2702_v24  ;;  %v511_v24 = vpop.f32.mrf.mxu0 }
 0x122   :  { %v2152_v29 = vpop.eup %2151  ;;  %1850 = vst [vmem:[%s2870_s3 + $0x30] sm:$0xff] %v1718_v39   ;;  %2177 = vrcp.f32 %v864_v43  ;;  %v862_v28 = vadd.f32 1.0, %v2150_v52  ;;  %v1976_v20 = vpop.f32.mrf.mxu1  ;;  %v2734_v31 = vadd.f32 %v2431_v38, %v623_v62  ;;  %v2737_v27 = vadd.f32 %v1941_v56, %v2431_v38 }
 0x123   :  { %v2154_v55 = vpop.eup %2153  ;;  %1866 = vst [vmem:[%s2870_s3 + $0xb0] sm:$0xff] %v1798_v58   ;;  %2179 = vrcp.f32 %v896_v45  ;;  %v894_v16 = vadd.f32 1.0, %v2152_v29  ;;  %v2740_v35 = vadd.f32 %v1973_v50, %v2431_v38  ;;  %v2743_v37 = vadd.f32 %v2431_v38, %v498_v3 }
 0x124   :  { %v2156_v51 = vpop.eup %2155  ;;  %2181 = vrcp.f32 %v862_v28  ;;  %v865_v33 = vadd.f32 1.0, %v2154_v55  ;;  %v2746_v39 = vadd.f32 %v2431_v38, %v626_v10  ;;  %v2749_v62 = vadd.f32 %v1944_v41, %v2431_v38  ;;  %v639_v43 = vpop.f32.mrf.mxu1 }
 0x125   :  { %v2158_v60 = vpop.eup %2157  ;;  %2183 = vrcp.f32 %v894_v16  ;;  %v897_v49 = vadd.f32 1.0, %v2156_v51  ;;  %v1551_v45 = vmul.f32 -1.442695, %v2726_v17  ;;  %v2753_v56 = vadd.f32 %v1976_v20, %v2431_v38 }
 0x126   :  { %v2160_v21 = vpop.eup %2159  ;;  %2185 = vrcp.f32 %v865_v33  ;;  %v863_v2 = vadd.f32 1.0, %v2158_v60  ;;  %v1517_v28 = vmul.f32 -1.442695, %v2731_v54  ;;  %v1549_v55 = vmul.f32 -1.442695, %v2734_v31  ;;  %v1945_v33 = vpop.f32.mrf.mxu0 }
 0x127   :  { %v2162_v14 = vpop.eup %2161  ;;  %2187 = vrcp.f32 %v897_v49  ;;  %v895_v15 = vadd.f32 1.0, %v2160_v21  ;;  %v1520_v16 = vmul.f32 -1.442695, %v2737_v27  ;;  %v1552_v51 = vmul.f32 -1.442695, %v2740_v35 }
 0x128   :  { %v2164_v18 = vpop.eup %2163  ;;  %2189 = vrcp.f32 %v863_v2  ;;  %v868_v8 = vadd.f32 1.0, %v2162_v14  ;;  %v1518_v49 = vmul.f32 -1.442695, %v2743_v37  ;;  %v1550_v3 = vmul.f32 -1.442695, %v2746_v39  ;;  %v1977_v2 = vpop.f32.mrf.mxu1 }
 0x129   :  { %v2166_v19 = vpop.eup %2165  ;;  %2191 = vrcp.f32 %v895_v15  ;;  %v900_v11 = vadd.f32 1.0, %v2164_v18  ;;  %v1523_v21 = vmul.f32 -1.442695, %v2749_v62  ;;  %v1555_v14 = vmul.f32 -1.442695, %v2753_v56 }
 0x12a   :  { %v2168_v53 = vpop.eup %2167  ;;  %2193 = vrcp.f32 %v868_v8  ;;  %v866_v12 = vadd.f32 1.0, %v2166_v19  ;;  %v2764_v15 = vadd.f32 %v2431_v38, %v511_v24  ;;  %v2767_v18 = vadd.f32 %v2431_v38, %v639_v43 }
 0x12b   :  { %v2170_v23 = vpop.eup %2169  ;;  %2195 = vrcp.f32 %v900_v11  ;;  %v898_v42 = vadd.f32 1.0, %v2168_v53  ;;  %v2772_v41 = vadd.f32 %v1945_v33, %v2431_v38 }
 0x12c   :  { %v2172_v47 = vpop.eup %2171  ;;  %2197 = vrcp.f32 %v866_v12  ;;  %v869_v25 = vadd.f32 1.0, %v2170_v23  ;;  %v2777_v23 = vadd.f32 %v1977_v2, %v2431_v38 }
 0x12d   :  { %v2174_v9 = vpop.eup %2173  ;;  %2199 = vrcp.f32 %v898_v42  ;;  %v901_v34 = vadd.f32 1.0, %v2172_v47  ;;  %v514_v42 = vpop.f32.mrf.mxu0 }
 0x12e   :  { %v2176_v32 = vpop.eup %2175  ;;  %2201 = vrcp.f32 %v869_v25  ;;  %v867_v5 = vadd.f32 1.0, %v2174_v9  ;;  %v642_v25 = vpop.f32.mrf.mxu1 }
 0x12f   :  { %v2178_v52 = vpop.eup %2177  ;;  %2203 = vrcp.f32 %v901_v34  ;;  %v899_v58 = vadd.f32 1.0, %v2176_v32  ;;  %v2795_v43 = vadd.f32 %v2431_v38, %v642_v25 }
 0x130   :  { %v2180_v29 = vpop.eup %2179  ;;  %2205 = vrcp.f32 %v867_v5  ;;  %v1056_v19 = vmul.f32 %v2178_v52, %v2609_v59 }
 0x131   :  { %v2182_v50 = vpop.eup %2181  ;;  %2207 = vrcp.f32 %v899_v58  ;;  %v1088_v12 = vmul.f32 %v2180_v29, %v2613_v40  ;;  %v1524_v58 = vmul.f32 -1.442695, %v2772_v41  ;;  %v1556_v29 = vmul.f32 -1.442695, %v2777_v23 }
 0x132   :  { %v2184_v60 = vpop.eup %2183  ;;  %2209 = vpow2.f32 %v1519_v6  ;;  %v1054_v47 = vmul.f32 %v2182_v50, %v2618_v46  ;;  %v1521_v46 = vmul.f32 -1.442695, %v2764_v15 }
 0x133   :  { %v2186_v10 = vpop.eup %2185  ;;  %2211 = vpow2.f32 %v1551_v45  ;;  %v1086_v34 = vmul.f32 %v2184_v60, %v2621_v57  ;;  %v1554_v60 = vmul.f32 -1.442695, %v2795_v43 }
 0x134   :  { %v2188_v8 = vpop.eup %2187  ;;  %v1057_v11 = vmul.f32 %v2186_v10, %v2624_v1  ;;  %2213 = vpow2.f32 %v1517_v28 }
 0x135   :  { %v2190_v53 = vpop.eup %2189  ;;  %v1089_v20 = vmul.f32 %v2188_v8, %v2627_v61  ;;  %2215 = vpow2.f32 %v1549_v55 }
 0x136   :  { %v2192_v6 = vpop.eup %2191  ;;  %v1733_v59 = vpack.c.bf16 %v1057_v11, %v1056_v19  ;;  %v1055_v1 = vmul.f32 %v2190_v53, %v2630_v63  ;;  %2217 = vpow2.f32 %v1520_v16  ;;  %v2788_v63 = vadd.f32 %v2431_v38, %v514_v42 }
 0x137   :  { %v2194_v9 = vpop.eup %2193  ;;  %v1813_v24 = vpack.c.bf16 %v1089_v20, %v1088_v12  ;;  %v1087_v40 = vmul.f32 %v2192_v6, %v2633_v0  ;;  %2219 = vpow2.f32 %v1552_v51  ;;  %v1553_v0 = vmul.f32 -1.442695, %v2767_v18 }
 0x138   :  { %v2196_v61 = vpop.eup %2195  ;;  %1853 = vst [vmem:[%s2870_s3 + $0x48] sm:$0xff] %v1733_v59   ;;  %v1728_v32 = vpack.c.bf16 %v1055_v1, %v1054_v47  ;;  %2221 = vpow2.f32 %v1518_v49  ;;  %v1060_v38 = vmul.f32 %v2194_v9, %v2636_v13  ;;  %v1522_v55 = vmul.f32 -1.442695, %v2788_v63 }
 0x139   :  { %v2198_v5 = vpop.eup %2197  ;;  %1869 = vst [vmem:[%s2870_s3 + $0xc8] sm:$0xff] %v1813_v24   ;;  %v1808_v57 = vpack.c.bf16 %v1087_v40, %v1086_v34  ;;  %2223 = vpow2.f32 %v1550_v3  ;;  %v1092_v51 = vmul.f32 %v2196_v61, %v2640_v7 }
 0x13a   :  { %v2200_v52 = vpop.eup %2199  ;;  %1852 = vst [vmem:[%s2870_s3 + $0x40] sm:$0xff] %v1728_v32   ;;  %2225 = vpow2.f32 %v1523_v21  ;;  %v1058_v3 = vmul.f32 %v2198_v5, %v2651_v48 }
 0x13b   :  { %v2202_v45 = vpop.eup %2201  ;;  %1868 = vst [vmem:[%s2870_s3 + $0xc0] sm:$0xff] %v1808_v57   ;;  %2227 = vpow2.f32 %v1555_v14 }
 0x13c   :  { %v2204_v28 = vpop.eup %2203  ;;  %v1061_v50 = vmul.f32 %v2202_v45, %v2659_v36  ;;  %2229 = vpow2.f32 %v1521_v46  ;;  %v1090_v36 = vmul.f32 %v2200_v52, %v2654_v30 }
 0x13d   :  { %v2206_v16 = vpop.eup %2205  ;;  %v1093_v33 = vmul.f32 %v2204_v28, %v2664_v44  ;;  %2231 = vpow2.f32 %v1553_v0 }
 0x13e   :  { %v2208_v49 = vpop.eup %2207  ;;  %v1743_v21 = vpack.c.bf16 %v1061_v50, %v1060_v38  ;;  %v1059_v2 = vmul.f32 %v2206_v16, %v2675_v22  ;;  %2233 = vpow2.f32 %v1524_v58 }
 0x13f   :  { %v2210_v13 = vpop.eup %2209  ;;  %v1823_v10 = vpack.c.bf16 %v1093_v33, %v1092_v51  ;;  %v1091_v14 = vmul.f32 %v2208_v49, %v2682_v4  ;;  %2235 = vpow2.f32 %v1556_v29 }
 0x140   :  { %v2212_v7 = vpop.eup %2211  ;;  %1855 = vst [vmem:[%s2870_s3 + $0x58] sm:$0xff] %v1743_v21   ;;  %v1738_v44 = vpack.c.bf16 %v1059_v2, %v1058_v3  ;;  %v872_v8 = vadd.f32 1.0, %v2210_v13  ;;  %2237 = vpow2.f32 %v1522_v55 }
 0x141   :  { %v2214_v48 = vpop.eup %2213  ;;  %1871 = vst [vmem:[%s2870_s3 + $0xd8] sm:$0xff] %v1823_v10   ;;  %v1818_v22 = vpack.c.bf16 %v1091_v14, %v1090_v36  ;;  %v904_v19 = vadd.f32 1.0, %v2212_v7  ;;  %2239 = vpow2.f32 %v1554_v60 }
 0x142   :  { %v2216_v30 = vpop.eup %2215  ;;  %1854 = vst [vmem:[%s2870_s3 + $0x50] sm:$0xff] %v1738_v44   ;;  %2241 = vrcp.f32 %v872_v8  ;;  %v870_v4 = vadd.f32 1.0, %v2214_v48 }
 0x143   :  { %v2218_v11 = vpop.eup %2217  ;;  %1870 = vst [vmem:[%s2870_s3 + $0xd0] sm:$0xff] %v1818_v22   ;;  %2243 = vrcp.f32 %v904_v19  ;;  %v902_v53 = vadd.f32 1.0, %v2216_v30 }
 0x144   :  { %v2220_v12 = vpop.eup %2219  ;;  %2245 = vrcp.f32 %v870_v4  ;;  %v873_v20 = vadd.f32 1.0, %v2218_v11 }
 0x145   :  { %v2222_v42 = vpop.eup %2221  ;;  %2247 = vrcp.f32 %v902_v53  ;;  %v905_v6 = vadd.f32 1.0, %v2220_v12 }
 0x146   :  { %v2224_v47 = vpop.eup %2223  ;;  %2249 = vrcp.f32 %v873_v20  ;;  %v871_v59 = vadd.f32 1.0, %v2222_v42 }
 0x147   :  { %v2226_v1 = vpop.eup %2225  ;;  %2251 = vrcp.f32 %v905_v6  ;;  %v903_v25 = vadd.f32 1.0, %v2224_v47 }
 0x148   :  { %v2228_v9 = vpop.eup %2227  ;;  %2253 = vrcp.f32 %v871_v59  ;;  %v876_v34 = vadd.f32 1.0, %v2226_v1 }
 0x149   :  { %v2230_v24 = vpop.eup %2229  ;;  %2255 = vrcp.f32 %v903_v25  ;;  %v908_v40 = vadd.f32 1.0, %v2228_v9 }
 0x14a   :  { %v2232_v61 = vpop.eup %2231  ;;  %2257 = vrcp.f32 %v876_v34  ;;  %v874_v32 = vadd.f32 1.0, %v2230_v24 }
 0x14b   :  { %v2234_v46 = vpop.eup %2233  ;;  %2259 = vrcp.f32 %v908_v40  ;;  %v906_v5 = vadd.f32 1.0, %v2232_v61 }
 0x14c   :  { %v2236_v57 = vpop.eup %2235  ;;  %2261 = vrcp.f32 %v874_v32  ;;  %v877_v0 = vadd.f32 1.0, %v2234_v46 }
 0x14d   :  { %v2238_v52 = vpop.eup %2237  ;;  %2263 = vrcp.f32 %v906_v5  ;;  %v909_v58 = vadd.f32 1.0, %v2236_v57 }
 0x14e   :  { %v2240_v45 = vpop.eup %2239  ;;  %2265 = vrcp.f32 %v877_v0  ;;  %v875_v29 = vadd.f32 1.0, %v2238_v52 }
 0x14f   :  { %v2242_v28 = vpop.eup %2241  ;;  %2267 = vrcp.f32 %v909_v58  ;;  %v907_v38 = vadd.f32 1.0, %v2240_v45 }
 0x150   :  { %v2244_v50 = vpop.eup %2243  ;;  %2269 = vrcp.f32 %v875_v29  ;;  %v1064_v60 = vmul.f32 %v2242_v28, %v2722_v26 }
 0x151   :  { %v2246_v55 = vpop.eup %2245  ;;  %2271 = vrcp.f32 %v907_v38  ;;  %v1096_v21 = vmul.f32 %v2244_v50, %v2726_v17 }
 0x152   :  { %v2248_v16 = vpop.eup %2247  ;;  %v1062_v36 = vmul.f32 %v2246_v55, %v2731_v54 }
 0x153   :  { %v2250_v51 = vpop.eup %2249  ;;  %v1094_v44 = vmul.f32 %v2248_v16, %v2734_v31 }
 0x154   :  { %v2252_v33 = vpop.eup %2251  ;;  %v1065_v49 = vmul.f32 %v2250_v51, %v2737_v27 }
 0x155   :  { %v2254_v3 = vpop.eup %2253  ;;  %v1097_v2 = vmul.f32 %v2252_v33, %v2740_v35 }
 0x156   :  { %v2256_v13 = vpop.eup %2255  ;;  %v1753_v10 = vpack.c.bf16 %v1065_v49, %v1064_v60  ;;  %v1063_v14 = vmul.f32 %v2254_v3, %v2743_v37 }
 0x157   :  { %v2258_v7 = vpop.eup %2257  ;;  %v1833_v8 = vpack.c.bf16 %v1097_v2, %v1096_v21  ;;  %v1095_v48 = vmul.f32 %v2256_v13, %v2746_v39 }
 0x158   :  { %v2260_v26 = vpop.eup %2259  ;;  %1857 = vst [vmem:[%s2870_s3 + $0x68] sm:$0xff] %v1753_v10   ;;  %v1748_v17 = vpack.c.bf16 %v1063_v14, %v1062_v36  ;;  %v1068_v39 = vmul.f32 %v2258_v7, %v2749_v62 }
 0x159   :  { %v2262_v27 = vpop.eup %2261  ;;  %1873 = vst [vmem:[%s2870_s3 + $0xe8] sm:$0xff] %v1833_v8   ;;  %v1828_v54 = vpack.c.bf16 %v1095_v48, %v1094_v44  ;;  %v1100_v30 = vmul.f32 %v2260_v26, %v2753_v56 }
 0x15a   :  { %v2264_v35 = vpop.eup %2263  ;;  %1856 = vst [vmem:[%s2870_s3 + $0x60] sm:$0xff] %v1748_v17   ;;  %v1066_v53 = vmul.f32 %v2262_v27, %v2764_v15 }
 0x15b   :  { %v2266_v31 = vpop.eup %2265  ;;  %1872 = vst [vmem:[%s2870_s3 + $0xe0] sm:$0xff] %v1828_v54   ;;  %v1098_v42 = vmul.f32 %v2264_v35, %v2767_v18 }
 0x15c   :  { %v2268_v37 = vpop.eup %2267  ;;  %v1069_v22 = vmul.f32 %v2266_v31, %v2772_v41 }
 0x15d   :  { %v2270_v19 = vpop.eup %2269  ;;  %v1101_v4 = vmul.f32 %v2268_v37, %v2777_v23 }
 0x15e   :  { %v2272_v11 = vpop.eup %2271  ;;  %v1763_v12 = vpack.c.bf16 %v1069_v22, %v1068_v39  ;;  %v1067_v20 = vmul.f32 %v2270_v19, %v2788_v63 }
 0x15f   :  { %v1843_v6 = vpack.c.bf16 %v1101_v4, %v1100_v30  ;;  %v1099_v47 = vmul.f32 %v2272_v11, %v2795_v43 }
 0x160   :  { %1859 = vst [vmem:[%s2870_s3 + $0x78] sm:$0xff] %v1763_v12   ;;  %v1758_v62 = vpack.c.bf16 %v1067_v20, %v1066_v53 }
 0x161   :  { %1875 = vst [vmem:[%s2870_s3 + $0xf8] sm:$0xff] %v1843_v6   ;;  %v1838_v56 = vpack.c.bf16 %v1099_v47, %v1098_v42 }
 0x162   :  { %1858 = vst [vmem:[%s2870_s3 + $0x70] sm:$0xff] %v1758_v62  }
 0x163   :  { %1874 = vst [vmem:[%s2870_s3 + $0xf0] sm:$0xff] %v1838_v56  }

// kernel: yolox_forward.27
= control target key start
LH: loop header
LB: loop body
LE: loop exit
PB: predicated region body
PF: predicated region fallthrough
CT: control target
= control target key end

     0   :  { %vm139_vm0 = vcmask 1043456   ;;  %vm114_vm1 = vcmask 588800   ;;  %s839_s1 = inlined_call_operand.vmem [shape: bf16[72,128], index: 1, kind: input, shape index: {}]   ;;  %s840_s0 = inlined_call_operand.vmem [shape: bf16[128,72], index: 0, kind: input, shape index: {}]   ;;  %s841_s2 = inlined_call_operand.vmem [shape: f32[1,128], index: 2, kind: input, shape index: {}]   ;;  %s842_s3 = inlined_call_operand.vmem [shape: bf16[128,128], index: 3, kind: output, shape index: {}]  }
   0x1   :  { %v604_v0 = vld [vmem:[%s839_s1 + $0x20] ss:$0 sps:$4 sm:$0xff]   ;;  %v605_v1 = vld [vmem:[%s839_s1 + $0x18] sm:$0xff]   ;;  %v606_v3 = vld [vmem:[%s839_s1 + $0x10] sm:$0xff]  }
   0x2   :  { %602 = vmatprep.subr.msk.bf16.mxu0 %vm139_vm0, %v604_v0  ;;  %603 = vmatprep.subr.msk.bf16.mxu1 %vm139_vm0, %v604_v0  ;;  %v141_v2 = vsel %vm139_vm0, %v604_v0, 0  ;;  %v609_v4 = vld [vmem:[%s840_s0] sm:$0xff]   ;;  %v607_v6 = vld [vmem:[%s839_s1 + $0x8] sm:$0xff]   ;;  %v613_v10 = vld [vmem:[%s840_s0 + $0x10] sm:$0xff]  }
   0x3   :  { %567 = vmatpush3.bf16.msra.mxu0 %v141_v2  ;;  %597 = vmatpush3.bf16.msra.mxu1 %v141_v2  ;;  %v610_v5 = vld [vmem:[%s840_s0 + $0x20] sm:$0xff]   ;;  %v611_v8 = vld [vmem:[%s840_s0 + $0x8] sm:$0xff]   ;;  %v614_v11 = vld [vmem:[%s840_s0 + $0x30] sm:$0xff]  }
   0x4   :  { %568 = vmatprep.subr.bf16.mxu0 %v605_v1  ;;  %593 = vmatprep.subr.bf16.mxu1 %v605_v1  ;;  %v608_v7 = vld [vmem:[%s839_s1] sm:$0xff]   ;;  %v612_v9 = vld [vmem:[%s840_s0 + $0x28] sm:$0xff]   ;;  %v615_v12 = vld [vmem:[%s840_s0 + $0x18] sm:$0xff]  }
   0x5   :  { %576 = vmatprep.mubr.msk.bf16.mxu0 %vm114_vm1, %v609_v4  ;;  %584 = vmatprep.mubr.msk.bf16.mxu1 %vm114_vm1, %v610_v5  ;;  %v616_v13 = vld [vmem:[%s840_s0 + $0x38] sm:$0xff]   ;;  %v436_v14 = vld [vmem:[%s841_s2] ss:$0 sm:$0xff] }
   0x7   :  { %569 = vmatpush3.bf16.msra.mxu0 %v605_v1  ;;  %598 = vmatpush3.bf16.msra.mxu1 %v605_v1 }
   0x8   :  { %570 = vmatprep.subr.bf16.mxu0 %v606_v3  ;;  %594 = vmatprep.subr.bf16.mxu1 %v606_v3 }
   0xb   :  { %571 = vmatpush3.bf16.msra.mxu0 %v606_v3  ;;  %599 = vmatpush3.bf16.msra.mxu1 %v606_v3 }
   0xc   :  { %572 = vmatprep.subr.bf16.mxu0 %v607_v6  ;;  %595 = vmatprep.subr.bf16.mxu1 %v607_v6 }
   0xf   :  { %573 = vmatpush3.bf16.msra.mxu0 %v607_v6  ;;  %600 = vmatpush3.bf16.msra.mxu1 %v607_v6 }
  0x10   :  { %574 = vmatprep.subr.bf16.mxu0 %v608_v7  ;;  %596 = vmatprep.subr.bf16.mxu1 %v608_v7 }
  0x13   :  { %575 = vmatpush3.bf16.msra.mxu0 %v608_v7  ;;  %601 = vmatpush3.bf16.msra.mxu1 %v608_v7 }
  0x16   :  { %577 = vmatmul.mubr.msk.bf16.vlgmr.msra.gmra.mxu0 %vm114_vm1, %v611_v8  ;;  %585 = vmatmul.mubr.msk.bf16.vlgmr.msra.gmra.mxu1 %vm114_vm1, %v612_v9 }
  0x17   :  { %580 = vmatprep.mubr.msk.bf16.mxu0 %vm114_vm1, %v613_v10  ;;  %588 = vmatprep.mubr.msk.bf16.mxu1 %vm114_vm1, %v614_v11 }
  0x1e   :  { %581 = vmatmul.mubr.msk.bf16.gmra.mxu0 %vm114_vm1, %v615_v12  ;;  %589 = vmatmul.mubr.msk.bf16.gmra.mxu1 %vm114_vm1, %v616_v13 }
  0xd6   :  { %v578_v15 = vpop.f32.mrf.mxu0  ;;  %v586_v16 = vpop.f32.mrf.mxu1 }
  0xd7   :  { %v751_v17 = vadd.f32 %v578_v15, %v436_v14  ;;  %v753_v18 = vadd.f32 %v586_v16, %v436_v14 }
  0xd8   :  { %v177_v19 = vpop.f32.mrf.mxu0  ;;  %v209_v20 = vpop.f32.mrf.mxu1 }
  0xd9   :  { %v460_v21 = vmul.f32 -1.442695, %v751_v17  ;;  %v468_v22 = vmul.f32 -1.442695, %v753_v18  ;;  %v757_v23 = vadd.f32 %v436_v14, %v177_v19  ;;  %v759_v24 = vadd.f32 %v436_v14, %v209_v20 }
  0xda   :  { %v579_v25 = vpop.f32.mrf.mxu0  ;;  %v587_v26 = vpop.f32.mrf.mxu1 }
  0xdb   :  { %617 = vpow2.f32 %v460_v21  ;;  %v458_v27 = vmul.f32 -1.442695, %v757_v23  ;;  %v466_v28 = vmul.f32 -1.442695, %v759_v24  ;;  %v763_v29 = vadd.f32 %v579_v25, %v436_v14 }
  0xdc   :  { %619 = vpow2.f32 %v468_v22  ;;  %v765_v30 = vadd.f32 %v587_v26, %v436_v14  ;;  %v180_v31 = vpop.f32.mrf.mxu0  ;;  %v212_v32 = vpop.f32.mrf.mxu1 }
  0xdd   :  { %621 = vpow2.f32 %v458_v27  ;;  %v461_v33 = vmul.f32 -1.442695, %v763_v29  ;;  %v768_v34 = vadd.f32 %v436_v14, %v180_v31  ;;  %v770_v35 = vadd.f32 %v436_v14, %v212_v32 }
  0xde   :  { %623 = vpow2.f32 %v466_v28  ;;  %v469_v36 = vmul.f32 -1.442695, %v765_v30  ;;  %v582_v37 = vpop.f32.mrf.mxu0  ;;  %v590_v38 = vpop.f32.mrf.mxu1 }
  0xdf   :  { %625 = vpow2.f32 %v461_v33  ;;  %v459_v39 = vmul.f32 -1.442695, %v768_v34  ;;  %v467_v40 = vmul.f32 -1.442695, %v770_v35  ;;  %v775_v41 = vadd.f32 %v582_v37, %v436_v14 }
  0xe0   :  { %627 = vpow2.f32 %v469_v36  ;;  %v777_v42 = vadd.f32 %v590_v38, %v436_v14  ;;  %v193_v43 = vpop.f32.mrf.mxu0  ;;  %v225_v44 = vpop.f32.mrf.mxu1 }
  0xe1   :  { %629 = vpow2.f32 %v459_v39  ;;  %v464_v45 = vmul.f32 -1.442695, %v775_v41  ;;  %v780_v46 = vadd.f32 %v436_v14, %v193_v43  ;;  %v782_v47 = vadd.f32 %v436_v14, %v225_v44 }
  0xe2   :  { %631 = vpow2.f32 %v467_v40  ;;  %v472_v48 = vmul.f32 -1.442695, %v777_v42  ;;  %v583_v49 = vpop.f32.mrf.mxu0  ;;  %v591_v50 = vpop.f32.mrf.mxu1 }
  0xe3   :  { %633 = vpow2.f32 %v464_v45  ;;  %v462_v51 = vmul.f32 -1.442695, %v780_v46  ;;  %v470_v52 = vmul.f32 -1.442695, %v782_v47  ;;  %v787_v53 = vadd.f32 %v583_v49, %v436_v14 }
  0xe4   :  { %635 = vpow2.f32 %v472_v48  ;;  %v789_v54 = vadd.f32 %v591_v50, %v436_v14  ;;  %v196_v55 = vpop.f32.mrf.mxu0  ;;  %v228_v56 = vpop.f32.mrf.mxu1 }
  0xe5   :  { %637 = vpow2.f32 %v462_v51  ;;  %v465_v57 = vmul.f32 -1.442695, %v787_v53  ;;  %v792_v58 = vadd.f32 %v436_v14, %v196_v55  ;;  %v794_v59 = vadd.f32 %v436_v14, %v228_v56 }
  0xe6   :  { %639 = vpow2.f32 %v470_v52  ;;  %v473_v60 = vmul.f32 -1.442695, %v789_v54 }
  0xe7   :  { %641 = vpow2.f32 %v465_v57  ;;  %v463_v61 = vmul.f32 -1.442695, %v792_v58  ;;  %v471_v62 = vmul.f32 -1.442695, %v794_v59 }
  0xe8   :  { %v618_v63 = vpop.eup %617  ;;  %643 = vpow2.f32 %v473_v60 }
  0xe9   :  { %v620_v0 = vpop.eup %619  ;;  %v290_v1 = vadd.f32 1.0, %v618_v63  ;;  %645 = vpow2.f32 %v463_v61 }
  0xea   :  { %v622_v2 = vpop.eup %621  ;;  %v298_v3 = vadd.f32 1.0, %v620_v0  ;;  %647 = vpow2.f32 %v471_v62 }
  0xeb   :  { %v624_v4 = vpop.eup %623  ;;  %649 = vrcp.f32 %v290_v1  ;;  %v288_v5 = vadd.f32 1.0, %v622_v2 }
  0xec   :  { %v626_v6 = vpop.eup %625  ;;  %651 = vrcp.f32 %v298_v3  ;;  %v296_v7 = vadd.f32 1.0, %v624_v4 }
  0xed   :  { %v628_v8 = vpop.eup %627  ;;  %653 = vrcp.f32 %v288_v5  ;;  %v291_v9 = vadd.f32 1.0, %v626_v6 }
  0xee   :  { %v630_v10 = vpop.eup %629  ;;  %655 = vrcp.f32 %v296_v7  ;;  %v299_v11 = vadd.f32 1.0, %v628_v8 }
  0xef   :  { %v632_v12 = vpop.eup %631  ;;  %657 = vrcp.f32 %v291_v9  ;;  %v289_v13 = vadd.f32 1.0, %v630_v10 }
  0xf0   :  { %v634_v14 = vpop.eup %633  ;;  %659 = vrcp.f32 %v299_v11  ;;  %v297_v15 = vadd.f32 1.0, %v632_v12 }
  0xf1   :  { %v636_v16 = vpop.eup %635  ;;  %661 = vrcp.f32 %v289_v13  ;;  %v294_v19 = vadd.f32 1.0, %v634_v14 }
  0xf2   :  { %v638_v20 = vpop.eup %637  ;;  %663 = vrcp.f32 %v297_v15  ;;  %v302_v21 = vadd.f32 1.0, %v636_v16 }
  0xf3   :  { %v640_v22 = vpop.eup %639  ;;  %665 = vrcp.f32 %v294_v19  ;;  %v292_v25 = vadd.f32 1.0, %v638_v20 }
  0xf4   :  { %v642_v26 = vpop.eup %641  ;;  %667 = vrcp.f32 %v302_v21  ;;  %v300_v27 = vadd.f32 1.0, %v640_v22 }
  0xf5   :  { %v644_v28 = vpop.eup %643  ;;  %669 = vrcp.f32 %v292_v25  ;;  %v295_v31 = vadd.f32 1.0, %v642_v26 }
  0xf6   :  { %v646_v32 = vpop.eup %645  ;;  %671 = vrcp.f32 %v300_v27  ;;  %v303_v33 = vadd.f32 1.0, %v644_v28 }
  0xf7   :  { %v648_v36 = vpop.eup %647  ;;  %673 = vrcp.f32 %v295_v31  ;;  %v293_v37 = vadd.f32 1.0, %v646_v32 }
  0xf8   :  { %v650_v38 = vpop.eup %649  ;;  %675 = vrcp.f32 %v303_v33  ;;  %v301_v39 = vadd.f32 1.0, %v648_v36 }
  0xf9   :  { %v652_v40 = vpop.eup %651  ;;  %677 = vrcp.f32 %v293_v37  ;;  %v338_v49 = vmul.f32 %v650_v38, %v751_v17 }
  0xfa   :  { %v654_v43 = vpop.eup %653  ;;  %679 = vrcp.f32 %v301_v39  ;;  %v346_v52 = vmul.f32 %v652_v40, %v753_v18 }
  0xfb   :  { %v656_v44 = vpop.eup %655  ;;  %v336_v57 = vmul.f32 %v654_v43, %v757_v23 }
  0xfc   :  { %v658_v45 = vpop.eup %657  ;;  %v344_v63 = vmul.f32 %v656_v44, %v759_v24 }
  0xfd   :  { %v660_v48 = vpop.eup %659  ;;  %v339_v50 = vmul.f32 %v658_v45, %v763_v29 }
  0xfe   :  { %v662_v51 = vpop.eup %661  ;;  %v347_v55 = vmul.f32 %v660_v48, %v765_v30 }
  0xff   :  { %v664_v56 = vpop.eup %663  ;;  %v514_v60 = vpack.c.bf16 %v339_v50, %v338_v49  ;;  %v337_v61 = vmul.f32 %v662_v51, %v768_v34 }
 0x100   :  { %v666_v62 = vpop.eup %665  ;;  %v534_v0 = vpack.c.bf16 %v347_v55, %v346_v52  ;;  %v345_v1 = vmul.f32 %v664_v56, %v770_v35 }
 0x101   :  { %v668_v17 = vpop.eup %667  ;;  %546 = vst [vmem:[%s842_s3 + $0x8] sm:$0xff] %v514_v60   ;;  %v509_v18 = vpack.c.bf16 %v337_v61, %v336_v57  ;;  %v342_v35 = vmul.f32 %v666_v62, %v775_v41 }
 0x102   :  { %v670_v29 = vpop.eup %669  ;;  %550 = vst [vmem:[%s842_s3 + $0x28] sm:$0xff] %v534_v0   ;;  %v529_v23 = vpack.c.bf16 %v345_v1, %v344_v63  ;;  %v350_v4 = vmul.f32 %v668_v17, %v777_v42 }
 0x103   :  { %v672_v30 = vpop.eup %671  ;;  %510 = vst [vmem:[%s842_s3] sm:$0xff] %v509_v18   ;;  %v340_v7 = vmul.f32 %v670_v29, %v780_v46 }
 0x104   :  { %v674_v24 = vpop.eup %673  ;;  %549 = vst [vmem:[%s842_s3 + $0x20] sm:$0xff] %v529_v23   ;;  %v348_v10 = vmul.f32 %v672_v30, %v782_v47 }
 0x105   :  { %v676_v34 = vpop.eup %675  ;;  %v343_v2 = vmul.f32 %v674_v24, %v787_v53 }
 0x106   :  { %v678_v3 = vpop.eup %677  ;;  %v351_v5 = vmul.f32 %v676_v34, %v789_v54 }
 0x107   :  { %v680_v6 = vpop.eup %679  ;;  %v524_v8 = vpack.c.bf16 %v343_v2, %v342_v35  ;;  %v341_v9 = vmul.f32 %v678_v3, %v792_v58 }
 0x108   :  { %v544_v11 = vpack.c.bf16 %v351_v5, %v350_v4  ;;  %v349_v12 = vmul.f32 %v680_v6, %v794_v59 }
 0x109   :  { %548 = vst [vmem:[%s842_s3 + $0x18] sm:$0xff] %v524_v8   ;;  %v519_v41 = vpack.c.bf16 %v341_v9, %v340_v7 }
 0x10a   :  { %552 = vst [vmem:[%s842_s3 + $0x38] sm:$0xff] %v544_v11   ;;  %v539_v42 = vpack.c.bf16 %v349_v12, %v348_v10 }
 0x10b   :  { %547 = vst [vmem:[%s842_s3 + $0x10] sm:$0xff] %v519_v41  }
 0x10c   :  { %551 = vst [vmem:[%s842_s3 + $0x30] sm:$0xff] %v539_v42  }

// kernel: yolox_forward.28
= control target key start
LH: loop header
LB: loop body
LE: loop exit
PB: predicated region body
PF: predicated region fallthrough
CT: control target
= control target key end

     0   :  { %v313_v0 = vmov 0   ;;  %vm116_vm0 = vcmask 130048   ;;  %s382_s1 = inlined_call_operand.vmem [shape: bf16[144,128], index: 1, kind: input, shape index: {}]   ;;  %s383_s0 = inlined_call_operand.vmem [shape: bf16[32,144], index: 0, kind: input, shape index: {}]   ;;  %s384_s2 = inlined_call_operand.vmem [shape: f32[1,128], index: 2, kind: input, shape index: {}]   ;;  %s385_s3 = inlined_call_operand.vmem [shape: bf16[32,128], index: 3, kind: output, shape index: {}]  }
   0x1   :  { %123 = vmatprep.subr.bf16.mxu0 %v313_v0  ;;  %263 = vmatprep.subr.bf16.mxu1 %v313_v0  ;;  %v282_v1 = vld [vmem:[%s382_s1 + $0x38] sm:$0xff]   ;;  %v283_v2 = vld [vmem:[%s382_s1 + $0x30] sm:$0xff]   ;;  %v284_v3 = vld [vmem:[%s382_s1 + $0x28] sm:$0xff]  }
   0x2   :  { %124 = vmatpush1.bf16.msra.mxu0 %v282_v1  ;;  %272 = vmatpush1.bf16.msra.mxu1 %v282_v1  ;;  %v285_v4 = vld [vmem:[%s382_s1 + $0x20] sm:$0xff]   ;;  %v296_v6 = vld [vmem:[%s383_s0 + $0x14] ss:$8 sps:$4 sm:$0xff]   ;;  %v288_v9 = vld [vmem:[%s382_s1 + $0x8] sm:$0xff]  }
   0x3   :  { %125 = vmatprep.subr.bf16.mxu0 %v313_v0  ;;  %264 = vmatprep.subr.bf16.mxu1 %v313_v0  ;;  %v293_v5 = vld [vmem:[%s383_s0 + $0x4] ss:$8 sps:$4 sm:$0xff]   ;;  %v286_v7 = vld [vmem:[%s382_s1 + $0x18] sm:$0xff]   ;;  %v287_v8 = vld [vmem:[%s382_s1 + $0x10] sm:$0xff]  }
   0x4   :  { %238 = vmatprep.mubr.msk.bf16.mxu0 %vm116_vm0, %v293_v5  ;;  %239 = vmatprep.mubr.msk.bf16.mxu1 %vm116_vm0, %v296_v6  ;;  %v289_v10 = vld [vmem:[%s382_s1] sm:$0xff]   ;;  %v294_v13 = vld [vmem:[%s383_s0 + $0x10] ss:$8 sps:$4 sm:$0xff]  }
   0x5   :  { %v290_v11 = vld [vmem:[%s382_s1 + $0x40] sm:$0xff]  }
   0x6   :  { %126 = vmatpush1.bf16.msra.mxu0 %v283_v2  ;;  %273 = vmatpush1.bf16.msra.mxu1 %v283_v2  ;;  %v291_v12 = vld [vmem:[%s383_s0] ss:$8 sps:$4 sm:$0xff]  }
   0x7   :  { %127 = vmatprep.subr.bf16.mxu0 %v313_v0  ;;  %265 = vmatprep.subr.bf16.mxu1 %v313_v0  ;;  %v224_v14 = vld [vmem:[%s384_s2] ss:$0 sm:$0xff] }
   0xa   :  { %128 = vmatpush1.bf16.msra.mxu0 %v284_v3  ;;  %274 = vmatpush1.bf16.msra.mxu1 %v284_v3 }
   0xb   :  { %129 = vmatprep.subr.bf16.mxu0 %v313_v0  ;;  %266 = vmatprep.subr.bf16.mxu1 %v313_v0 }
   0xe   :  { %130 = vmatpush1.bf16.msra.mxu0 %v285_v4  ;;  %275 = vmatpush1.bf16.msra.mxu1 %v285_v4 }
   0xf   :  { %131 = vmatprep.subr.bf16.mxu0 %v313_v0  ;;  %267 = vmatprep.subr.bf16.mxu1 %v313_v0 }
  0x12   :  { %132 = vmatpush1.bf16.msra.mxu0 %v286_v7  ;;  %276 = vmatpush1.bf16.msra.mxu1 %v286_v7 }
  0x13   :  { %133 = vmatprep.subr.bf16.mxu0 %v313_v0  ;;  %268 = vmatprep.subr.bf16.mxu1 %v313_v0 }
  0x16   :  { %134 = vmatpush1.bf16.msra.mxu0 %v287_v8  ;;  %277 = vmatpush1.bf16.msra.mxu1 %v287_v8 }
  0x17   :  { %135 = vmatprep.subr.bf16.mxu0 %v313_v0  ;;  %269 = vmatprep.subr.bf16.mxu1 %v313_v0 }
  0x1a   :  { %136 = vmatpush1.bf16.msra.mxu0 %v288_v9  ;;  %278 = vmatpush1.bf16.msra.mxu1 %v288_v9 }
  0x1b   :  { %137 = vmatprep.subr.bf16.mxu0 %v313_v0  ;;  %270 = vmatprep.subr.bf16.mxu1 %v313_v0 }
  0x1e   :  { %138 = vmatpush1.bf16.msra.mxu0 %v289_v10  ;;  %279 = vmatpush1.bf16.msra.mxu1 %v289_v10 }
  0x1f   :  { %153 = vmatprep.subr.bf16.mxu0 %v313_v0  ;;  %271 = vmatprep.subr.bf16.mxu1 %v313_v0 }
  0x22   :  { %154 = vmatpush2.bf16.msra.mxu0 %v290_v11  ;;  %280 = vmatpush2.bf16.msra.mxu1 %v290_v11 }
  0x25   :  { %156 = vmatmul.mubr.bf16.vlgmr.msra.gmra.mxu0 %v291_v12  ;;  %164 = vmatmul.mubr.bf16.vlgmr.msra.gmra.mxu1 %v294_v13 }
  0xe5   :  { %v157_v15 = vpop.f32.mrf.mxu0  ;;  %v165_v16 = vpop.f32.mrf.mxu1 }
  0xe6   :  { %v158_v17 = vadd.f32 %v224_v14, %v157_v15  ;;  %v166_v18 = vadd.f32 %v224_v14, %v165_v16 }
  0xe7   :  { %v159_v19 = vpop.f32.mrf.mxu0  ;;  %v167_v20 = vpop.f32.mrf.mxu1 }
  0xe8   :  { %v240_v21 = vmul.f32 -1.442695, %v158_v17  ;;  %v242_v22 = vmul.f32 -1.442695, %v166_v18 }
  0xe9   :  { %v160_v23 = vpop.f32.mrf.mxu0  ;;  %v168_v24 = vpop.f32.mrf.mxu1 }
  0xea   :  { %297 = vpow2.f32 %v240_v21  ;;  %v161_v25 = vadd.f32 %v224_v14, %v160_v23  ;;  %v169_v26 = vadd.f32 %v224_v14, %v168_v24 }
  0xeb   :  { %299 = vpow2.f32 %v242_v22  ;;  %v162_v27 = vpop.f32.mrf.mxu0  ;;  %v170_v28 = vpop.f32.mrf.mxu1 }
  0xec   :  { %v241_v29 = vmul.f32 -1.442695, %v161_v25  ;;  %v243_v30 = vmul.f32 -1.442695, %v169_v26 }
  0xee   :  { %301 = vpow2.f32 %v241_v29 }
  0xef   :  { %303 = vpow2.f32 %v243_v30 }
  0xf7   :  { %v298_v31 = vpop.eup %297 }
  0xf8   :  { %v300_v32 = vpop.eup %299  ;;  %v184_v33 = vadd.f32 1.0, %v298_v31 }
  0xf9   :  { %v186_v34 = vadd.f32 1.0, %v300_v32 }
  0xfa   :  { %305 = vrcp.f32 %v184_v33 }
  0xfb   :  { %v302_v35 = vpop.eup %301  ;;  %307 = vrcp.f32 %v186_v34 }
  0xfc   :  { %v304_v36 = vpop.eup %303  ;;  %v185_v37 = vadd.f32 1.0, %v302_v35 }
  0xfd   :  { %v187_v38 = vadd.f32 1.0, %v304_v36 }
  0xfe   :  { %309 = vrcp.f32 %v185_v37 }
  0xff   :  { %311 = vrcp.f32 %v187_v38 }
 0x107   :  { %v306_v39 = vpop.eup %305 }
 0x108   :  { %v308_v40 = vpop.eup %307  ;;  %v196_v43 = vmul.f32 %v306_v39, %v158_v17 }
 0x109   :  { %v198_v45 = vmul.f32 %v308_v40, %v166_v18 }
 0x10b   :  { %v310_v41 = vpop.eup %309 }
 0x10c   :  { %v312_v42 = vpop.eup %311  ;;  %v197_v44 = vmul.f32 %v310_v41, %v161_v25 }
 0x10d   :  { %v199_v46 = vmul.f32 %v312_v42, %v169_v26 }
 0x10e   :  { %v255_v47 = vpack.c.bf16 %v197_v44, %v196_v43 }
 0x10f   :  { %v260_v48 = vpack.c.bf16 %v199_v46, %v198_v45 }
 0x110   :  { %256 = vst [vmem:[%s385_s3] sm:$0xff] %v255_v47  }
 0x111   :  { %262 = vst [vmem:[%s385_s3 + $0x8] sm:$0xff] %v260_v48  }

// kernel: yolox_forward.29
= control target key start
LH: loop header
LB: loop body
LE: loop exit
PB: predicated region body
PF: predicated region fallthrough
CT: control target
= control target key end

     0   :  { %v223_v0 = vmov 0   ;;  %vm105_vm0 = vcmask 130048   ;;  %s283_s1 = inlined_call_operand.vmem [shape: bf16[144,128], index: 1, kind: input, shape index: {}]   ;;  %s284_s0 = inlined_call_operand.vmem [shape: bf16[16,144], index: 0, kind: input, shape index: {}]   ;;  %s285_s2 = inlined_call_operand.vmem [shape: f32[1,128], index: 2, kind: input, shape index: {}]   ;;  %s286_s3 = inlined_call_operand.vmem [shape: bf16[16,128], index: 3, kind: output, shape index: {}]  }
   0x1   :  { %109 = vmatprep.subr.bf16.mxu0 %v223_v0  ;;  %v203_v1 = vld [vmem:[%s283_s1 + $0x38] sm:$0xff]   ;;  %v204_v2 = vld [vmem:[%s283_s1 + $0x30] sm:$0xff]   ;;  %v205_v3 = vld [vmem:[%s283_s1 + $0x28] sm:$0xff]  }
   0x2   :  { %110 = vmatpush1.bf16.msra.mxu0 %v203_v1  ;;  %v206_v4 = vld [vmem:[%s283_s1 + $0x20] sm:$0xff]   ;;  %v207_v6 = vld [vmem:[%s283_s1 + $0x18] sm:$0xff]   ;;  %v208_v7 = vld [vmem:[%s283_s1 + $0x10] sm:$0xff]  }
   0x3   :  { %111 = vmatprep.subr.bf16.mxu0 %v223_v0  ;;  %v214_v5 = vld [vmem:[%s284_s0 + $0x4] ss:$8 sps:$4 sm:$0xff]   ;;  %v212_v11 = vld [vmem:[%s284_s0] ss:$8 sps:$4 sm:$0xff]  }
   0x4   :  { %190 = vmatprep.mubr.msk.bf16.mxu0 %vm105_vm0, %v214_v5  ;;  %v209_v8 = vld [vmem:[%s283_s1 + $0x8] sm:$0xff]   ;;  %v210_v9 = vld [vmem:[%s283_s1] sm:$0xff]  }
   0x5   :  { %v211_v10 = vld [vmem:[%s283_s1 + $0x40] sm:$0xff]  }
   0x6   :  { %112 = vmatpush1.bf16.msra.mxu0 %v204_v2  ;;  %v178_v12 = vld [vmem:[%s285_s2] ss:$0 sm:$0xff] }
   0x7   :  { %113 = vmatprep.subr.bf16.mxu0 %v223_v0 }
   0xa   :  { %114 = vmatpush1.bf16.msra.mxu0 %v205_v3 }
   0xb   :  { %115 = vmatprep.subr.bf16.mxu0 %v223_v0 }
   0xe   :  { %116 = vmatpush1.bf16.msra.mxu0 %v206_v4 }
   0xf   :  { %117 = vmatprep.subr.bf16.mxu0 %v223_v0 }
  0x12   :  { %118 = vmatpush1.bf16.msra.mxu0 %v207_v6 }
  0x13   :  { %119 = vmatprep.subr.bf16.mxu0 %v223_v0 }
  0x16   :  { %120 = vmatpush1.bf16.msra.mxu0 %v208_v7 }
  0x17   :  { %121 = vmatprep.subr.bf16.mxu0 %v223_v0 }
  0x1a   :  { %122 = vmatpush1.bf16.msra.mxu0 %v209_v8 }
  0x1b   :  { %123 = vmatprep.subr.bf16.mxu0 %v223_v0 }
  0x1e   :  { %124 = vmatpush1.bf16.msra.mxu0 %v210_v9 }
  0x1f   :  { %139 = vmatprep.subr.bf16.mxu0 %v223_v0 }
  0x22   :  { %140 = vmatpush2.bf16.msra.mxu0 %v211_v10 }
  0x25   :  { %142 = vmatmul.mubr.bf16.vlgmr.msra.gmra.mxu0 %v212_v11 }
  0xe5   :  { %v143_v13 = vpop.f32.mrf.mxu0 }
  0xe6   :  { %v144_v14 = vadd.f32 %v178_v12, %v143_v13 }
  0xe7   :  { %v145_v15 = vpop.f32.mrf.mxu0 }
  0xe8   :  { %v191_v16 = vmul.f32 -1.442695, %v144_v14 }
  0xe9   :  { %v146_v17 = vpop.f32.mrf.mxu0 }
  0xea   :  { %215 = vpow2.f32 %v191_v16  ;;  %v147_v18 = vadd.f32 %v178_v12, %v146_v17 }
  0xeb   :  { %v148_v19 = vpop.f32.mrf.mxu0 }
  0xec   :  { %v192_v20 = vmul.f32 -1.442695, %v147_v18 }
  0xee   :  { %217 = vpow2.f32 %v192_v20 }
  0xf7   :  { %v216_v21 = vpop.eup %215 }
  0xf8   :  { %v156_v22 = vadd.f32 1.0, %v216_v21 }
  0xfa   :  { %219 = vrcp.f32 %v156_v22 }
  0xfb   :  { %v218_v23 = vpop.eup %217 }
  0xfc   :  { %v157_v24 = vadd.f32 1.0, %v218_v23 }
  0xfe   :  { %221 = vrcp.f32 %v157_v24 }
 0x107   :  { %v220_v25 = vpop.eup %219 }
 0x108   :  { %v162_v27 = vmul.f32 %v220_v25, %v144_v14 }
 0x10b   :  { %v222_v26 = vpop.eup %221 }
 0x10c   :  { %v163_v28 = vmul.f32 %v222_v26, %v147_v18 }
 0x10e   :  { %v200_v29 = vpack.c.bf16 %v163_v28, %v162_v27 }
 0x110   :  { %201 = vst [vmem:[%s286_s3] sm:$0xff] %v200_v29  }

// kernel: yolox_forward.30
= control target key start
LH: loop header
LB: loop body
LE: loop exit
PB: predicated region body
PF: predicated region fallthrough
CT: control target
= control target key end

     0   :  { %v398_v1 = vmov 0.0   ;;  %vm399_vm0 = vmmov 0   ;;  %vm185_vm1 = vcmask 261120   ;;  %s489_s1 = inlined_call_operand.vmem [shape: bf16[288,128], index: 1, kind: input, shape index: {}]   ;;  %s490_s0 = inlined_call_operand.vmem [shape: bf16[16,288], index: 0, kind: input, shape index: {}]   ;;  %s491_s2 = inlined_call_operand.vmem [shape: f32[1,128], index: 2, kind: input, shape index: {}]   ;;  %s492_s3 = inlined_call_operand.vmem [shape: bf16[16,128], index: 3, kind: output, shape index: {}]  }
   0x1   :  { %v368_v0 = vld [vmem:[%s489_s1 + $0x78] sm:$0xff]   ;;  %358 = vmatprep.subr.bf16.mxu1 %v398_v1  ;;  %362 = vmatprep.mubr.msk.bf16.mxu1 %vm399_vm0, %v398_v1  ;;  %v370_v3 = vld [vmem:[%s489_s1 + $0x70] sm:$0xff]   ;;  %v372_v5 = vld [vmem:[%s489_s1 + $0x68] sm:$0xff]  }
   0x2   :  { %v369_v2 = vld [vmem:[%s489_s1 + $0x38] sm:$0xff]   ;;  %333 = vmatprep.subr.bf16.mxu0 %v368_v0  ;;  %v371_v4 = vld [vmem:[%s489_s1 + $0x30] sm:$0xff]   ;;  %v373_v6 = vld [vmem:[%s489_s1 + $0x28] sm:$0xff]  }
   0x3   :  { %334 = vmatpush3.bf16.msra.mxu0 %v369_v2  ;;  %v374_v7 = vld [vmem:[%s489_s1 + $0x60] sm:$0xff]   ;;  %v376_v9 = vld [vmem:[%s489_s1 + $0x58] sm:$0xff]   ;;  %v382_v10 = vld [vmem:[%s489_s1 + $0x88] sm:$0xff]  }
   0x4   :  { %335 = vmatprep.subr.bf16.mxu0 %v370_v3  ;;  %v375_v8 = vld [vmem:[%s489_s1 + $0x20] sm:$0xff]   ;;  %v377_v11 = vld [vmem:[%s489_s1 + $0x18] sm:$0xff]   ;;  %v378_v12 = vld [vmem:[%s489_s1 + $0x50] sm:$0xff]   ;;  %359 = vmatpush3.bf16.msra.mxu1 %v382_v10 }
   0x5   :  { %360 = vmatprep.subr.bf16.mxu1 %v398_v1  ;;  %v385_v13 = vld [vmem:[%s489_s1 + $0x80] sm:$0xff]   ;;  %v379_v14 = vld [vmem:[%s489_s1 + $0x10] sm:$0xff]   ;;  %v380_v16 = vld [vmem:[%s489_s1 + $0x48] sm:$0xff]  }
   0x6   :  { %v388_v15 = vld [vmem:[%s490_s0 + $0x4] ss:$12 sps:$4 sm:$0xff]   ;;  %v389_v17 = vld [vmem:[%s490_s0 + $0x8] ss:$12 sps:$4 sm:$0xff]   ;;  %v386_v21 = vld [vmem:[%s490_s0] ss:$12 sps:$4 sm:$0xff]  }
   0x7   :  { %336 = vmatpush3.bf16.msra.mxu0 %v371_v4  ;;  %221 = vmatprep.mubr.bf16.mxu0 %v388_v15  ;;  %v381_v18 = vld [vmem:[%s489_s1 + $0x8] sm:$0xff]   ;;  %v383_v19 = vld [vmem:[%s489_s1 + $0x40] sm:$0xff]  }
   0x8   :  { %337 = vmatprep.subr.bf16.mxu0 %v372_v5  ;;  %361 = vmatpush3.bf16.msra.mxu1 %v385_v13  ;;  %v384_v20 = vld [vmem:[%s489_s1] sm:$0xff]  }
   0x9   :  { %v299_v27 = vld [vmem:[%s491_s2] ss:$0 sm:$0xff] }
   0xb   :  { %338 = vmatpush3.bf16.msra.mxu0 %v373_v6  ;;  %363 = vmatmul.mubr.msk.bf16.vlgmr.msra.gmra.mxu1 %vm185_vm1, %v389_v17 }
   0xc   :  { %339 = vmatprep.subr.bf16.mxu0 %v374_v7 }
   0xf   :  { %340 = vmatpush3.bf16.msra.mxu0 %v375_v8 }
  0x10   :  { %341 = vmatprep.subr.bf16.mxu0 %v376_v9 }
  0x13   :  { %342 = vmatpush3.bf16.msra.mxu0 %v377_v11 }
  0x14   :  { %343 = vmatprep.subr.bf16.mxu0 %v378_v12 }
  0x17   :  { %344 = vmatpush3.bf16.msra.mxu0 %v379_v14 }
  0x18   :  { %345 = vmatprep.subr.bf16.mxu0 %v380_v16 }
  0x1b   :  { %346 = vmatpush3.bf16.msra.mxu0 %v381_v18 }
  0x1c   :  { %347 = vmatprep.subr.bf16.mxu0 %v383_v19 }
  0x1f   :  { %348 = vmatpush3.bf16.msra.mxu0 %v384_v20 }
  0x22   :  { %222 = vmatmul.mubr.bf16.vlgmr.msra.gmra.mxu0 %v386_v21 }
  0xcb   :  { %v264_v22 = vpop.f32.mrf.mxu1 }
  0xcd   :  { %v364_v23 = vpop.f32.mrf.mxu1 }
  0xcf   :  { %v267_v24 = vpop.f32.mrf.mxu1 }
  0xd1   :  { %v365_v25 = vpop.f32.mrf.mxu1 }
  0xe2   :  { %v349_v26 = vpop.f32.mrf.mxu0 }
  0xe4   :  { %v350_v28 = vpop.f32.mrf.mxu0 }
  0xe5   :  { %v351_v29 = vadd.f32 %v350_v28, %v349_v26 }
  0xe6   :  { %v352_v30 = vpop.f32.mrf.mxu0 }
  0xe7   :  { %v224_v31 = vadd.f32 %v351_v29, %v299_v27 }
  0xe8   :  { %v353_v32 = vpop.f32.mrf.mxu0 }
  0xe9   :  { %v265_v33 = vadd.f32 %v264_v22, %v224_v31  ;;  %v354_v34 = vadd.f32 %v353_v32, %v352_v30 }
  0xeb   :  { %v322_v35 = vmul.f32 -1.442695, %v265_v33  ;;  %v227_v36 = vadd.f32 %v354_v34, %v299_v27 }
  0xed   :  { %390 = vpow2.f32 %v322_v35  ;;  %v268_v37 = vadd.f32 %v267_v24, %v227_v36 }
  0xef   :  { %v323_v38 = vmul.f32 -1.442695, %v268_v37 }
  0xf1   :  { %392 = vpow2.f32 %v323_v38 }
  0xfa   :  { %v391_v39 = vpop.eup %390 }
  0xfb   :  { %v277_v40 = vadd.f32 1.0, %v391_v39 }
  0xfd   :  { %394 = vrcp.f32 %v277_v40 }
  0xfe   :  { %v393_v41 = vpop.eup %392 }
  0xff   :  { %v278_v42 = vadd.f32 1.0, %v393_v41 }
 0x101   :  { %396 = vrcp.f32 %v278_v42 }
 0x10a   :  { %v395_v43 = vpop.eup %394 }
 0x10b   :  { %v283_v45 = vmul.f32 %v395_v43, %v265_v33 }
 0x10e   :  { %v397_v44 = vpop.eup %396 }
 0x10f   :  { %v284_v46 = vmul.f32 %v397_v44, %v268_v37 }
 0x111   :  { %v331_v47 = vpack.c.bf16 %v284_v46, %v283_v45 }
 0x113   :  { %332 = vst [vmem:[%s492_s3] sm:$0xff] %v331_v47  }

// kernel: yolox_forward.31
= control target key start
LH: loop header
LB: loop body
LE: loop exit
PB: predicated region body
PF: predicated region fallthrough
CT: control target
= control target key end

     0   :  { %v184_v0 = vmov 0.0   ;;  %vm185_vm0 = vmmov 0   ;;  %vm61_vm1 = vcmask 523264   ;;  %s227_s1 = inlined_call_operand.vmem [shape: bf16[64,128], index: 1, kind: input, shape index: {}]   ;;  %s228_s0 = inlined_call_operand.vmem [shape: bf16[16,64], index: 0, kind: input, shape index: {}]   ;;  %s229_s2 = inlined_call_operand.vmem [shape: f32[1,128], index: 2, kind: input, shape index: {}]   ;;  %s230_s3 = inlined_call_operand.vmem [shape: bf16[16,128], index: 3, kind: output, shape index: {}]  }
   0x1   :  { %157 = vmatprep.subr.bf16.mxu0 %v184_v0  ;;  %v171_v1 = vld [vmem:[%s227_s1 + $0x18] sm:$0xff]   ;;  %165 = vmatprep.mubr.msk.bf16.mxu0 %vm185_vm0, %v184_v0  ;;  %v172_v2 = vld [vmem:[%s227_s1 + $0x10] sm:$0xff]   ;;  %v173_v3 = vld [vmem:[%s227_s1 + $0x8] sm:$0xff]  }
   0x2   :  { %158 = vmatpush3.bf16.msra.mxu0 %v171_v1  ;;  %v174_v4 = vld [vmem:[%s227_s1] sm:$0xff]  }
   0x3   :  { %159 = vmatprep.subr.bf16.mxu0 %v184_v0  ;;  %v175_v5 = vld [vmem:[%s228_s0] sm:$0xff]  }
   0x4   :  { %v134_v6 = vld [vmem:[%s229_s2] ss:$0 sm:$0xff] }
   0x6   :  { %160 = vmatpush3.bf16.msra.mxu0 %v172_v2 }
   0x7   :  { %161 = vmatprep.subr.bf16.mxu0 %v184_v0 }
   0xa   :  { %162 = vmatpush3.bf16.msra.mxu0 %v173_v3 }
   0xb   :  { %163 = vmatprep.subr.bf16.mxu0 %v184_v0 }
   0xe   :  { %164 = vmatpush3.bf16.msra.mxu0 %v174_v4 }
  0x11   :  { %166 = vmatmul.mubr.msk.bf16.vlgmr.msra.gmra.mxu0 %vm61_vm1, %v175_v5 }
  0xd1   :  { %v99_v7 = vpop.f32.mrf.mxu0 }
  0xd2   :  { %v100_v8 = vadd.f32 %v134_v6, %v99_v7 }
  0xd3   :  { %v167_v9 = vpop.f32.mrf.mxu0 }
  0xd4   :  { %v141_v10 = vmul.f32 -1.442695, %v100_v8 }
  0xd5   :  { %v102_v11 = vpop.f32.mrf.mxu0 }
  0xd6   :  { %176 = vpow2.f32 %v141_v10  ;;  %v103_v12 = vadd.f32 %v134_v6, %v102_v11 }
  0xd7   :  { %v168_v13 = vpop.f32.mrf.mxu0 }
  0xd8   :  { %v142_v14 = vmul.f32 -1.442695, %v103_v12 }
  0xda   :  { %178 = vpow2.f32 %v142_v14 }
  0xe3   :  { %v177_v15 = vpop.eup %176 }
  0xe4   :  { %v112_v16 = vadd.f32 1.0, %v177_v15 }
  0xe6   :  { %180 = vrcp.f32 %v112_v16 }
  0xe7   :  { %v179_v17 = vpop.eup %178 }
  0xe8   :  { %v113_v18 = vadd.f32 1.0, %v179_v17 }
  0xea   :  { %182 = vrcp.f32 %v113_v18 }
  0xf3   :  { %v181_v19 = vpop.eup %180 }
  0xf4   :  { %v118_v21 = vmul.f32 %v181_v19, %v100_v8 }
  0xf7   :  { %v183_v20 = vpop.eup %182 }
  0xf8   :  { %v119_v22 = vmul.f32 %v183_v20, %v103_v12 }
  0xfa   :  { %v150_v23 = vpack.c.bf16 %v119_v22, %v118_v21 }
  0xfc   :  { %151 = vst [vmem:[%s230_s3] sm:$0xff] %v150_v23  }

// kernel: yolox_forward.33
= control target key start
LH: loop header
LB: loop body
LE: loop exit
PB: predicated region body
PF: predicated region fallthrough
CT: control target
= control target key end

     0   :  { %v158_v0 = vmov 0.0   ;;  %vm159_vm0 = vmmov 0   ;;  %vm45_vm1 = vcmask 261120   ;;  %s195_s1 = inlined_call_operand.vmem [shape: bf16[32,128], index: 1, kind: input, shape index: {}]   ;;  %s196_s0 = inlined_call_operand.vmem [shape: bf16[16,32], index: 0, kind: input, shape index: {}]   ;;  %s197_s2 = inlined_call_operand.vmem [shape: f32[1,128], index: 2, kind: input, shape index: {}]   ;;  %s198_s3 = inlined_call_operand.vmem [shape: bf16[16,128], index: 3, kind: output, shape index: {}]  }
   0x1   :  { %137 = vmatprep.subr.bf16.mxu0 %v158_v0  ;;  %v147_v1 = vld [vmem:[%s195_s1 + $0x8] sm:$0xff]   ;;  %141 = vmatprep.mubr.msk.bf16.mxu0 %vm159_vm0, %v158_v0  ;;  %v148_v2 = vld [vmem:[%s195_s1] sm:$0xff]  }
   0x2   :  { %138 = vmatpush3.bf16.msra.mxu0 %v147_v1  ;;  %v149_v3 = vld [vmem:[%s196_s0] sm:$0xff]  }
   0x3   :  { %139 = vmatprep.subr.bf16.mxu0 %v158_v0  ;;  %v118_v4 = vld [vmem:[%s197_s2] ss:$0 sm:$0xff] }
   0x6   :  { %140 = vmatpush3.bf16.msra.mxu0 %v148_v2 }
   0x9   :  { %142 = vmatmul.mubr.msk.bf16.vlgmr.msra.gmra.mxu0 %vm45_vm1, %v149_v3 }
  0xc9   :  { %v83_v5 = vpop.f32.mrf.mxu0 }
  0xca   :  { %v84_v6 = vadd.f32 %v118_v4, %v83_v5 }
  0xcb   :  { %v143_v7 = vpop.f32.mrf.mxu0 }
  0xcc   :  { %v123_v8 = vmul.f32 -1.442695, %v84_v6 }
  0xcd   :  { %v86_v9 = vpop.f32.mrf.mxu0 }
  0xce   :  { %150 = vpow2.f32 %v123_v8  ;;  %v87_v10 = vadd.f32 %v118_v4, %v86_v9 }
  0xcf   :  { %v144_v11 = vpop.f32.mrf.mxu0 }
  0xd0   :  { %v124_v12 = vmul.f32 -1.442695, %v87_v10 }
  0xd2   :  { %152 = vpow2.f32 %v124_v12 }
  0xdb   :  { %v151_v13 = vpop.eup %150 }
  0xdc   :  { %v96_v14 = vadd.f32 1.0, %v151_v13 }
  0xde   :  { %154 = vrcp.f32 %v96_v14 }
  0xdf   :  { %v153_v15 = vpop.eup %152 }
  0xe0   :  { %v97_v16 = vadd.f32 1.0, %v153_v15 }
  0xe2   :  { %156 = vrcp.f32 %v97_v16 }
  0xeb   :  { %v155_v17 = vpop.eup %154 }
  0xec   :  { %v102_v19 = vmul.f32 %v155_v17, %v84_v6 }
  0xef   :  { %v157_v18 = vpop.eup %156 }
  0xf0   :  { %v103_v20 = vmul.f32 %v157_v18, %v87_v10 }
  0xf2   :  { %v132_v21 = vpack.c.bf16 %v103_v20, %v102_v19 }
  0xf4   :  { %133 = vst [vmem:[%s198_s3] sm:$0xff] %v132_v21  }

// kernel: yolox_forward.32
= control target key start
LH: loop header
LB: loop body
LE: loop exit
PB: predicated region body
PF: predicated region fallthrough
CT: control target
= control target key end

     0   :  { %v664_v33 = vmov 0.0   ;;  %vm665_vm0 = vmmov 0   ;;  %vm341_vm1 = vcmask 523264   ;;  %s815_s1 = inlined_call_operand.vmem [shape: bf16[576,128], index: 1, kind: input, shape index: {}]   ;;  %s816_s0 = inlined_call_operand.vmem [shape: bf16[16,576], index: 0, kind: input, shape index: {}]   ;;  %s817_s2 = inlined_call_operand.vmem [shape: f32[1,128], index: 2, kind: input, shape index: {}]   ;;  %s818_s3 = inlined_call_operand.vmem [shape: bf16[16,128], index: 3, kind: output, shape index: {}]  }
   0x1   :  { %v613_v0 = vld [vmem:[%s815_s1 + $0x78] sm:$0xff]   ;;  %v617_v4 = vld [vmem:[%s815_s1 + $0x70] sm:$0xff]   ;;  %v621_v8 = vld [vmem:[%s815_s1 + $0x68] sm:$0xff]  }
   0x2   :  { %v614_v1 = vld [vmem:[%s815_s1 + $0x38] sm:$0xff]   ;;  %550 = vmatprep.subr.bf16.mxu0 %v613_v0  ;;  %v618_v5 = vld [vmem:[%s815_s1 + $0x30] sm:$0xff]   ;;  %v622_v9 = vld [vmem:[%s815_s1 + $0x28] sm:$0xff]  }
   0x3   :  { %v615_v2 = vld [vmem:[%s815_s1 + $0xf8] sm:$0xff]   ;;  %551 = vmatpush3.bf16.msra.mxu0 %v614_v1  ;;  %v619_v6 = vld [vmem:[%s815_s1 + $0xf0] sm:$0xff]   ;;  %v623_v10 = vld [vmem:[%s815_s1 + $0xe8] sm:$0xff]  }
   0x4   :  { %v616_v3 = vld [vmem:[%s815_s1 + $0xb8] sm:$0xff]   ;;  %572 = vmatprep.subr.bf16.mxu1 %v615_v2  ;;  %552 = vmatprep.subr.bf16.mxu0 %v617_v4  ;;  %v620_v7 = vld [vmem:[%s815_s1 + $0xb0] sm:$0xff]   ;;  %v624_v11 = vld [vmem:[%s815_s1 + $0xa8] sm:$0xff]  }
   0x5   :  { %573 = vmatpush3.bf16.msra.mxu1 %v616_v3  ;;  %v625_v12 = vld [vmem:[%s815_s1 + $0x60] sm:$0xff]   ;;  %v629_v16 = vld [vmem:[%s815_s1 + $0x58] sm:$0xff]   ;;  %v633_v20 = vld [vmem:[%s815_s1 + $0x50] sm:$0xff]  }
   0x6   :  { %574 = vmatprep.subr.bf16.mxu1 %v619_v6  ;;  %v626_v13 = vld [vmem:[%s815_s1 + $0x20] sm:$0xff]   ;;  %v630_v17 = vld [vmem:[%s815_s1 + $0x18] sm:$0xff]   ;;  %v634_v21 = vld [vmem:[%s815_s1 + $0x10] sm:$0xff]  }
   0x7   :  { %553 = vmatpush3.bf16.msra.mxu0 %v618_v5  ;;  %v627_v14 = vld [vmem:[%s815_s1 + $0xe0] sm:$0xff]   ;;  %v631_v18 = vld [vmem:[%s815_s1 + $0xd8] sm:$0xff]   ;;  %v635_v22 = vld [vmem:[%s815_s1 + $0xd0] sm:$0xff]  }
   0x8   :  { %554 = vmatprep.subr.bf16.mxu0 %v621_v8  ;;  %v628_v15 = vld [vmem:[%s815_s1 + $0xa0] sm:$0xff]   ;;  %v632_v19 = vld [vmem:[%s815_s1 + $0x98] sm:$0xff]   ;;  %v636_v23 = vld [vmem:[%s815_s1 + $0x90] sm:$0xff]  }
   0x9   :  { %575 = vmatpush3.bf16.msra.mxu1 %v620_v7  ;;  %v637_v24 = vld [vmem:[%s815_s1 + $0x48] sm:$0xff]   ;;  %v641_v28 = vld [vmem:[%s815_s1 + $0x40] sm:$0xff]   ;;  %v651_v37 = vld [vmem:[%s815_s1 + $0x118] sm:$0xff]  }
   0xa   :  { %576 = vmatprep.subr.bf16.mxu1 %v623_v10  ;;  %v638_v25 = vld [vmem:[%s815_s1 + $0x8] sm:$0xff]   ;;  %v642_v29 = vld [vmem:[%s815_s1] sm:$0xff]   ;;  %v652_v38 = vld [vmem:[%s815_s1 + $0x110] sm:$0xff]  }
   0xb   :  { %555 = vmatpush3.bf16.msra.mxu0 %v622_v9  ;;  %v639_v26 = vld [vmem:[%s815_s1 + $0xc8] sm:$0xff]   ;;  %v643_v30 = vld [vmem:[%s815_s1 + $0xc0] sm:$0xff]  }
   0xc   :  { %556 = vmatprep.subr.bf16.mxu0 %v625_v12  ;;  %v640_v27 = vld [vmem:[%s815_s1 + $0x88] sm:$0xff]   ;;  %v644_v31 = vld [vmem:[%s816_s0] ss:$20 sps:$4 sm:$0xff]   ;;  %v646_v32 = vld [vmem:[%s816_s0 + $0x4] ss:$20 sps:$4 sm:$0xff]  }
   0xd   :  { %577 = vmatpush3.bf16.msra.mxu1 %v624_v11  ;;  %v647_v34 = vld [vmem:[%s815_s1 + $0x80] sm:$0xff]   ;;  %377 = vmatprep.mubr.bf16.mxu0 %v646_v32  ;;  %v648_v35 = vld [vmem:[%s816_s0 + $0x8] ss:$20 sps:$4 sm:$0xff]  }
   0xe   :  { %578 = vmatprep.subr.bf16.mxu1 %v627_v14  ;;  %v650_v36 = vld [vmem:[%s816_s0 + $0xc] ss:$20 sps:$4 sm:$0xff]   ;;  %v655_v41 = vld [vmem:[%s816_s0 + $0x10] ss:$20 sps:$4 sm:$0xff]  }
   0xf   :  { %557 = vmatpush3.bf16.msra.mxu0 %v626_v13  ;;  %418 = vmatprep.mubr.bf16.mxu1 %v650_v36  ;;  %v653_v39 = vld [vmem:[%s815_s1 + $0x108] sm:$0xff]   ;;  %v654_v40 = vld [vmem:[%s815_s1 + $0x100] sm:$0xff]  }
  0x10   :  { %558 = vmatprep.subr.bf16.mxu0 %v629_v16  ;;  %v496_v48 = vld [vmem:[%s817_s2] ss:$0 sm:$0xff] }
  0x11   :  { %579 = vmatpush3.bf16.msra.mxu1 %v628_v15 }
  0x12   :  { %580 = vmatprep.subr.bf16.mxu1 %v631_v18 }
  0x13   :  { %559 = vmatpush3.bf16.msra.mxu0 %v630_v17 }
  0x14   :  { %560 = vmatprep.subr.bf16.mxu0 %v633_v20 }
  0x15   :  { %581 = vmatpush3.bf16.msra.mxu1 %v632_v19 }
  0x16   :  { %582 = vmatprep.subr.bf16.mxu1 %v635_v22 }
  0x17   :  { %561 = vmatpush3.bf16.msra.mxu0 %v634_v21 }
  0x18   :  { %562 = vmatprep.subr.bf16.mxu0 %v637_v24 }
  0x19   :  { %583 = vmatpush3.bf16.msra.mxu1 %v636_v23 }
  0x1a   :  { %584 = vmatprep.subr.bf16.mxu1 %v639_v26 }
  0x1b   :  { %563 = vmatpush3.bf16.msra.mxu0 %v638_v25 }
  0x1c   :  { %564 = vmatprep.subr.bf16.mxu0 %v641_v28 }
  0x1d   :  { %585 = vmatpush3.bf16.msra.mxu1 %v640_v27 }
  0x1e   :  { %586 = vmatprep.subr.bf16.mxu1 %v643_v30 }
  0x1f   :  { %565 = vmatpush3.bf16.msra.mxu0 %v642_v29 }
  0x20   :  { %599 = vmatprep.subr.bf16.mxu0 %v664_v33 }
  0x21   :  { %587 = vmatpush3.bf16.msra.mxu1 %v647_v34 }
  0x22   :  { %378 = vmatmul.mubr.bf16.vlgmr.msra.gmra.mxu0 %v644_v31 }
  0x23   :  { %607 = vmatprep.mubr.msk.bf16.mxu0 %vm665_vm0, %v664_v33  ;;  %600 = vmatpush3.bf16.msra.mxu0 %v651_v37 }
  0x24   :  { %419 = vmatmul.mubr.bf16.vlgmr.msra.gmra.mxu1 %v648_v35  ;;  %601 = vmatprep.subr.bf16.mxu0 %v664_v33 }
  0x27   :  { %602 = vmatpush3.bf16.msra.mxu0 %v652_v38 }
  0x28   :  { %603 = vmatprep.subr.bf16.mxu0 %v664_v33 }
  0x2b   :  { %604 = vmatpush3.bf16.msra.mxu0 %v653_v39 }
  0x2c   :  { %605 = vmatprep.subr.bf16.mxu0 %v664_v33 }
  0x2f   :  { %606 = vmatpush3.bf16.msra.mxu0 %v654_v40 }
  0x32   :  { %608 = vmatmul.mubr.msk.bf16.vlgmr.msra.gmra.mxu0 %vm341_vm1, %v655_v41 }
  0xe2   :  { %v566_v42 = vpop.f32.mrf.mxu0 }
  0xe4   :  { %v567_v43 = vpop.f32.mrf.mxu0  ;;  %v588_v44 = vpop.f32.mrf.mxu1 }
  0xe5   :  { %v568_v47 = vadd.f32 %v567_v43, %v566_v42 }
  0xe6   :  { %v569_v45 = vpop.f32.mrf.mxu0  ;;  %v589_v46 = vpop.f32.mrf.mxu1 }
  0xe7   :  { %v380_v51 = vadd.f32 %v568_v47, %v496_v48  ;;  %v590_v52 = vadd.f32 %v589_v46, %v588_v44 }
  0xe8   :  { %v570_v49 = vpop.f32.mrf.mxu0  ;;  %v591_v50 = vpop.f32.mrf.mxu1 }
  0xe9   :  { %v571_v53 = vadd.f32 %v570_v49, %v569_v45  ;;  %v421_v57 = vadd.f32 %v590_v52, %v380_v51 }
  0xea   :  { %v592_v54 = vpop.f32.mrf.mxu1 }
  0xeb   :  { %v383_v55 = vadd.f32 %v571_v53, %v496_v48  ;;  %v593_v56 = vadd.f32 %v592_v54, %v591_v50 }
  0xed   :  { %v424_v62 = vadd.f32 %v593_v56, %v383_v55 }
  0xf2   :  { %v461_v58 = vpop.f32.mrf.mxu0 }
  0xf3   :  { %v462_v59 = vadd.f32 %v461_v58, %v421_v57 }
  0xf4   :  { %v609_v60 = vpop.f32.mrf.mxu0 }
  0xf5   :  { %v539_v61 = vmul.f32 -1.442695, %v462_v59 }
  0xf6   :  { %v464_v63 = vpop.f32.mrf.mxu0 }
  0xf7   :  { %656 = vpow2.f32 %v539_v61  ;;  %v465_v0 = vadd.f32 %v464_v63, %v424_v62 }
  0xf8   :  { %v610_v1 = vpop.f32.mrf.mxu0 }
  0xf9   :  { %v540_v2 = vmul.f32 -1.442695, %v465_v0 }
  0xfb   :  { %658 = vpow2.f32 %v540_v2 }
 0x104   :  { %v657_v3 = vpop.eup %656 }
 0x105   :  { %v474_v4 = vadd.f32 1.0, %v657_v3 }
 0x107   :  { %660 = vrcp.f32 %v474_v4 }
 0x108   :  { %v659_v5 = vpop.eup %658 }
 0x109   :  { %v475_v6 = vadd.f32 1.0, %v659_v5 }
 0x10b   :  { %662 = vrcp.f32 %v475_v6 }
 0x114   :  { %v661_v7 = vpop.eup %660 }
 0x115   :  { %v480_v9 = vmul.f32 %v661_v7, %v462_v59 }
 0x118   :  { %v663_v8 = vpop.eup %662 }
 0x119   :  { %v481_v10 = vmul.f32 %v663_v8, %v465_v0 }
 0x11b   :  { %v548_v11 = vpack.c.bf16 %v481_v10, %v480_v9 }
 0x11d   :  { %549 = vst [vmem:[%s818_s3] sm:$0xff] %v548_v11  }

// kernel: yolox_forward.34
= control target key start
LH: loop header
LB: loop body
LE: loop exit
PB: predicated region body
PF: predicated region fallthrough
CT: control target
= control target key end

     0   :  { %vm204_vm0 = vcmask 261120   ;;  %s594_s1 = inlined_call_operand.vmem [shape: bf16[288,128], index: 1, kind: input, shape index: {}]   ;;  %s595_s0 = inlined_call_operand.vmem [shape: bf16[32,288], index: 0, kind: input, shape index: {}]   ;;  %s596_s2 = inlined_call_operand.vmem [shape: f32[1,128], index: 2, kind: input, shape index: {}]   ;;  %s597_s3 = inlined_call_operand.vmem [shape: bf16[32,128], index: 3, kind: output, shape index: {}]  }
   0x1   :  { %v451_v0 = vld [vmem:[%s594_s1 + $0x78] sm:$0xff]   ;;  %v453_v2 = vld [vmem:[%s594_s1 + $0x70] sm:$0xff]   ;;  %v455_v4 = vld [vmem:[%s594_s1 + $0x68] sm:$0xff]  }
   0x2   :  { %v452_v1 = vld [vmem:[%s594_s1 + $0x38] sm:$0xff]   ;;  %411 = vmatprep.subr.bf16.mxu0 %v451_v0  ;;  %v454_v3 = vld [vmem:[%s594_s1 + $0x30] sm:$0xff]   ;;  %v456_v5 = vld [vmem:[%s594_s1 + $0x28] sm:$0xff]  }
   0x3   :  { %412 = vmatpush3.bf16.msra.mxu0 %v452_v1  ;;  %v457_v6 = vld [vmem:[%s594_s1 + $0x60] sm:$0xff]   ;;  %v459_v8 = vld [vmem:[%s594_s1 + $0x58] sm:$0xff]   ;;  %v466_v10 = vld [vmem:[%s594_s1 + $0x88] sm:$0xff]  }
   0x4   :  { %413 = vmatprep.subr.bf16.mxu0 %v453_v2  ;;  %v458_v7 = vld [vmem:[%s594_s1 + $0x20] sm:$0xff]   ;;  %v460_v9 = vld [vmem:[%s594_s1 + $0x18] sm:$0xff]   ;;  %v461_v11 = vld [vmem:[%s594_s1 + $0x50] sm:$0xff]   ;;  %443 = vmatprep.subr.bf16.mxu1 %v466_v10 }
   0x5   :  { %v462_v12 = vld [vmem:[%s594_s1 + $0x10] sm:$0xff]   ;;  %v463_v13 = vld [vmem:[%s594_s1 + $0x48] sm:$0xff]   ;;  %444 = vmatpush3.bf16.msra.mxu1 %v466_v10  ;;  %v471_v15 = vld [vmem:[%s594_s1 + $0x80] sm:$0xff]  }
   0x6   :  { %v470_v14 = vld [vmem:[%s595_s0 + $0x4] ss:$12 sps:$4 sm:$0xff]   ;;  %v472_v16 = vld [vmem:[%s595_s0 + $0x8] ss:$12 sps:$4 sm:$0xff]   ;;  %445 = vmatprep.subr.bf16.mxu1 %v471_v15  ;;  %v473_v17 = vld [vmem:[%s595_s0 + $0x20] ss:$12 sps:$4 sm:$0xff]  }
   0x7   :  { %414 = vmatpush3.bf16.msra.mxu0 %v454_v3  ;;  %243 = vmatprep.mubr.bf16.mxu0 %v470_v14  ;;  %v464_v18 = vld [vmem:[%s594_s1 + $0x8] sm:$0xff]   ;;  %v465_v19 = vld [vmem:[%s594_s1 + $0x40] sm:$0xff]  }
   0x8   :  { %415 = vmatprep.subr.bf16.mxu0 %v455_v4  ;;  %447 = vmatprep.mubr.msk.bf16.mxu1 %vm204_vm0, %v472_v16  ;;  %v467_v20 = vld [vmem:[%s594_s1] sm:$0xff]   ;;  %v474_v22 = vld [vmem:[%s595_s0 + $0x1c] ss:$12 sps:$4 sm:$0xff]  }
   0x9   :  { %446 = vmatpush3.bf16.msra.mxu1 %v471_v15  ;;  %v468_v21 = vld [vmem:[%s595_s0] ss:$12 sps:$4 sm:$0xff]   ;;  %v476_v23 = vld [vmem:[%s595_s0 + $0x18] ss:$12 sps:$4 sm:$0xff]  }
   0xa   :  { %v361_v28 = vld [vmem:[%s596_s2] ss:$0 sm:$0xff] }
   0xb   :  { %416 = vmatpush3.bf16.msra.mxu0 %v456_v5 }
   0xc   :  { %417 = vmatprep.subr.bf16.mxu0 %v457_v6  ;;  %448 = vmatmul.mubr.msk.bf16.vlgmr.msra.gmra.mxu1 %vm204_vm0, %v473_v17 }
   0xf   :  { %418 = vmatpush3.bf16.msra.mxu0 %v458_v7 }
  0x10   :  { %419 = vmatprep.subr.bf16.mxu0 %v459_v8 }
  0x13   :  { %420 = vmatpush3.bf16.msra.mxu0 %v460_v9 }
  0x14   :  { %421 = vmatprep.subr.bf16.mxu0 %v461_v11 }
  0x17   :  { %422 = vmatpush3.bf16.msra.mxu0 %v462_v12 }
  0x18   :  { %423 = vmatprep.subr.bf16.mxu0 %v463_v13 }
  0x1b   :  { %424 = vmatpush3.bf16.msra.mxu0 %v464_v18 }
  0x1c   :  { %425 = vmatprep.subr.bf16.mxu0 %v465_v19 }
  0x1f   :  { %426 = vmatpush3.bf16.msra.mxu0 %v467_v20 }
  0x22   :  { %244 = vmatmul.mubr.bf16.vlgmr.msra.gmra.mxu0 %v468_v21 }
  0x23   :  { %251 = vmatprep.mubr.bf16.mxu0 %v474_v22 }
  0x2a   :  { %252 = vmatmul.mubr.bf16.gmra.mxu0 %v476_v23 }
  0xcc   :  { %v449_v24 = vpop.f32.mrf.mxu1 }
  0xce   :  { %v294_v26 = vpop.f32.mrf.mxu1 }
  0xd0   :  { %v450_v31 = vpop.f32.mrf.mxu1 }
  0xd2   :  { %v297_v37 = vpop.f32.mrf.mxu1 }
  0xe2   :  { %v427_v25 = vpop.f32.mrf.mxu0 }
  0xe4   :  { %v428_v27 = vpop.f32.mrf.mxu0 }
  0xe5   :  { %v429_v29 = vadd.f32 %v428_v27, %v427_v25 }
  0xe6   :  { %v430_v30 = vpop.f32.mrf.mxu0 }
  0xe7   :  { %v246_v32 = vadd.f32 %v429_v29, %v361_v28 }
  0xe8   :  { %v431_v33 = vpop.f32.mrf.mxu0 }
  0xe9   :  { %v432_v34 = vadd.f32 %v431_v33, %v430_v30  ;;  %v295_v35 = vadd.f32 %v294_v26, %v246_v32 }
  0xea   :  { %v433_v36 = vpop.f32.mrf.mxu0 }
  0xeb   :  { %v388_v38 = vmul.f32 -1.442695, %v295_v35  ;;  %v249_v39 = vadd.f32 %v432_v34, %v361_v28 }
  0xec   :  { %v434_v40 = vpop.f32.mrf.mxu0 }
  0xed   :  { %477 = vpow2.f32 %v388_v38  ;;  %v435_v41 = vadd.f32 %v434_v40, %v433_v36  ;;  %v298_v42 = vadd.f32 %v297_v37, %v249_v39 }
  0xee   :  { %v436_v43 = vpop.f32.mrf.mxu0 }
  0xef   :  { %v254_v44 = vadd.f32 %v435_v41, %v361_v28  ;;  %v389_v45 = vmul.f32 -1.442695, %v298_v42 }
  0xf0   :  { %v437_v46 = vpop.f32.mrf.mxu0 }
  0xf1   :  { %v303_v47 = vadd.f32 %v449_v24, %v254_v44  ;;  %479 = vpow2.f32 %v389_v45  ;;  %v438_v48 = vadd.f32 %v437_v46, %v436_v43 }
  0xf3   :  { %v390_v49 = vmul.f32 -1.442695, %v303_v47  ;;  %v257_v50 = vadd.f32 %v438_v48, %v361_v28 }
  0xf5   :  { %481 = vpow2.f32 %v390_v49  ;;  %v306_v51 = vadd.f32 %v450_v31, %v257_v50 }
  0xf7   :  { %v391_v52 = vmul.f32 -1.442695, %v306_v51 }
  0xf9   :  { %483 = vpow2.f32 %v391_v52 }
  0xfa   :  { %v478_v53 = vpop.eup %477 }
  0xfb   :  { %v321_v54 = vadd.f32 1.0, %v478_v53 }
  0xfd   :  { %485 = vrcp.f32 %v321_v54 }
  0xfe   :  { %v480_v55 = vpop.eup %479 }
  0xff   :  { %v322_v56 = vadd.f32 1.0, %v480_v55 }
 0x101   :  { %487 = vrcp.f32 %v322_v56 }
 0x102   :  { %v482_v57 = vpop.eup %481 }
 0x103   :  { %v323_v58 = vadd.f32 1.0, %v482_v57 }
 0x105   :  { %489 = vrcp.f32 %v323_v58 }
 0x106   :  { %v484_v59 = vpop.eup %483 }
 0x107   :  { %v324_v60 = vadd.f32 1.0, %v484_v59 }
 0x109   :  { %491 = vrcp.f32 %v324_v60 }
 0x10a   :  { %v486_v61 = vpop.eup %485 }
 0x10b   :  { %v333_v63 = vmul.f32 %v486_v61, %v295_v35 }
 0x10e   :  { %v488_v62 = vpop.eup %487 }
 0x10f   :  { %v334_v0 = vmul.f32 %v488_v62, %v298_v42 }
 0x111   :  { %v403_v1 = vpack.c.bf16 %v334_v0, %v333_v63 }
 0x112   :  { %v490_v2 = vpop.eup %489 }
 0x113   :  { %404 = vst [vmem:[%s597_s3] sm:$0xff] %v403_v1   ;;  %v335_v4 = vmul.f32 %v490_v2, %v303_v47 }
 0x116   :  { %v492_v3 = vpop.eup %491 }
 0x117   :  { %v336_v5 = vmul.f32 %v492_v3, %v306_v51 }
 0x119   :  { %v408_v6 = vpack.c.bf16 %v336_v5, %v335_v4 }
 0x11b   :  { %410 = vst [vmem:[%s597_s3 + $0x8] sm:$0xff] %v408_v6  }

// kernel: yolox_forward.39
= control target key start
LH: loop header
LB: loop body
LE: loop exit
PB: predicated region body
PF: predicated region fallthrough
CT: control target
= control target key end

     0   :  { %vm44_vm0 = vcmask 130048   ;;  %s247_s1 = inlined_call_operand.vmem [shape: bf16[16,128], index: 1, kind: input, shape index: {}]   ;;  %s248_s0 = inlined_call_operand.vmem [shape: bf16[32,16], index: 0, kind: input, shape index: {}]   ;;  %s249_s2 = inlined_call_operand.vmem [shape: f32[1,128], index: 2, kind: input, shape index: {}]   ;;  %s250_s3 = inlined_call_operand.vmem [shape: bf16[32,128], index: 3, kind: output, shape index: {}]  }
   0x1   :  { %v190_v0 = vld [vmem:[%s247_s1] sm:$0xff]   ;;  %v192_v2 = vld [vmem:[%s248_s0 + $0x8] sm:$0xff]  }
   0x2   :  { %v191_v1 = vld [vmem:[%s248_s0] sm:$0xff]   ;;  %184 = vmatprep.subr.bf16.mxu0 %v190_v0 }
   0x3   :  { %185 = vmatpush3.bf16.msra.mxu0 %v190_v0  ;;  %186 = vmatprep.mubr.msk.bf16.mxu0 %vm44_vm0, %v191_v1  ;;  %v152_v3 = vld [vmem:[%s249_s2] ss:$0 sm:$0xff] }
   0x6   :  { %187 = vmatmul.mubr.msk.bf16.vlgmr.msra.gmra.mxu0 %vm44_vm0, %v192_v2 }
  0xc6   :  { %v188_v4 = vpop.f32.mrf.mxu0 }
  0xc7   :  { %v94_v5 = vadd.f32 %v188_v4, %v152_v3 }
  0xc8   :  { %v85_v6 = vpop.f32.mrf.mxu0 }
  0xc9   :  { %v160_v7 = vmul.f32 -1.442695, %v94_v5  ;;  %v86_v8 = vadd.f32 %v152_v3, %v85_v6 }
  0xca   :  { %v189_v9 = vpop.f32.mrf.mxu0 }
  0xcb   :  { %193 = vpow2.f32 %v160_v7  ;;  %v158_v10 = vmul.f32 -1.442695, %v86_v8  ;;  %v97_v11 = vadd.f32 %v189_v9, %v152_v3 }
  0xcc   :  { %v88_v12 = vpop.f32.mrf.mxu0 }
  0xcd   :  { %195 = vpow2.f32 %v158_v10  ;;  %v161_v13 = vmul.f32 -1.442695, %v97_v11  ;;  %v89_v14 = vadd.f32 %v152_v3, %v88_v12 }
  0xcf   :  { %197 = vpow2.f32 %v161_v13  ;;  %v159_v15 = vmul.f32 -1.442695, %v89_v14 }
  0xd1   :  { %199 = vpow2.f32 %v159_v15 }
  0xd8   :  { %v194_v16 = vpop.eup %193 }
  0xd9   :  { %v114_v17 = vadd.f32 1.0, %v194_v16 }
  0xda   :  { %v196_v18 = vpop.eup %195 }
  0xdb   :  { %v112_v19 = vadd.f32 1.0, %v196_v18  ;;  %201 = vrcp.f32 %v114_v17 }
  0xdc   :  { %v198_v20 = vpop.eup %197 }
  0xdd   :  { %v115_v21 = vadd.f32 1.0, %v198_v20  ;;  %203 = vrcp.f32 %v112_v19 }
  0xde   :  { %v200_v22 = vpop.eup %199 }
  0xdf   :  { %205 = vrcp.f32 %v115_v21  ;;  %v113_v23 = vadd.f32 1.0, %v200_v22 }
  0xe1   :  { %207 = vrcp.f32 %v113_v23 }
  0xe8   :  { %v202_v24 = vpop.eup %201 }
  0xe9   :  { %v126_v27 = vmul.f32 %v202_v24, %v94_v5 }
  0xea   :  { %v204_v25 = vpop.eup %203 }
  0xeb   :  { %v124_v30 = vmul.f32 %v204_v25, %v86_v8 }
  0xec   :  { %v206_v26 = vpop.eup %205 }
  0xed   :  { %v127_v28 = vmul.f32 %v206_v26, %v97_v11 }
  0xee   :  { %v208_v29 = vpop.eup %207 }
  0xef   :  { %v178_v31 = vpack.c.bf16 %v127_v28, %v126_v27  ;;  %v125_v32 = vmul.f32 %v208_v29, %v89_v14 }
  0xf1   :  { %180 = vst [vmem:[%s250_s3 + $0x8] sm:$0xff] %v178_v31   ;;  %v173_v33 = vpack.c.bf16 %v125_v32, %v124_v30 }
  0xf3   :  { %174 = vst [vmem:[%s250_s3] sm:$0xff] %v173_v33  }

// kernel: yolox_forward.42
= control target key start
LH: loop header
LB: loop body
LE: loop exit
PB: predicated region body
PF: predicated region fallthrough
CT: control target
= control target key end

     0   :  { %vm52_vm0 = vcmask 261120   ;;  %s186_s1 = inlined_call_operand.vmem [shape: bf16[32,128], index: 1, kind: input, shape index: {}]   ;;  %s187_s0 = inlined_call_operand.vmem [shape: bf16[32,32], index: 0, kind: input, shape index: {}]   ;;  %s188_s2 = inlined_call_operand.vmem [shape: f32[1,128], index: 2, kind: input, shape index: {}]   ;;  %s189_s3 = inlined_call_operand.vmem [shape: f32[32,128], index: 3, kind: output, shape index: {}]  }
   0x1   :  { %v135_v0 = vld [vmem:[%s186_s1 + $0x8] sm:$0xff]   ;;  %v136_v1 = vld [vmem:[%s186_s1] sm:$0xff]  }
   0x2   :  { %127 = vmatprep.subr.bf16.mxu0 %v135_v0  ;;  %v137_v2 = vld [vmem:[%s187_s0] sm:$0xff]   ;;  %v138_v3 = vld [vmem:[%s187_s0 + $0x8] sm:$0xff]  }
   0x3   :  { %128 = vmatpush3.bf16.msra.mxu0 %v135_v0  ;;  %131 = vmatprep.mubr.msk.bf16.mxu0 %vm52_vm0, %v137_v2  ;;  %v116_v4 = vld [vmem:[%s188_s2] ss:$0 sm:$0xff] }
   0x4   :  { %129 = vmatprep.subr.bf16.mxu0 %v136_v1 }
   0x7   :  { %130 = vmatpush3.bf16.msra.mxu0 %v136_v1 }
   0xa   :  { %132 = vmatmul.mubr.msk.bf16.vlgmr.msra.gmra.mxu0 %vm52_vm0, %v138_v3 }
  0xca   :  { %v133_v5 = vpop.f32.mrf.mxu0 }
  0xcb   :  { %v102_v6 = vadd.f32 %v133_v5, %v116_v4 }
  0xcc   :  { %v93_v7 = vpop.f32.mrf.mxu0 }
  0xcd   :  { %110 = vst [vmem:[%s189_s3 + $0x10] sm:$0xff] %v102_v6  ;;  %v94_v8 = vadd.f32 %v116_v4, %v93_v7 }
  0xce   :  { %v134_v9 = vpop.f32.mrf.mxu0 }
  0xcf   :  { %108 = vst [vmem:[%s189_s3] sm:$0xff] %v94_v8  ;;  %v105_v10 = vadd.f32 %v134_v9, %v116_v4 }
  0xd0   :  { %v96_v11 = vpop.f32.mrf.mxu0 }
  0xd1   :  { %111 = vst [vmem:[%s189_s3 + $0x18] sm:$0xff] %v105_v10  ;;  %v97_v12 = vadd.f32 %v116_v4, %v96_v11 }
  0xd3   :  { %109 = vst [vmem:[%s189_s3 + $0x8] sm:$0xff] %v97_v12 }

// kernel: yolox_forward.46
= control target key start
LH: loop header
LB: loop body
LE: loop exit
PB: predicated region body
PF: predicated region fallthrough
CT: control target
= control target key end

     0   :  { %v117_v0 = vmov 0.0   ;;  %vm118_vm0 = vmmov 0   ;;  %vm45_vm1 = vcmask 261120   ;;  %s157_s1 = inlined_call_operand.vmem [shape: bf16[32,128], index: 1, kind: input, shape index: {}]   ;;  %s158_s0 = inlined_call_operand.vmem [shape: bf16[16,32], index: 0, kind: input, shape index: {}]   ;;  %s159_s2 = inlined_call_operand.vmem [shape: f32[1,128], index: 2, kind: input, shape index: {}]   ;;  %s160_s3 = inlined_call_operand.vmem [shape: f32[16,128], index: 3, kind: output, shape index: {}]  }
   0x1   :  { %104 = vmatprep.subr.bf16.mxu0 %v117_v0  ;;  %v114_v1 = vld [vmem:[%s157_s1 + $0x8] sm:$0xff]   ;;  %108 = vmatprep.mubr.msk.bf16.mxu0 %vm118_vm0, %v117_v0  ;;  %v115_v2 = vld [vmem:[%s157_s1] sm:$0xff]  }
   0x2   :  { %105 = vmatpush3.bf16.msra.mxu0 %v114_v1  ;;  %v116_v3 = vld [vmem:[%s158_s0] sm:$0xff]  }
   0x3   :  { %106 = vmatprep.subr.bf16.mxu0 %v117_v0  ;;  %v96_v4 = vld [vmem:[%s159_s2] ss:$0 sm:$0xff] }
   0x6   :  { %107 = vmatpush3.bf16.msra.mxu0 %v115_v2 }
   0x9   :  { %109 = vmatmul.mubr.msk.bf16.vlgmr.msra.gmra.mxu0 %vm45_vm1, %v116_v3 }
  0xc9   :  { %v83_v5 = vpop.f32.mrf.mxu0 }
  0xca   :  { %v84_v6 = vadd.f32 %v96_v4, %v83_v5 }
  0xcb   :  { %v110_v7 = vpop.f32.mrf.mxu0 }
  0xcc   :  { %90 = vst [vmem:[%s160_s3] sm:$0xff] %v84_v6 }
  0xcd   :  { %v86_v8 = vpop.f32.mrf.mxu0 }
  0xce   :  { %v87_v9 = vadd.f32 %v96_v4, %v86_v8 }
  0xcf   :  { %v111_v10 = vpop.f32.mrf.mxu0 }
  0xd0   :  { %91 = vst [vmem:[%s160_s3 + $0x8] sm:$0xff] %v87_v9 }

// kernel: yolox_forward.51
= control target key start
LH: loop header
LB: loop body
LE: loop exit
PB: predicated region body
PF: predicated region fallthrough
CT: control target
= control target key end

     0   :  { %v178_v0 = vmov 0   ;;  %v107_v34 = vlaneseq  ;;  %s265_s2 = inlined_call_operand.vmem [shape: f32[24,1], index: 2, kind: input, shape index: {}]   ;;  %s266_s0 = inlined_call_operand.vmem [shape: f32[2,24,128], index: 0, kind: input, shape index: {}]   ;;  %s267_s1 = inlined_call_operand.vmem [shape: f32[24,128], index: 1, kind: input, shape index: {}]   ;;  %s268_s3 = inlined_call_operand.vmem [shape: f32[2,24,128], index: 3, kind: output, shape index: {}]  }
   0x1   :  { %140 = vset.pattern.permute.xlu0 %v178_v0  ;;  %v23_v1 = vld [vmem:[%s265_s2] sm:$0xff]  ;;  %141 = vset.pattern.permute.xlu1 %v178_v0  ;;  %v25_v2 = vld [vmem:[%s265_s2 + $0x10] sm:$0xff]  ;;  %v24_v3 = vld [vmem:[%s265_s2 + $0x8] sm:$0xff] }
   0x2   :  { %34 = vperm.xlu0 %140, %v23_v1   ;;  %44 = vperm.xlu1 %141, %v25_v2   ;;  %v14_v4 = vld [vmem:[%s266_s0] sm:$0xff]  ;;  %v17_v5 = vld [vmem:[%s266_s0 + $0x18] sm:$0xff]  ;;  %v16_v6 = vld [vmem:[%s266_s0 + $0x10] sm:$0xff]  ;;  %v108_v40 = vand.u32 127, %v107_v34 }
   0x3   :  { %v133_v7 = vmul.f32 -1.442695, %v14_v4  ;;  %v19_v8 = vld [vmem:[%s266_s0 + $0x28] sm:$0xff]  ;;  %v136_v9 = vmul.f32 -1.442695, %v17_v5  ;;  %v18_v13 = vld [vmem:[%s266_s0 + $0x20] sm:$0xff] }
   0x4   :  { %v135_v10 = vmul.f32 -1.442695, %v16_v6  ;;  %v138_v11 = vmul.f32 -1.442695, %v19_v8  ;;  %v15_v12 = vld [vmem:[%s266_s0 + $0x8] sm:$0xff]  ;;  %v20_v36 = vld [vmem:[%s267_s1] sm:$0xff] }
   0x5   :  { %142 = vpow2.f32 %v133_v7  ;;  %v134_v14 = vmul.f32 -1.442695, %v15_v12  ;;  %v137_v15 = vmul.f32 -1.442695, %v18_v13  ;;  %v53_v16 = vmul.f32 1.442695, %v14_v4 }
   0x6   :  { %39 = vperm.xlu0 %140, %v24_v3   ;;  %144 = vpow2.f32 %v136_v9  ;;  %v59_v18 = vmul.f32 1.442695, %v17_v5  ;;  %v57_v20 = vmul.f32 1.442695, %v16_v6  ;;  %v63_v22 = vmul.f32 1.442695, %v19_v8 }
   0x7   :  { %146 = vpow2.f32 %v135_v10  ;;  %v55_v30 = vmul.f32 1.442695, %v15_v12  ;;  %v61_v31 = vmul.f32 1.442695, %v18_v13  ;;  %v22_v38 = vld [vmem:[%s267_s1 + $0x10] sm:$0xff]  ;;  %v26_v42 = vadd.f32 %v20_v36, %v14_v4  ;;  %v21_v44 = vld [vmem:[%s267_s1 + $0x8] sm:$0xff] }
   0x8   :  { %148 = vpow2.f32 %v138_v11  ;;  %v29_v43 = vadd.f32 %v20_v36, %v17_v5  ;;  %v28_v46 = vadd.f32 %v22_v38, %v16_v6  ;;  %v31_v47 = vadd.f32 %v22_v38, %v19_v8 }
   0x9   :  { %150 = vpow2.f32 %v134_v14  ;;  %vm109_vm0 = vcmp.lt.s32.totalorder %v108_v40, 2  ;;  %vm110_vm1 = vcmp.lt.s32.totalorder %v108_v40, 4  ;;  %v27_v52 = vadd.f32 %v21_v44, %v15_v12 }
   0xa   :  { %152 = vpow2.f32 %v137_v15  ;;  %v30_v53 = vadd.f32 %v21_v44, %v18_v13 }
   0xb   :  { %154 = vpow2.f32 %v53_v16 }
   0xc   :  { %156 = vpow2.f32 %v59_v18 }
   0xd   :  { %158 = vpow2.f32 %v57_v20 }
   0xe   :  { %160 = vpow2.f32 %v63_v22 }
  0x12   :  { %v143_v17 = vpop.eup %142 }
  0x13   :  { %v145_v19 = vpop.eup %144  ;;  %v89_v24 = vadd.f32 1.0, %v143_v17 }
  0x14   :  { %v147_v21 = vpop.eup %146  ;;  %v92_v25 = vadd.f32 1.0, %v145_v19 }
  0x15   :  { %v149_v23 = vpop.eup %148  ;;  %v91_v26 = vadd.f32 1.0, %v147_v21  ;;  %162 = vrcp.f32 %v89_v24 }
  0x16   :  { %v151_v27 = vpop.eup %150  ;;  %v94_v28 = vadd.f32 1.0, %v149_v23  ;;  %164 = vrcp.f32 %v92_v25 }
  0x17   :  { %v153_v29 = vpop.eup %152  ;;  %166 = vrcp.f32 %v91_v26  ;;  %v90_v32 = vadd.f32 1.0, %v151_v27 }
  0x18   :  { %168 = vrcp.f32 %v94_v28  ;;  %v93_v33 = vadd.f32 1.0, %v153_v29  ;;  %v155_v35 = vpop.eup %154 }
  0x19   :  { %170 = vpow2.f32 %v55_v30  ;;  %v157_v37 = vpop.eup %156 }
  0x1a   :  { %172 = vpow2.f32 %v61_v31  ;;  %v159_v39 = vpop.eup %158 }
  0x1b   :  { %174 = vrcp.f32 %v90_v32  ;;  %v161_v41 = vpop.eup %160 }
  0x1c   :  { %176 = vrcp.f32 %v93_v33 }
  0x22   :  { %v163_v45 = vpop.eup %162 }
  0x23   :  { %v165_v48 = vpop.eup %164 }
  0x24   :  { %v167_v49 = vpop.eup %166 }
  0x25   :  { %v169_v54 = vpop.eup %168 }
  0x26   :  { %v171_v59 = vpop.eup %170 }
  0x27   :  { %v173_v0 = vpop.eup %172 }
  0x28   :  { %v175_v3 = vpop.eup %174 }
  0x29   :  { %v177_v9 = vpop.eup %176 }
  0x7d   :  { %v35_v50 = vpop.permute.xlu0 %34  ;;  %v45_v51 = vpop.permute.xlu1 %44 }
  0x7e   :  { %v47_v55 = vmul.f32 %v35_v50, %v26_v42  ;;  %v50_v56 = vmul.f32 %v35_v50, %v29_v43  ;;  %v65_v57 = vmul.f32 %v155_v35, %v35_v50  ;;  %v68_v58 = vmul.f32 %v157_v37, %v35_v50 }
  0x7f   :  { %v49_v60 = vmul.f32 %v45_v51, %v28_v46  ;;  %v52_v61 = vmul.f32 %v45_v51, %v31_v47  ;;  %v67_v62 = vmul.f32 %v159_v39, %v45_v51  ;;  %v70_v63 = vmul.f32 %v161_v41, %v45_v51 }
  0x80   :  { %v111_v1 = vsel %vm110_vm1, %v65_v57, %v163_v45  ;;  %v114_v2 = vsel %vm110_vm1, %v68_v58, %v165_v48 }
  0x81   :  { %v117_v4 = vsel %vm109_vm0, %v47_v55, %v111_v1  ;;  %v120_v5 = vsel %vm109_vm0, %v50_v56, %v114_v2  ;;  %v113_v6 = vsel %vm110_vm1, %v67_v62, %v167_v49  ;;  %v116_v7 = vsel %vm110_vm1, %v70_v63, %v169_v54  ;;  %v40_v8 = vpop.permute.xlu0 %39 }
  0x82   :  { %123 = vst [vmem:[%s268_s3] sm:$0xff] %v117_v4  ;;  %126 = vst [vmem:[%s268_s3 + $0x18] sm:$0xff] %v120_v5  ;;  %v119_v10 = vsel %vm109_vm0, %v49_v60, %v113_v6  ;;  %v122_v11 = vsel %vm109_vm0, %v52_v61, %v116_v7  ;;  %v48_v12 = vmul.f32 %v40_v8, %v27_v52 }
  0x83   :  { %v51_v13 = vmul.f32 %v40_v8, %v30_v53  ;;  %125 = vst [vmem:[%s268_s3 + $0x10] sm:$0xff] %v119_v10  ;;  %128 = vst [vmem:[%s268_s3 + $0x28] sm:$0xff] %v122_v11  ;;  %v66_v14 = vmul.f32 %v171_v59, %v40_v8  ;;  %v69_v15 = vmul.f32 %v173_v0, %v40_v8 }
  0x85   :  { %v112_v16 = vsel %vm110_vm1, %v66_v14, %v175_v3  ;;  %v115_v17 = vsel %vm110_vm1, %v69_v15, %v177_v9 }
  0x86   :  { %v118_v18 = vsel %vm109_vm0, %v48_v12, %v112_v16  ;;  %v121_v19 = vsel %vm109_vm0, %v51_v13, %v115_v17 }
  0x87   :  { %124 = vst [vmem:[%s268_s3 + $0x8] sm:$0xff] %v118_v18  ;;  %127 = vst [vmem:[%s268_s3 + $0x20] sm:$0xff] %v121_v19 }

</bundles_post_ra>
